<compile_context>
chip_gen: v7x
topology: tpu7x:2x2x1
jax: 0.10.0
libtpu: 0.0.40
codegen_flags: <defaults>
</compile_context>

<pallas_src>
import numpy as np
import jax
import jax.numpy as jnp
from jax import lax
from jax.experimental import pallas as pl
from jax.experimental.pallas import tpu as pltpu


# --------------------------------------------------------------------------
# Host-side constant builders (built once at parameter-setup time)
# --------------------------------------------------------------------------
def _bilinear_matrix(out_size, in_size):
    """PyTorch F.interpolate(mode='bilinear', align_corners=False) as a matrix."""
    m = np.zeros((out_size, in_size), dtype=np.float32)
    scale = in_size / out_size
    for o in range(out_size):
        src = (o + 0.5) * scale - 0.5
        src = max(src, 0.0)
        i0 = min(int(np.floor(src)), in_size - 1)
        i1 = min(i0 + 1, in_size - 1)
        lam = src - i0
        m[o, i0] += 1.0 - lam
        m[o, i1] += lam
    return m


def _kron_resize_matrix(out_size, in_h, in_w):
    """x_flat (C, H*W) @ R -> (C, P*P) bilinear resize, R = kron(Ry, Rx)^T."""
    ry = _bilinear_matrix(out_size, in_h)          # (P, H)
    rx = _bilinear_matrix(out_size, in_w)          # (P, W)
    rk = np.kron(ry, rx)                           # (P*P, H*W)
    return jnp.asarray(rk.T)                       # (H*W, P*P)


def _conv3x3_masks(h, w):
    """(9, H*W) 0/1 masks: tap t=(oy+1)*3+(ox+1) in-bounds at pixel p=y*W+x."""
    m = np.zeros((9, h * w), dtype=np.float32)
    t = 0
    for oy in (-1, 0, 1):
        for ox in (-1, 0, 1):
            for y in range(h):
                for x in range(w):
                    if 0 <= y + oy < h and 0 <= x + ox < w:
                        m[t, y * w + x] = 1.0
            t += 1
    return jnp.asarray(m)


# --------------------------------------------------------------------------
# Parameters
# --------------------------------------------------------------------------
def make_raw_params(key, in_channels, hidden_channels, num_prototypes):
    """PyTorch-style raw parameters (OIHW conv weights, conv bias, BN stats)."""
    keys = jax.random.split(key, 5)
    raw = {}
    dims = [(in_channels, hidden_channels)] + [(hidden_channels, hidden_channels)] * 3
    for i, (cin, cout) in enumerate(dims, start=1):
        fan_in = 9 * cin
        raw[f"w{i}"] = (jax.random.normal(keys[i - 1], (cout, cin, 3, 3), jnp.float32)
                        / np.sqrt(fan_in))
        raw[f"b{i}"] = 0.01 * jnp.arange(cout, dtype=jnp.float32)
        raw[f"gamma{i}"] = 1.0 + 0.01 * jnp.arange(cout, dtype=jnp.float32)
        raw[f"beta{i}"] = 0.02 * jnp.arange(cout, dtype=jnp.float32)
        raw[f"mean{i}"] = 0.05 * jnp.arange(cout, dtype=jnp.float32)
        raw[f"var{i}"] = 1.0 + 0.03 * jnp.arange(cout, dtype=jnp.float32)
    raw["w5"] = (jax.random.normal(keys[4], (num_prototypes, hidden_channels, 1, 1),
                                   jnp.float32) / np.sqrt(hidden_channels))
    raw["b5"] = 0.01 * jnp.arange(num_prototypes, dtype=jnp.float32)
    return raw


def prepare_kernel_params(raw, h, w, proto_dim, eps=1e-5):
    """Fold BN, flatten conv weights to (Cout, 9*Cin_pad), precompute resize/masks."""
    p = {}
    cin = int(raw["w1"].shape[1])
    cin_pad = int(np.ceil(cin / 8) * 8)             # sublane-align conv1 patch rows
    p["cin_pad"] = cin_pad
    for i in range(1, 5):
        wt = raw[f"w{i}"]                            # (Cout, Cin, 3, 3)
        co, ci = int(wt.shape[0]), int(wt.shape[1])
        # tap-major (ky, kx), channel-minor ordering -> matches in-kernel im2col
        wt = jnp.transpose(wt, (0, 2, 3, 1))         # (Cout, ky, kx, Cin)
        if i == 1 and cin_pad != ci:
            wt = jnp.pad(wt, ((0, 0), (0, 0), (0, 0), (0, cin_pad - ci)))
            ci = cin_pad
        p[f"w{i}"] = wt.reshape(co, 9 * ci)
        scale = raw[f"gamma{i}"] / jnp.sqrt(raw[f"var{i}"] + eps)
        shift = raw[f"beta{i}"] + (raw[f"b{i}"] - raw[f"mean{i}"]) * scale
        p[f"scale{i}"] = scale.reshape(-1, 1)        # (Cout, 1) channels-first
        p[f"shift{i}"] = shift.reshape(-1, 1)
    p["w5"] = raw["w5"][:, :, 0, 0]                  # (Np, Ch)
    p["b5"] = raw["b5"].reshape(-1, 1)               # (Np, 1)
    p["rk"] = _kron_resize_matrix(proto_dim, h, w)   # (H*W, P*P)
    p["maskA"] = _conv3x3_masks(h, w)                # (9, H*W)
    p["maskB"] = _conv3x3_masks(proto_dim, proto_dim)  # (9, P*P)
    return p


# --------------------------------------------------------------------------
# Fused Pallas kernel
# --------------------------------------------------------------------------
def protonet_forward(x_nchw, kp, proto_dim, images_per_step=None,
                     matmul_dtype=jnp.float32):
    """x_nchw: (N, Cin, H, W) f32 -> (N, num_prototypes, P, P) f32.

    images_per_step: images stacked along the lane axis per grid step.
      None -> fold the whole batch into one step (best on single-TC v5e/v6e).
      On v7x, pass N // 2 so two "parallel" grid steps shard across the 2 TCs.
    matmul_dtype: cast MXU operands (weights / patch / rk) to this dtype
      (accumulation stays f32).  bf16 gives ~3x MXU throughput at realistic
      channel counts; f32 default keeps the tight toy-size tolerance.
    """
    n, cin, h, w = x_nchw.shape
    cin_pad = kp["cin_pad"]
    ch = kp["w2"].shape[0]
    npr = kp["w5"].shape[0]
    hw = h * w
    pp = proto_dim * proto_dim

    b = n if images_per_step is None else int(images_per_step)
    assert n % b == 0, "images_per_step must divide the batch"
    g = n // b                                       # grid steps
    bhw = b * hw                                     # stacked lane width, conv1-3
    bpp = b * pp                                     # stacked lane width, conv4-5
    md = matmul_dtype

    # Channels-first, image-major lane stacking (wrapper-side layout plumbing).
    xr = x_nchw.reshape(g, b, cin, hw)
    if cin_pad != cin:
        xr = jnp.pad(xr, ((0, 0), (0, 0), (0, cin_pad - cin), (0, 0)))
    x_lane = jnp.transpose(xr, (0, 2, 1, 3)).reshape(g, cin_pad, bhw)

    # Masks tiled per image: every cross-image roll wrap is a masked boundary tap.
    mask_a = jnp.tile(kp["maskA"], (1, b))           # (9, B*H*W)
    mask_b = jnp.tile(kp["maskB"], (1, b))           # (9, B*P*P)

    prow = 9 * max(cin_pad, ch)                      # shared patch scratch rows
    pcol = max(bhw, bpp)                             # shared patch scratch width

    def kernel(x_ref,
               w1, sc1, sh1, w2, sc2, sh2, w3, sc3, sh3,
               rk, w4, sc4, sh4, w5, b5, m_a, m_b,
               o_ref,
               patch):

        def conv3x3(x, w_ref, sc_ref, sh_ref, m_ref, img_w, ncols):
            # x: (C, ncols) channels-first, B images stacked along lanes.
            # Roll-based im2col: per tap, one XLU lane-roll + mask, one
            # full-width lane-aligned store; then ONE MXU matmul.
            c = x.shape[0]
            tap = 0
            for oy in (-1, 0, 1):
                for ox in (-1, 0, 1):
                    s = oy * img_w + ox              # flat source-pixel shift
                    if s == 0:
                        val = x                      # center tap: mask is all-ones
                    else:
                        # want col p <- x[:, p + s]; np.roll semantics => shift=-s
                        val = (pltpu.roll(x, (-s) % ncols, axis=1)
                               * m_ref[tap:tap + 1, :])
                    patch[tap * c:(tap + 1) * c, 0:ncols] = val
                    tap += 1
            y = jnp.dot(w_ref[...].astype(md),
                        patch[0:9 * c, 0:ncols].astype(md),
                        preferred_element_type=jnp.float32)   # (Cout, ncols)
            y = y * sc_ref[...] + sh_ref[...]                  # folded BN (f32)
            return jnp.maximum(y, 0.0)

        a = x_ref[0]                                           # (Cin_pad, B*H*W)
        a = conv3x3(a, w1, sc1, sh1, m_a, w, bhw)
        a = conv3x3(a, w2, sc2, sh2, m_a, w, bhw)
        a = conv3x3(a, w3, sc3, sh3, m_a, w, bhw)
        # Bilinear resize (align_corners=False): kron(Ry,Rx)^T matmul, per image
        # on lane-aligned H*W-wide slices of the stacked activation.
        rk_v = rk[...].astype(md)
        parts = [jnp.dot(a[:, bi * hw:(bi + 1) * hw].astype(md), rk_v,
                         preferred_element_type=jnp.float32)   # (Ch, P*P)
                 for bi in range(b)]
        a = parts[0] if b == 1 else jnp.concatenate(parts, axis=-1)  # (Ch, B*P*P)
        a = conv3x3(a, w4, sc4, sh4, m_b, proto_dim, bpp)
        y = jnp.dot(w5[...].astype(md), a.astype(md),
                    preferred_element_type=jnp.float32) + b5[...]
        o_ref[0] = jnp.maximum(y, 0.0)               # lane-dense (Np, B*P*P)

    def const_spec(arr):
        nd = arr.ndim
        return pl.BlockSpec(arr.shape, lambda i, nd=nd: (0,) * nd)

    inputs = (x_lane,
              kp["w1"], kp["scale1"], kp["shift1"],
              kp["w2"], kp["scale2"], kp["shift2"],
              kp["w3"], kp["scale3"], kp["shift3"],
              kp["rk"],
              kp["w4"], kp["scale4"], kp["shift4"],
              kp["w5"], kp["b5"],
              mask_a, mask_b)
    in_specs = ([pl.BlockSpec((1, cin_pad, bhw), lambda i: (i, 0, 0))]
                + [const_spec(a) for a in inputs[1:]])

    out = pl.pallas_call(
        kernel,
        out_shape=jax.ShapeDtypeStruct((g, npr, bpp), jnp.float32),
        grid=(g,),
        in_specs=in_specs,
        out_specs=pl.BlockSpec((1, npr, bpp), lambda i: (i, 0, 0)),
        scratch_shapes=[
            pltpu.VMEM((prow, pcol), jnp.float32),   # single shared patch scratch
        ],
        compiler_params=pltpu.CompilerParams(
            dimension_semantics=("parallel",)),      # shards grid steps over TCs
    )(*inputs)

    # (G, Np, B*P*P) -> (N, Np, P, P)   (tiny wrapper-side layout plumbing)
    out = out.reshape(g, npr, b, pp)
    out = jnp.transpose(out, (0, 2, 1, 3)).reshape(n, npr, proto_dim, proto_dim)
    return out


# --------------------------------------------------------------------------
# Pure-JAX reference (XLA, HIGHEST precision) for correctness checking
# --------------------------------------------------------------------------
def protonet_reference(x_nchw, raw, proto_dim, eps=1e-5):
    dn = ("NCHW", "OIHW", "NCHW")
    hp = lax.Precision.HIGHEST

    def conv_bn_relu(x, i):
        y = lax.conv_general_dilated(x, raw[f"w{i}"], (1, 1), ((1, 1), (1, 1)),
                                     dimension_numbers=dn, precision=hp)
        y = y + raw[f"b{i}"].reshape(1, -1, 1, 1)
        g = raw[f"gamma{i}"].reshape(1, -1, 1, 1)
        bt = raw[f"beta{i}"].reshape(1, -1, 1, 1)
        mu = raw[f"mean{i}"].reshape(1, -1, 1, 1)
        var = raw[f"var{i}"].reshape(1, -1, 1, 1)
        y = (y - mu) / jnp.sqrt(var + eps) * g + bt
        return jnp.maximum(y, 0.0)

    x = conv_bn_relu(x_nchw, 1)
    x = conv_bn_relu(x, 2)
    x = conv_bn_relu(x, 3)
    ry = jnp.asarray(_bilinear_matrix(proto_dim, x.shape[2]))
    rx = jnp.asarray(_bilinear_matrix(proto_dim, x.shape[3]))
    x = jnp.einsum("oh,nchw->ncow", ry, x, precision=hp)
    x = jnp.einsum("pw,ncow->ncop", rx, x, precision=hp)
    x = conv_bn_relu(x, 4)
    y = lax.conv_general_dilated(x, raw["w5"], (1, 1), ((0, 0), (0, 0)),
                                 dimension_numbers=dn, precision=hp)
    y = y + raw["b5"].reshape(1, -1, 1, 1)
    return jnp.maximum(y, 0.0)


# --------------------------------------------------------------------------
if __name__ == "__main__":
    # Small shapes consistent with the module:
    #   in_channels=4, hidden_channels=8, spatial=16, proto_dim=32, num_prototypes=8
    N, CIN, H, W = 2, 4, 16, 16
    HIDDEN, PROTO_DIM, NUM_PROTO = 8, 32, 8

    key = jax.random.PRNGKey(0)
    kx, kparam = jax.random.split(key)
    x = jax.random.normal(kx, (N, CIN, H, W), jnp.float32)

    raw = make_raw_params(kparam, CIN, HIDDEN, NUM_PROTO)
    kparams = prepare_kernel_params(raw, H, W, PROTO_DIM)

    # Default: whole batch folded into one lane-stacked grid step.
    # (On v7x, call with images_per_step=N // 2 to occupy both TensorCores.)
    out = protonet_forward(x, kparams, PROTO_DIM)
    out = jax.block_until_ready(out)

    assert out.shape == (N, NUM_PROTO, PROTO_DIM, PROTO_DIM), out.shape
    assert bool(jnp.all(jnp.isfinite(out)))
    assert bool(jnp.all(out >= 0.0))  # final ReLU

    ref = jax.block_until_ready(protonet_reference(x, raw, PROTO_DIM))
    max_err = float(jnp.max(jnp.abs(out - ref)))
    assert max_err < 1e-3, f"max abs error vs reference: {max_err}"

    print("KERNEL_OK")
</pallas_src>

<mosaic_0001>
module attributes {stable_mosaic.version = 11 : i64} {
  func.func @kernel(%arg0: i32, %arg1: memref<1x8x512xf32, #tpu.memory_space<vmem>>, %arg2: memref<8x72xf32, #tpu.memory_space<vmem>>, %arg3: memref<8x1xf32, #tpu.memory_space<vmem>>, %arg4: memref<8x1xf32, #tpu.memory_space<vmem>>, %arg5: memref<8x72xf32, #tpu.memory_space<vmem>>, %arg6: memref<8x1xf32, #tpu.memory_space<vmem>>, %arg7: memref<8x1xf32, #tpu.memory_space<vmem>>, %arg8: memref<8x72xf32, #tpu.memory_space<vmem>>, %arg9: memref<8x1xf32, #tpu.memory_space<vmem>>, %arg10: memref<8x1xf32, #tpu.memory_space<vmem>>, %arg11: memref<256x1024xf32, #tpu.memory_space<vmem>>, %arg12: memref<8x72xf32, #tpu.memory_space<vmem>>, %arg13: memref<8x1xf32, #tpu.memory_space<vmem>>, %arg14: memref<8x1xf32, #tpu.memory_space<vmem>>, %arg15: memref<8x8xf32, #tpu.memory_space<vmem>>, %arg16: memref<8x1xf32, #tpu.memory_space<vmem>>, %arg17: memref<9x512xf32, #tpu.memory_space<vmem>>, %arg18: memref<9x2048xf32, #tpu.memory_space<vmem>>, %arg19: memref<1x8x2048xf32, #tpu.memory_space<vmem>>, %arg20: memref<72x2048xf32, #tpu.memory_space<vmem>>) attributes {dimension_semantics = [#tpu.dimension_semantics<parallel>], iteration_bounds = array<i64: 1>, scalar_prefetch = 0 : i64, scratch_operands = 1 : i64, tpu.core_type = #tpu.core_type<tc>, window_params = [{transform_indices = @transform_0, window_bounds = array<i64: 1, 8, 512>}, {pipeline_mode = #tpu.pipeline_mode<synchronous>, transform_indices = @transform_1, window_bounds = array<i64: 8, 72>}, {pipeline_mode = #tpu.pipeline_mode<synchronous>, transform_indices = @transform_2, window_bounds = array<i64: 8, 1>}, {pipeline_mode = #tpu.pipeline_mode<synchronous>, transform_indices = @transform_3, window_bounds = array<i64: 8, 1>}, {pipeline_mode = #tpu.pipeline_mode<synchronous>, transform_indices = @transform_4, window_bounds = array<i64: 8, 72>}, {pipeline_mode = #tpu.pipeline_mode<synchronous>, transform_indices = @transform_5, window_bounds = array<i64: 8, 1>}, {pipeline_mode = #tpu.pipeline_mode<synchronous>, transform_indices = @transform_6, window_bounds = array<i64: 8, 1>}, {pipeline_mode = #tpu.pipeline_mode<synchronous>, transform_indices = @transform_7, window_bounds = array<i64: 8, 72>}, {pipeline_mode = #tpu.pipeline_mode<synchronous>, transform_indices = @transform_8, window_bounds = array<i64: 8, 1>}, {pipeline_mode = #tpu.pipeline_mode<synchronous>, transform_indices = @transform_9, window_bounds = array<i64: 8, 1>}, {pipeline_mode = #tpu.pipeline_mode<synchronous>, transform_indices = @transform_10, window_bounds = array<i64: 256, 1024>}, {pipeline_mode = #tpu.pipeline_mode<synchronous>, transform_indices = @transform_11, window_bounds = array<i64: 8, 72>}, {pipeline_mode = #tpu.pipeline_mode<synchronous>, transform_indices = @transform_12, window_bounds = array<i64: 8, 1>}, {pipeline_mode = #tpu.pipeline_mode<synchronous>, transform_indices = @transform_13, window_bounds = array<i64: 8, 1>}, {pipeline_mode = #tpu.pipeline_mode<synchronous>, transform_indices = @transform_14, window_bounds = array<i64: 8, 8>}, {pipeline_mode = #tpu.pipeline_mode<synchronous>, transform_indices = @transform_15, window_bounds = array<i64: 8, 1>}, {pipeline_mode = #tpu.pipeline_mode<synchronous>, transform_indices = @transform_16, window_bounds = array<i64: 9, 512>}, {pipeline_mode = #tpu.pipeline_mode<synchronous>, transform_indices = @transform_17, window_bounds = array<i64: 9, 2048>}, {transform_indices = @transform_18, window_bounds = array<i64: 1, 8, 2048>}]} {
    %c0 = arith.constant 0 : index
    %c0_0 = arith.constant 0 : index
    %c0_1 = arith.constant 0 : index
    %0 = vector.load %arg1[%c0, %c0_0, %c0_1] : memref<1x8x512xf32, #tpu.memory_space<vmem>>, vector<1x8x512xf32>
    %1 = vector.shape_cast %0 : vector<1x8x512xf32> to vector<8x512xf32>
    %c17_i32 = arith.constant 17 : i32
    %2 = tpu.dynamic_rotate %1 by %c17_i32 dim 1 : vector<8x512xf32>, i32 -> vector<8x512xf32>
    %c0_2 = arith.constant 0 : index
    %c0_3 = arith.constant 0 : index
    %3 = vector.load %arg17[%c0_2, %c0_3] : memref<9x512xf32, #tpu.memory_space<vmem>>, vector<1x512xf32>
    %4 = vector.broadcast %3 : vector<1x512xf32> to vector<8x512xf32>
    %5 = arith.mulf %2, %4 : vector<8x512xf32>
    %c0_4 = arith.constant 0 : index
    %c0_5 = arith.constant 0 : index
    %6 = vector.load %arg20[%c0_4, %c0_5] : memref<72x2048xf32, #tpu.memory_space<vmem>>, vector<8x512xf32>
    tpu.vector_store %arg20[%c0_4, %c0_5], %5 {strides = array<i32>} : memref<72x2048xf32, #tpu.memory_space<vmem>>, vector<8x512xf32>,
    %c16_i32 = arith.constant 16 : i32
    %7 = tpu.dynamic_rotate %1 by %c16_i32 dim 1 : vector<8x512xf32>, i32 -> vector<8x512xf32>
    %c1 = arith.constant 1 : index
    %c0_6 = arith.constant 0 : index
    %8 = vector.load %arg17[%c1, %c0_6] : memref<9x512xf32, #tpu.memory_space<vmem>>, vector<1x512xf32>
    %9 = vector.broadcast %8 : vector<1x512xf32> to vector<8x512xf32>
    %10 = arith.mulf %7, %9 : vector<8x512xf32>
    %c8 = arith.constant 8 : index
    %c0_7 = arith.constant 0 : index
    %11 = vector.load %arg20[%c8, %c0_7] : memref<72x2048xf32, #tpu.memory_space<vmem>>, vector<8x512xf32>
    tpu.vector_store %arg20[%c8, %c0_7], %10 {strides = array<i32>} : memref<72x2048xf32, #tpu.memory_space<vmem>>, vector<8x512xf32>,
    %c15_i32 = arith.constant 15 : i32
    %12 = tpu.dynamic_rotate %1 by %c15_i32 dim 1 : vector<8x512xf32>, i32 -> vector<8x512xf32>
    %c2 = arith.constant 2 : index
    %c0_8 = arith.constant 0 : index
    %13 = vector.load %arg17[%c2, %c0_8] : memref<9x512xf32, #tpu.memory_space<vmem>>, vector<1x512xf32>
    %14 = vector.broadcast %13 : vector<1x512xf32> to vector<8x512xf32>
    %15 = arith.mulf %12, %14 : vector<8x512xf32>
    %c16 = arith.constant 16 : index
    %c0_9 = arith.constant 0 : index
    %16 = vector.load %arg20[%c16, %c0_9] : memref<72x2048xf32, #tpu.memory_space<vmem>>, vector<8x512xf32>
    tpu.vector_store %arg20[%c16, %c0_9], %15 {strides = array<i32>} : memref<72x2048xf32, #tpu.memory_space<vmem>>, vector<8x512xf32>,
    %c1_i32 = arith.constant 1 : i32
    %17 = tpu.dynamic_rotate %1 by %c1_i32 dim 1 : vector<8x512xf32>, i32 -> vector<8x512xf32>
    %c3 = arith.constant 3 : index
    %c0_10 = arith.constant 0 : index
    %18 = vector.load %arg17[%c3, %c0_10] : memref<9x512xf32, #tpu.memory_space<vmem>>, vector<1x512xf32>
    %19 = vector.broadcast %18 : vector<1x512xf32> to vector<8x512xf32>
    %20 = arith.mulf %17, %19 : vector<8x512xf32>
    %c24 = arith.constant 24 : index
    %c0_11 = arith.constant 0 : index
    %21 = vector.load %arg20[%c24, %c0_11] : memref<72x2048xf32, #tpu.memory_space<vmem>>, vector<8x512xf32>
    tpu.vector_store %arg20[%c24, %c0_11], %20 {strides = array<i32>} : memref<72x2048xf32, #tpu.memory_space<vmem>>, vector<8x512xf32>,
    %c32 = arith.constant 32 : index
    %c0_12 = arith.constant 0 : index
    %22 = vector.load %arg20[%c32, %c0_12] : memref<72x2048xf32, #tpu.memory_space<vmem>>, vector<8x512xf32>
    tpu.vector_store %arg20[%c32, %c0_12], %1 {strides = array<i32>} : memref<72x2048xf32, #tpu.memory_space<vmem>>, vector<8x512xf32>,
    %c511_i32 = arith.constant 511 : i32
    %23 = tpu.dynamic_rotate %1 by %c511_i32 dim 1 : vector<8x512xf32>, i32 -> vector<8x512xf32>
    %c5 = arith.constant 5 : index
    %c0_13 = arith.constant 0 : index
    %24 = vector.load %arg17[%c5, %c0_13] : memref<9x512xf32, #tpu.memory_space<vmem>>, vector<1x512xf32>
    %25 = vector.broadcast %24 : vector<1x512xf32> to vector<8x512xf32>
    %26 = arith.mulf %23, %25 : vector<8x512xf32>
    %c40 = arith.constant 40 : index
    %c0_14 = arith.constant 0 : index
    %27 = vector.load %arg20[%c40, %c0_14] : memref<72x2048xf32, #tpu.memory_space<vmem>>, vector<8x512xf32>
    tpu.vector_store %arg20[%c40, %c0_14], %26 {strides = array<i32>} : memref<72x2048xf32, #tpu.memory_space<vmem>>, vector<8x512xf32>,
    %c497_i32 = arith.constant 497 : i32
    %28 = tpu.dynamic_rotate %1 by %c497_i32 dim 1 : vector<8x512xf32>, i32 -> vector<8x512xf32>
    %c6 = arith.constant 6 : index
    %c0_15 = arith.constant 0 : index
    %29 = vector.load %arg17[%c6, %c0_15] : memref<9x512xf32, #tpu.memory_space<vmem>>, vector<1x512xf32>
    %30 = vector.broadcast %29 : vector<1x512xf32> to vector<8x512xf32>
    %31 = arith.mulf %28, %30 : vector<8x512xf32>
    %c48 = arith.constant 48 : index
    %c0_16 = arith.constant 0 : index
    %32 = vector.load %arg20[%c48, %c0_16] : memref<72x2048xf32, #tpu.memory_space<vmem>>, vector<8x512xf32>
    tpu.vector_store %arg20[%c48, %c0_16], %31 {strides = array<i32>} : memref<72x2048xf32, #tpu.memory_space<vmem>>, vector<8x512xf32>,
    %c496_i32 = arith.constant 496 : i32
    %33 = tpu.dynamic_rotate %1 by %c496_i32 dim 1 : vector<8x512xf32>, i32 -> vector<8x512xf32>
    %c7 = arith.constant 7 : index
    %c0_17 = arith.constant 0 : index
    %34 = vector.load %arg17[%c7, %c0_17] : memref<9x512xf32, #tpu.memory_space<vmem>>, vector<1x512xf32>
    %35 = vector.broadcast %34 : vector<1x512xf32> to vector<8x512xf32>
    %36 = arith.mulf %33, %35 : vector<8x512xf32>
    %c56 = arith.constant 56 : index
    %c0_18 = arith.constant 0 : index
    %37 = vector.load %arg20[%c56, %c0_18] : memref<72x2048xf32, #tpu.memory_space<vmem>>, vector<8x512xf32>
    tpu.vector_store %arg20[%c56, %c0_18], %36 {strides = array<i32>} : memref<72x2048xf32, #tpu.memory_space<vmem>>, vector<8x512xf32>,
    %c495_i32 = arith.constant 495 : i32
    %38 = tpu.dynamic_rotate %1 by %c495_i32 dim 1 : vector<8x512xf32>, i32 -> vector<8x512xf32>
    %c8_19 = arith.constant 8 : index
    %c0_20 = arith.constant 0 : index
    %39 = vector.load %arg17[%c8_19, %c0_20] : memref<9x512xf32, #tpu.memory_space<vmem>>, vector<1x512xf32>
    %40 = vector.broadcast %39 : vector<1x512xf32> to vector<8x512xf32>
    %41 = arith.mulf %38, %40 : vector<8x512xf32>
    %c64 = arith.constant 64 : index
    %c0_21 = arith.constant 0 : index
    %42 = vector.load %arg20[%c64, %c0_21] : memref<72x2048xf32, #tpu.memory_space<vmem>>, vector<8x512xf32>
    tpu.vector_store %arg20[%c64, %c0_21], %41 {strides = array<i32>} : memref<72x2048xf32, #tpu.memory_space<vmem>>, vector<8x512xf32>,
    %c0_22 = arith.constant 0 : index
    %c0_23 = arith.constant 0 : index
    %43 = vector.load %arg2[%c0_22, %c0_23] : memref<8x72xf32, #tpu.memory_space<vmem>>, vector<8x72xf32>
    %c0_24 = arith.constant 0 : index
    %c0_25 = arith.constant 0 : index
    %44 = vector.load %arg20[%c0_24, %c0_25] : memref<72x2048xf32, #tpu.memory_space<vmem>>, vector<72x512xf32>
    %cst = arith.constant dense<0.000000e+00> : vector<8x512xf32>
    %45 = tpu.matmul %43, %44, %cst {dimension_numbers = #tpu.dot_dimension_numbers<[1], [0], [0], [1], [0, 0, 1, 1], [], []>} : vector<8x72xf32>, vector<72x512xf32>, vector<8x512xf32> -> vector<8x512xf32>
    %c0_26 = arith.constant 0 : index
    %c0_27 = arith.constant 0 : index
    %46 = vector.load %arg3[%c0_26, %c0_27] : memref<8x1xf32, #tpu.memory_space<vmem>>, vector<8x1xf32>
    %47 = vector.broadcast %46 : vector<8x1xf32> to vector<8x512xf32>
    %48 = arith.mulf %45, %47 : vector<8x512xf32>
    %c0_28 = arith.constant 0 : index
    %c0_29 = arith.constant 0 : index
    %49 = vector.load %arg4[%c0_28, %c0_29] : memref<8x1xf32, #tpu.memory_space<vmem>>, vector<8x1xf32>
    %50 = vector.broadcast %49 : vector<8x1xf32> to vector<8x512xf32>
    %51 = arith.addf %48, %50 : vector<8x512xf32>
    %cst_30 = arith.constant 0.000000e+00 : f32
    %52 = vector.broadcast %cst_30 : f32 to vector<8x512xf32>
    %53 = arith.maximumf %51, %52 : vector<8x512xf32>
    %c17_i32_31 = arith.constant 17 : i32
    %54 = tpu.dynamic_rotate %53 by %c17_i32_31 dim 1 : vector<8x512xf32>, i32 -> vector<8x512xf32>
    %c0_32 = arith.constant 0 : index
    %c0_33 = arith.constant 0 : index
    %55 = vector.load %arg17[%c0_32, %c0_33] : memref<9x512xf32, #tpu.memory_space<vmem>>, vector<1x512xf32>
    %56 = vector.broadcast %55 : vector<1x512xf32> to vector<8x512xf32>
    %57 = arith.mulf %54, %56 : vector<8x512xf32>
    %c0_34 = arith.constant 0 : index
    %c0_35 = arith.constant 0 : index
    %58 = vector.load %arg20[%c0_34, %c0_35] : memref<72x2048xf32, #tpu.memory_space<vmem>>, vector<8x512xf32>
    tpu.vector_store %arg20[%c0_34, %c0_35], %57 {strides = array<i32>} : memref<72x2048xf32, #tpu.memory_space<vmem>>, vector<8x512xf32>,
    %c16_i32_36 = arith.constant 16 : i32
    %59 = tpu.dynamic_rotate %53 by %c16_i32_36 dim 1 : vector<8x512xf32>, i32 -> vector<8x512xf32>
    %c1_37 = arith.constant 1 : index
    %c0_38 = arith.constant 0 : index
    %60 = vector.load %arg17[%c1_37, %c0_38] : memref<9x512xf32, #tpu.memory_space<vmem>>, vector<1x512xf32>
    %61 = vector.broadcast %60 : vector<1x512xf32> to vector<8x512xf32>
    %62 = arith.mulf %59, %61 : vector<8x512xf32>
    %c8_39 = arith.constant 8 : index
    %c0_40 = arith.constant 0 : index
    %63 = vector.load %arg20[%c8_39, %c0_40] : memref<72x2048xf32, #tpu.memory_space<vmem>>, vector<8x512xf32>
    tpu.vector_store %arg20[%c8_39, %c0_40], %62 {strides = array<i32>} : memref<72x2048xf32, #tpu.memory_space<vmem>>, vector<8x512xf32>,
    %c15_i32_41 = arith.constant 15 : i32
    %64 = tpu.dynamic_rotate %53 by %c15_i32_41 dim 1 : vector<8x512xf32>, i32 -> vector<8x512xf32>
    %c2_42 = arith.constant 2 : index
    %c0_43 = arith.constant 0 : index
    %65 = vector.load %arg17[%c2_42, %c0_43] : memref<9x512xf32, #tpu.memory_space<vmem>>, vector<1x512xf32>
    %66 = vector.broadcast %65 : vector<1x512xf32> to vector<8x512xf32>
    %67 = arith.mulf %64, %66 : vector<8x512xf32>
    %c16_44 = arith.constant 16 : index
    %c0_45 = arith.constant 0 : index
    %68 = vector.load %arg20[%c16_44, %c0_45] : memref<72x2048xf32, #tpu.memory_space<vmem>>, vector<8x512xf32>
    tpu.vector_store %arg20[%c16_44, %c0_45], %67 {strides = array<i32>} : memref<72x2048xf32, #tpu.memory_space<vmem>>, vector<8x512xf32>,
    %c1_i32_46 = arith.constant 1 : i32
    %69 = tpu.dynamic_rotate %53 by %c1_i32_46 dim 1 : vector<8x512xf32>, i32 -> vector<8x512xf32>
    %c3_47 = arith.constant 3 : index
    %c0_48 = arith.constant 0 : index
    %70 = vector.load %arg17[%c3_47, %c0_48] : memref<9x512xf32, #tpu.memory_space<vmem>>, vector<1x512xf32>
    %71 = vector.broadcast %70 : vector<1x512xf32> to vector<8x512xf32>
    %72 = arith.mulf %69, %71 : vector<8x512xf32>
    %c24_49 = arith.constant 24 : index
    %c0_50 = arith.constant 0 : index
    %73 = vector.load %arg20[%c24_49, %c0_50] : memref<72x2048xf32, #tpu.memory_space<vmem>>, vector<8x512xf32>
    tpu.vector_store %arg20[%c24_49, %c0_50], %72 {strides = array<i32>} : memref<72x2048xf32, #tpu.memory_space<vmem>>, vector<8x512xf32>,
    %c32_51 = arith.constant 32 : index
    %c0_52 = arith.constant 0 : index
    %74 = vector.load %arg20[%c32_51, %c0_52] : memref<72x2048xf32, #tpu.memory_space<vmem>>, vector<8x512xf32>
    tpu.vector_store %arg20[%c32_51, %c0_52], %53 {strides = array<i32>} : memref<72x2048xf32, #tpu.memory_space<vmem>>, vector<8x512xf32>,
    %c511_i32_53 = arith.constant 511 : i32
    %75 = tpu.dynamic_rotate %53 by %c511_i32_53 dim 1 : vector<8x512xf32>, i32 -> vector<8x512xf32>
    %c5_54 = arith.constant 5 : index
    %c0_55 = arith.constant 0 : index
    %76 = vector.load %arg17[%c5_54, %c0_55] : memref<9x512xf32, #tpu.memory_space<vmem>>, vector<1x512xf32>
    %77 = vector.broadcast %76 : vector<1x512xf32> to vector<8x512xf32>
    %78 = arith.mulf %75, %77 : vector<8x512xf32>
    %c40_56 = arith.constant 40 : index
    %c0_57 = arith.constant 0 : index
    %79 = vector.load %arg20[%c40_56, %c0_57] : memref<72x2048xf32, #tpu.memory_space<vmem>>, vector<8x512xf32>
    tpu.vector_store %arg20[%c40_56, %c0_57], %78 {strides = array<i32>} : memref<72x2048xf32, #tpu.memory_space<vmem>>, vector<8x512xf32>,
    %c497_i32_58 = arith.constant 497 : i32
    %80 = tpu.dynamic_rotate %53 by %c497_i32_58 dim 1 : vector<8x512xf32>, i32 -> vector<8x512xf32>
    %c6_59 = arith.constant 6 : index
    %c0_60 = arith.constant 0 : index
    %81 = vector.load %arg17[%c6_59, %c0_60] : memref<9x512xf32, #tpu.memory_space<vmem>>, vector<1x512xf32>
    %82 = vector.broadcast %81 : vector<1x512xf32> to vector<8x512xf32>
    %83 = arith.mulf %80, %82 : vector<8x512xf32>
    %c48_61 = arith.constant 48 : index
    %c0_62 = arith.constant 0 : index
    %84 = vector.load %arg20[%c48_61, %c0_62] : memref<72x2048xf32, #tpu.memory_space<vmem>>, vector<8x512xf32>
    tpu.vector_store %arg20[%c48_61, %c0_62], %83 {strides = array<i32>} : memref<72x2048xf32, #tpu.memory_space<vmem>>, vector<8x512xf32>,
    %c496_i32_63 = arith.constant 496 : i32
    %85 = tpu.dynamic_rotate %53 by %c496_i32_63 dim 1 : vector<8x512xf32>, i32 -> vector<8x512xf32>
    %c7_64 = arith.constant 7 : index
    %c0_65 = arith.constant 0 : index
    %86 = vector.load %arg17[%c7_64, %c0_65] : memref<9x512xf32, #tpu.memory_space<vmem>>, vector<1x512xf32>
    %87 = vector.broadcast %86 : vector<1x512xf32> to vector<8x512xf32>
    %88 = arith.mulf %85, %87 : vector<8x512xf32>
    %c56_66 = arith.constant 56 : index
    %c0_67 = arith.constant 0 : index
    %89 = vector.load %arg20[%c56_66, %c0_67] : memref<72x2048xf32, #tpu.memory_space<vmem>>, vector<8x512xf32>
    tpu.vector_store %arg20[%c56_66, %c0_67], %88 {strides = array<i32>} : memref<72x2048xf32, #tpu.memory_space<vmem>>, vector<8x512xf32>,
    %c495_i32_68 = arith.constant 495 : i32
    %90 = tpu.dynamic_rotate %53 by %c495_i32_68 dim 1 : vector<8x512xf32>, i32 -> vector<8x512xf32>
    %c8_69 = arith.constant 8 : index
    %c0_70 = arith.constant 0 : index
    %91 = vector.load %arg17[%c8_69, %c0_70] : memref<9x512xf32, #tpu.memory_space<vmem>>, vector<1x512xf32>
    %92 = vector.broadcast %91 : vector<1x512xf32> to vector<8x512xf32>
    %93 = arith.mulf %90, %92 : vector<8x512xf32>
    %c64_71 = arith.constant 64 : index
    %c0_72 = arith.constant 0 : index
    %94 = vector.load %arg20[%c64_71, %c0_72] : memref<72x2048xf32, #tpu.memory_space<vmem>>, vector<8x512xf32>
    tpu.vector_store %arg20[%c64_71, %c0_72], %93 {strides = array<i32>} : memref<72x2048xf32, #tpu.memory_space<vmem>>, vector<8x512xf32>,
    %c0_73 = arith.constant 0 : index
    %c0_74 = arith.constant 0 : index
    %95 = vector.load %arg5[%c0_73, %c0_74] : memref<8x72xf32, #tpu.memory_space<vmem>>, vector<8x72xf32>
    %c0_75 = arith.constant 0 : index
    %c0_76 = arith.constant 0 : index
    %96 = vector.load %arg20[%c0_75, %c0_76] : memref<72x2048xf32, #tpu.memory_space<vmem>>, vector<72x512xf32>
    %cst_77 = arith.constant dense<0.000000e+00> : vector<8x512xf32>
    %97 = tpu.matmul %95, %96, %cst_77 {dimension_numbers = #tpu.dot_dimension_numbers<[1], [0], [0], [1], [0, 0, 1, 1], [], []>} : vector<8x72xf32>, vector<72x512xf32>, vector<8x512xf32> -> vector<8x512xf32>
    %c0_78 = arith.constant 0 : index
    %c0_79 = arith.constant 0 : index
    %98 = vector.load %arg6[%c0_78, %c0_79] : memref<8x1xf32, #tpu.memory_space<vmem>>, vector<8x1xf32>
    %99 = vector.broadcast %98 : vector<8x1xf32> to vector<8x512xf32>
    %100 = arith.mulf %97, %99 : vector<8x512xf32>
    %c0_80 = arith.constant 0 : index
    %c0_81 = arith.constant 0 : index
    %101 = vector.load %arg7[%c0_80, %c0_81] : memref<8x1xf32, #tpu.memory_space<vmem>>, vector<8x1xf32>
    %102 = vector.broadcast %101 : vector<8x1xf32> to vector<8x512xf32>
    %103 = arith.addf %100, %102 : vector<8x512xf32>
    %cst_82 = arith.constant 0.000000e+00 : f32
    %104 = vector.broadcast %cst_82 : f32 to vector<8x512xf32>
    %105 = arith.maximumf %103, %104 : vector<8x512xf32>
    %c17_i32_83 = arith.constant 17 : i32
    %106 = tpu.dynamic_rotate %105 by %c17_i32_83 dim 1 : vector<8x512xf32>, i32 -> vector<8x512xf32>
    %c0_84 = arith.constant 0 : index
    %c0_85 = arith.constant 0 : index
    %107 = vector.load %arg17[%c0_84, %c0_85] : memref<9x512xf32, #tpu.memory_space<vmem>>, vector<1x512xf32>
    %108 = vector.broadcast %107 : vector<1x512xf32> to vector<8x512xf32>
    %109 = arith.mulf %106, %108 : vector<8x512xf32>
    %c0_86 = arith.constant 0 : index
    %c0_87 = arith.constant 0 : index
    %110 = vector.load %arg20[%c0_86, %c0_87] : memref<72x2048xf32, #tpu.memory_space<vmem>>, vector<8x512xf32>
    tpu.vector_store %arg20[%c0_86, %c0_87], %109 {strides = array<i32>} : memref<72x2048xf32, #tpu.memory_space<vmem>>, vector<8x512xf32>,
    %c16_i32_88 = arith.constant 16 : i32
    %111 = tpu.dynamic_rotate %105 by %c16_i32_88 dim 1 : vector<8x512xf32>, i32 -> vector<8x512xf32>
    %c1_89 = arith.constant 1 : index
    %c0_90 = arith.constant 0 : index
    %112 = vector.load %arg17[%c1_89, %c0_90] : memref<9x512xf32, #tpu.memory_space<vmem>>, vector<1x512xf32>
    %113 = vector.broadcast %112 : vector<1x512xf32> to vector<8x512xf32>
    %114 = arith.mulf %111, %113 : vector<8x512xf32>
    %c8_91 = arith.constant 8 : index
    %c0_92 = arith.constant 0 : index
    %115 = vector.load %arg20[%c8_91, %c0_92] : memref<72x2048xf32, #tpu.memory_space<vmem>>, vector<8x512xf32>
    tpu.vector_store %arg20[%c8_91, %c0_92], %114 {strides = array<i32>} : memref<72x2048xf32, #tpu.memory_space<vmem>>, vector<8x512xf32>,
    %c15_i32_93 = arith.constant 15 : i32
    %116 = tpu.dynamic_rotate %105 by %c15_i32_93 dim 1 : vector<8x512xf32>, i32 -> vector<8x512xf32>
    %c2_94 = arith.constant 2 : index
    %c0_95 = arith.constant 0 : index
    %117 = vector.load %arg17[%c2_94, %c0_95] : memref<9x512xf32, #tpu.memory_space<vmem>>, vector<1x512xf32>
    %118 = vector.broadcast %117 : vector<1x512xf32> to vector<8x512xf32>
    %119 = arith.mulf %116, %118 : vector<8x512xf32>
    %c16_96 = arith.constant 16 : index
    %c0_97 = arith.constant 0 : index
    %120 = vector.load %arg20[%c16_96, %c0_97] : memref<72x2048xf32, #tpu.memory_space<vmem>>, vector<8x512xf32>
    tpu.vector_store %arg20[%c16_96, %c0_97], %119 {strides = array<i32>} : memref<72x2048xf32, #tpu.memory_space<vmem>>, vector<8x512xf32>,
    %c1_i32_98 = arith.constant 1 : i32
    %121 = tpu.dynamic_rotate %105 by %c1_i32_98 dim 1 : vector<8x512xf32>, i32 -> vector<8x512xf32>
    %c3_99 = arith.constant 3 : index
    %c0_100 = arith.constant 0 : index
    %122 = vector.load %arg17[%c3_99, %c0_100] : memref<9x512xf32, #tpu.memory_space<vmem>>, vector<1x512xf32>
    %123 = vector.broadcast %122 : vector<1x512xf32> to vector<8x512xf32>
    %124 = arith.mulf %121, %123 : vector<8x512xf32>
    %c24_101 = arith.constant 24 : index
    %c0_102 = arith.constant 0 : index
    %125 = vector.load %arg20[%c24_101, %c0_102] : memref<72x2048xf32, #tpu.memory_space<vmem>>, vector<8x512xf32>
    tpu.vector_store %arg20[%c24_101, %c0_102], %124 {strides = array<i32>} : memref<72x2048xf32, #tpu.memory_space<vmem>>, vector<8x512xf32>,
    %c32_103 = arith.constant 32 : index
    %c0_104 = arith.constant 0 : index
    %126 = vector.load %arg20[%c32_103, %c0_104] : memref<72x2048xf32, #tpu.memory_space<vmem>>, vector<8x512xf32>
    tpu.vector_store %arg20[%c32_103, %c0_104], %105 {strides = array<i32>} : memref<72x2048xf32, #tpu.memory_space<vmem>>, vector<8x512xf32>,
    %c511_i32_105 = arith.constant 511 : i32
    %127 = tpu.dynamic_rotate %105 by %c511_i32_105 dim 1 : vector<8x512xf32>, i32 -> vector<8x512xf32>
    %c5_106 = arith.constant 5 : index
    %c0_107 = arith.constant 0 : index
    %128 = vector.load %arg17[%c5_106, %c0_107] : memref<9x512xf32, #tpu.memory_space<vmem>>, vector<1x512xf32>
    %129 = vector.broadcast %128 : vector<1x512xf32> to vector<8x512xf32>
    %130 = arith.mulf %127, %129 : vector<8x512xf32>
    %c40_108 = arith.constant 40 : index
    %c0_109 = arith.constant 0 : index
    %131 = vector.load %arg20[%c40_108, %c0_109] : memref<72x2048xf32, #tpu.memory_space<vmem>>, vector<8x512xf32>
    tpu.vector_store %arg20[%c40_108, %c0_109], %130 {strides = array<i32>} : memref<72x2048xf32, #tpu.memory_space<vmem>>, vector<8x512xf32>,
    %c497_i32_110 = arith.constant 497 : i32
    %132 = tpu.dynamic_rotate %105 by %c497_i32_110 dim 1 : vector<8x512xf32>, i32 -> vector<8x512xf32>
    %c6_111 = arith.constant 6 : index
    %c0_112 = arith.constant 0 : index
    %133 = vector.load %arg17[%c6_111, %c0_112] : memref<9x512xf32, #tpu.memory_space<vmem>>, vector<1x512xf32>
    %134 = vector.broadcast %133 : vector<1x512xf32> to vector<8x512xf32>
    %135 = arith.mulf %132, %134 : vector<8x512xf32>
    %c48_113 = arith.constant 48 : index
    %c0_114 = arith.constant 0 : index
    %136 = vector.load %arg20[%c48_113, %c0_114] : memref<72x2048xf32, #tpu.memory_space<vmem>>, vector<8x512xf32>
    tpu.vector_store %arg20[%c48_113, %c0_114], %135 {strides = array<i32>} : memref<72x2048xf32, #tpu.memory_space<vmem>>, vector<8x512xf32>,
    %c496_i32_115 = arith.constant 496 : i32
    %137 = tpu.dynamic_rotate %105 by %c496_i32_115 dim 1 : vector<8x512xf32>, i32 -> vector<8x512xf32>
    %c7_116 = arith.constant 7 : index
    %c0_117 = arith.constant 0 : index
    %138 = vector.load %arg17[%c7_116, %c0_117] : memref<9x512xf32, #tpu.memory_space<vmem>>, vector<1x512xf32>
    %139 = vector.broadcast %138 : vector<1x512xf32> to vector<8x512xf32>
    %140 = arith.mulf %137, %139 : vector<8x512xf32>
    %c56_118 = arith.constant 56 : index
    %c0_119 = arith.constant 0 : index
    %141 = vector.load %arg20[%c56_118, %c0_119] : memref<72x2048xf32, #tpu.memory_space<vmem>>, vector<8x512xf32>
    tpu.vector_store %arg20[%c56_118, %c0_119], %140 {strides = array<i32>} : memref<72x2048xf32, #tpu.memory_space<vmem>>, vector<8x512xf32>,
    %c495_i32_120 = arith.constant 495 : i32
    %142 = tpu.dynamic_rotate %105 by %c495_i32_120 dim 1 : vector<8x512xf32>, i32 -> vector<8x512xf32>
    %c8_121 = arith.constant 8 : index
    %c0_122 = arith.constant 0 : index
    %143 = vector.load %arg17[%c8_121, %c0_122] : memref<9x512xf32, #tpu.memory_space<vmem>>, vector<1x512xf32>
    %144 = vector.broadcast %143 : vector<1x512xf32> to vector<8x512xf32>
    %145 = arith.mulf %142, %144 : vector<8x512xf32>
    %c64_123 = arith.constant 64 : index
    %c0_124 = arith.constant 0 : index
    %146 = vector.load %arg20[%c64_123, %c0_124] : memref<72x2048xf32, #tpu.memory_space<vmem>>, vector<8x512xf32>
    tpu.vector_store %arg20[%c64_123, %c0_124], %145 {strides = array<i32>} : memref<72x2048xf32, #tpu.memory_space<vmem>>, vector<8x512xf32>,
    %c0_125 = arith.constant 0 : index
    %c0_126 = arith.constant 0 : index
    %147 = vector.load %arg8[%c0_125, %c0_126] : memref<8x72xf32, #tpu.memory_space<vmem>>, vector<8x72xf32>
    %c0_127 = arith.constant 0 : index
    %c0_128 = arith.constant 0 : index
    %148 = vector.load %arg20[%c0_127, %c0_128] : memref<72x2048xf32, #tpu.memory_space<vmem>>, vector<72x512xf32>
    %cst_129 = arith.constant dense<0.000000e+00> : vector<8x512xf32>
    %149 = tpu.matmul %147, %148, %cst_129 {dimension_numbers = #tpu.dot_dimension_numbers<[1], [0], [0], [1], [0, 0, 1, 1], [], []>} : vector<8x72xf32>, vector<72x512xf32>, vector<8x512xf32> -> vector<8x512xf32>
    %c0_130 = arith.constant 0 : index
    %c0_131 = arith.constant 0 : index
    %150 = vector.load %arg9[%c0_130, %c0_131] : memref<8x1xf32, #tpu.memory_space<vmem>>, vector<8x1xf32>
    %151 = vector.broadcast %150 : vector<8x1xf32> to vector<8x512xf32>
    %152 = arith.mulf %149, %151 : vector<8x512xf32>
    %c0_132 = arith.constant 0 : index
    %c0_133 = arith.constant 0 : index
    %153 = vector.load %arg10[%c0_132, %c0_133] : memref<8x1xf32, #tpu.memory_space<vmem>>, vector<8x1xf32>
    %154 = vector.broadcast %153 : vector<8x1xf32> to vector<8x512xf32>
    %155 = arith.addf %152, %154 : vector<8x512xf32>
    %cst_134 = arith.constant 0.000000e+00 : f32
    %156 = vector.broadcast %cst_134 : f32 to vector<8x512xf32>
    %157 = arith.maximumf %155, %156 : vector<8x512xf32>
    %c0_135 = arith.constant 0 : index
    %c0_136 = arith.constant 0 : index
    %158 = vector.load %arg11[%c0_135, %c0_136] : memref<256x1024xf32, #tpu.memory_space<vmem>>, vector<256x1024xf32>
    %159 = vector.extract_strided_slice %157 {offsets = [0, 0], sizes = [8, 256], strides = [1, 1]} : vector<8x512xf32> to vector<8x256xf32>
    %cst_137 = arith.constant dense<0.000000e+00> : vector<8x1024xf32>
    %160 = tpu.matmul %159, %158, %cst_137 {dimension_numbers = #tpu.dot_dimension_numbers<[1], [0], [0], [1], [0, 0, 1, 1], [], []>} : vector<8x256xf32>, vector<256x1024xf32>, vector<8x1024xf32> -> vector<8x1024xf32>
    %161 = vector.extract_strided_slice %157 {offsets = [0, 256], sizes = [8, 256], strides = [1, 1]} : vector<8x512xf32> to vector<8x256xf32>
    %cst_138 = arith.constant dense<0.000000e+00> : vector<8x1024xf32>
    %162 = tpu.matmul %161, %158, %cst_138 {dimension_numbers = #tpu.dot_dimension_numbers<[1], [0], [0], [1], [0, 0, 1, 1], [], []>} : vector<8x256xf32>, vector<256x1024xf32>, vector<8x1024xf32> -> vector<8x1024xf32>
    %163 = tpu.concatenate %160, %162 in 1 : vector<8x1024xf32>, vector<8x1024xf32> -> vector<8x2048xf32>
    %c33_i32 = arith.constant 33 : i32
    %164 = tpu.dynamic_rotate %163 by %c33_i32 dim 1 : vector<8x2048xf32>, i32 -> vector<8x2048xf32>
    %c0_139 = arith.constant 0 : index
    %c0_140 = arith.constant 0 : index
    %165 = vector.load %arg18[%c0_139, %c0_140] : memref<9x2048xf32, #tpu.memory_space<vmem>>, vector<1x2048xf32>
    %166 = vector.broadcast %165 : vector<1x2048xf32> to vector<8x2048xf32>
    %167 = arith.mulf %164, %166 : vector<8x2048xf32>
    %c0_141 = arith.constant 0 : index
    %c0_142 = arith.constant 0 : index
    %168 = vector.load %arg20[%c0_141, %c0_142] : memref<72x2048xf32, #tpu.memory_space<vmem>>, vector<8x2048xf32>
    tpu.vector_store %arg20[%c0_141, %c0_142], %167 {strides = array<i32>} : memref<72x2048xf32, #tpu.memory_space<vmem>>, vector<8x2048xf32>,
    %c32_i32 = arith.constant 32 : i32
    %169 = tpu.dynamic_rotate %163 by %c32_i32 dim 1 : vector<8x2048xf32>, i32 -> vector<8x2048xf32>
    %c1_143 = arith.constant 1 : index
    %c0_144 = arith.constant 0 : index
    %170 = vector.load %arg18[%c1_143, %c0_144] : memref<9x2048xf32, #tpu.memory_space<vmem>>, vector<1x2048xf32>
    %171 = vector.broadcast %170 : vector<1x2048xf32> to vector<8x2048xf32>
    %172 = arith.mulf %169, %171 : vector<8x2048xf32>
    %c8_145 = arith.constant 8 : index
    %c0_146 = arith.constant 0 : index
    %173 = vector.load %arg20[%c8_145, %c0_146] : memref<72x2048xf32, #tpu.memory_space<vmem>>, vector<8x2048xf32>
    tpu.vector_store %arg20[%c8_145, %c0_146], %172 {strides = array<i32>} : memref<72x2048xf32, #tpu.memory_space<vmem>>, vector<8x2048xf32>,
    %c31_i32 = arith.constant 31 : i32
    %174 = tpu.dynamic_rotate %163 by %c31_i32 dim 1 : vector<8x2048xf32>, i32 -> vector<8x2048xf32>
    %c2_147 = arith.constant 2 : index
    %c0_148 = arith.constant 0 : index
    %175 = vector.load %arg18[%c2_147, %c0_148] : memref<9x2048xf32, #tpu.memory_space<vmem>>, vector<1x2048xf32>
    %176 = vector.broadcast %175 : vector<1x2048xf32> to vector<8x2048xf32>
    %177 = arith.mulf %174, %176 : vector<8x2048xf32>
    %c16_149 = arith.constant 16 : index
    %c0_150 = arith.constant 0 : index
    %178 = vector.load %arg20[%c16_149, %c0_150] : memref<72x2048xf32, #tpu.memory_space<vmem>>, vector<8x2048xf32>
    tpu.vector_store %arg20[%c16_149, %c0_150], %177 {strides = array<i32>} : memref<72x2048xf32, #tpu.memory_space<vmem>>, vector<8x2048xf32>,
    %c1_i32_151 = arith.constant 1 : i32
    %179 = tpu.dynamic_rotate %163 by %c1_i32_151 dim 1 : vector<8x2048xf32>, i32 -> vector<8x2048xf32>
    %c3_152 = arith.constant 3 : index
    %c0_153 = arith.constant 0 : index
    %180 = vector.load %arg18[%c3_152, %c0_153] : memref<9x2048xf32, #tpu.memory_space<vmem>>, vector<1x2048xf32>
    %181 = vector.broadcast %180 : vector<1x2048xf32> to vector<8x2048xf32>
    %182 = arith.mulf %179, %181 : vector<8x2048xf32>
    %c24_154 = arith.constant 24 : index
    %c0_155 = arith.constant 0 : index
    %183 = vector.load %arg20[%c24_154, %c0_155] : memref<72x2048xf32, #tpu.memory_space<vmem>>, vector<8x2048xf32>
    tpu.vector_store %arg20[%c24_154, %c0_155], %182 {strides = array<i32>} : memref<72x2048xf32, #tpu.memory_space<vmem>>, vector<8x2048xf32>,
    %c32_156 = arith.constant 32 : index
    %c0_157 = arith.constant 0 : index
    %184 = vector.load %arg20[%c32_156, %c0_157] : memref<72x2048xf32, #tpu.memory_space<vmem>>, vector<8x2048xf32>
    tpu.vector_store %arg20[%c32_156, %c0_157], %163 {strides = array<i32>} : memref<72x2048xf32, #tpu.memory_space<vmem>>, vector<8x2048xf32>,
    %c2047_i32 = arith.constant 2047 : i32
    %185 = tpu.dynamic_rotate %163 by %c2047_i32 dim 1 : vector<8x2048xf32>, i32 -> vector<8x2048xf32>
    %c5_158 = arith.constant 5 : index
    %c0_159 = arith.constant 0 : index
    %186 = vector.load %arg18[%c5_158, %c0_159] : memref<9x2048xf32, #tpu.memory_space<vmem>>, vector<1x2048xf32>
    %187 = vector.broadcast %186 : vector<1x2048xf32> to vector<8x2048xf32>
    %188 = arith.mulf %185, %187 : vector<8x2048xf32>
    %c40_160 = arith.constant 40 : index
    %c0_161 = arith.constant 0 : index
    %189 = vector.load %arg20[%c40_160, %c0_161] : memref<72x2048xf32, #tpu.memory_space<vmem>>, vector<8x2048xf32>
    tpu.vector_store %arg20[%c40_160, %c0_161], %188 {strides = array<i32>} : memref<72x2048xf32, #tpu.memory_space<vmem>>, vector<8x2048xf32>,
    %c2017_i32 = arith.constant 2017 : i32
    %190 = tpu.dynamic_rotate %163 by %c2017_i32 dim 1 : vector<8x2048xf32>, i32 -> vector<8x2048xf32>
    %c6_162 = arith.constant 6 : index
    %c0_163 = arith.constant 0 : index
    %191 = vector.load %arg18[%c6_162, %c0_163] : memref<9x2048xf32, #tpu.memory_space<vmem>>, vector<1x2048xf32>
    %192 = vector.broadcast %191 : vector<1x2048xf32> to vector<8x2048xf32>
    %193 = arith.mulf %190, %192 : vector<8x2048xf32>
    %c48_164 = arith.constant 48 : index
    %c0_165 = arith.constant 0 : index
    %194 = vector.load %arg20[%c48_164, %c0_165] : memref<72x2048xf32, #tpu.memory_space<vmem>>, vector<8x2048xf32>
    tpu.vector_store %arg20[%c48_164, %c0_165], %193 {strides = array<i32>} : memref<72x2048xf32, #tpu.memory_space<vmem>>, vector<8x2048xf32>,
    %c2016_i32 = arith.constant 2016 : i32
    %195 = tpu.dynamic_rotate %163 by %c2016_i32 dim 1 : vector<8x2048xf32>, i32 -> vector<8x2048xf32>
    %c7_166 = arith.constant 7 : index
    %c0_167 = arith.constant 0 : index
    %196 = vector.load %arg18[%c7_166, %c0_167] : memref<9x2048xf32, #tpu.memory_space<vmem>>, vector<1x2048xf32>
    %197 = vector.broadcast %196 : vector<1x2048xf32> to vector<8x2048xf32>
    %198 = arith.mulf %195, %197 : vector<8x2048xf32>
    %c56_168 = arith.constant 56 : index
    %c0_169 = arith.constant 0 : index
    %199 = vector.load %arg20[%c56_168, %c0_169] : memref<72x2048xf32, #tpu.memory_space<vmem>>, vector<8x2048xf32>
    tpu.vector_store %arg20[%c56_168, %c0_169], %198 {strides = array<i32>} : memref<72x2048xf32, #tpu.memory_space<vmem>>, vector<8x2048xf32>,
    %c2015_i32 = arith.constant 2015 : i32
    %200 = tpu.dynamic_rotate %163 by %c2015_i32 dim 1 : vector<8x2048xf32>, i32 -> vector<8x2048xf32>
    %c8_170 = arith.constant 8 : index
    %c0_171 = arith.constant 0 : index
    %201 = vector.load %arg18[%c8_170, %c0_171] : memref<9x2048xf32, #tpu.memory_space<vmem>>, vector<1x2048xf32>
    %202 = vector.broadcast %201 : vector<1x2048xf32> to vector<8x2048xf32>
    %203 = arith.mulf %200, %202 : vector<8x2048xf32>
    %c64_172 = arith.constant 64 : index
    %c0_173 = arith.constant 0 : index
    %204 = vector.load %arg20[%c64_172, %c0_173] : memref<72x2048xf32, #tpu.memory_space<vmem>>, vector<8x2048xf32>
    tpu.vector_store %arg20[%c64_172, %c0_173], %203 {strides = array<i32>} : memref<72x2048xf32, #tpu.memory_space<vmem>>, vector<8x2048xf32>,
    %c0_174 = arith.constant 0 : index
    %c0_175 = arith.constant 0 : index
    %205 = vector.load %arg12[%c0_174, %c0_175] : memref<8x72xf32, #tpu.memory_space<vmem>>, vector<8x72xf32>
    %c0_176 = arith.constant 0 : index
    %c0_177 = arith.constant 0 : index
    %206 = vector.load %arg20[%c0_176, %c0_177] : memref<72x2048xf32, #tpu.memory_space<vmem>>, vector<72x2048xf32>
    %cst_178 = arith.constant dense<0.000000e+00> : vector<8x2048xf32>
    %207 = tpu.matmul %205, %206, %cst_178 {dimension_numbers = #tpu.dot_dimension_numbers<[1], [0], [0], [1], [0, 0, 1, 1], [], []>} : vector<8x72xf32>, vector<72x2048xf32>, vector<8x2048xf32> -> vector<8x2048xf32>
    %c0_179 = arith.constant 0 : index
    %c0_180 = arith.constant 0 : index
    %208 = vector.load %arg13[%c0_179, %c0_180] : memref<8x1xf32, #tpu.memory_space<vmem>>, vector<8x1xf32>
    %209 = vector.broadcast %208 : vector<8x1xf32> to vector<8x2048xf32>
    %210 = arith.mulf %207, %209 : vector<8x2048xf32>
    %c0_181 = arith.constant 0 : index
    %c0_182 = arith.constant 0 : index
    %211 = vector.load %arg14[%c0_181, %c0_182] : memref<8x1xf32, #tpu.memory_space<vmem>>, vector<8x1xf32>
    %212 = vector.broadcast %211 : vector<8x1xf32> to vector<8x2048xf32>
    %213 = arith.addf %210, %212 : vector<8x2048xf32>
    %cst_183 = arith.constant 0.000000e+00 : f32
    %214 = vector.broadcast %cst_183 : f32 to vector<8x2048xf32>
    %215 = arith.maximumf %213, %214 : vector<8x2048xf32>
    %c0_184 = arith.constant 0 : index
    %c0_185 = arith.constant 0 : index
    %216 = vector.load %arg15[%c0_184, %c0_185] : memref<8x8xf32, #tpu.memory_space<vmem>>, vector<8x8xf32>
    %cst_186 = arith.constant dense<0.000000e+00> : vector<8x2048xf32>
    %217 = tpu.matmul %216, %215, %cst_186 {dimension_numbers = #tpu.dot_dimension_numbers<[1], [0], [0], [1], [0, 0, 1, 1], [], []>} : vector<8x8xf32>, vector<8x2048xf32>, vector<8x2048xf32> -> vector<8x2048xf32>
    %c0_187 = arith.constant 0 : index
    %c0_188 = arith.constant 0 : index
    %218 = vector.load %arg16[%c0_187, %c0_188] : memref<8x1xf32, #tpu.memory_space<vmem>>, vector<8x1xf32>
    %219 = vector.broadcast %218 : vector<8x1xf32> to vector<8x2048xf32>
    %220 = arith.addf %217, %219 : vector<8x2048xf32>
    %cst_189 = arith.constant 0.000000e+00 : f32
    %221 = vector.broadcast %cst_189 : f32 to vector<8x2048xf32>
    %222 = arith.maximumf %220, %221 : vector<8x2048xf32>
    %c0_190 = arith.constant 0 : index
    %c0_191 = arith.constant 0 : index
    %c0_192 = arith.constant 0 : index
    %223 = vector.load %arg19[%c0_190, %c0_191, %c0_192] : memref<1x8x2048xf32, #tpu.memory_space<vmem>>, vector<1x8x2048xf32>
    %224 = vector.shape_cast %223 : vector<1x8x2048xf32> to vector<8x2048xf32>
    %225 = vector.shape_cast %222 : vector<8x2048xf32> to vector<1x8x2048xf32>
    tpu.vector_store %arg19[%c0_190, %c0_191, %c0_192], %225 {strides = array<i32>} : memref<1x8x2048xf32, #tpu.memory_space<vmem>>, vector<1x8x2048xf32>,
    return
  }
  func.func @transform_0(%arg0: i32) -> (i32, i32, i32) {
    %c0_i32 = arith.constant 0 : i32
    %c0_i32_0 = arith.constant 0 : i32
    %c0_i32_1 = arith.constant 0 : i32
    return %arg0, %c0_i32, %c0_i32_0 : i32, i32, i32
  }
  func.func @transform_1(%arg0: i32) -> (i32, i32) {
    %c0_i32 = arith.constant 0 : i32
    %c0_i32_0 = arith.constant 0 : i32
    %c0_i32_1 = arith.constant 0 : i32
    return %c0_i32, %c0_i32_0 : i32, i32
  }
  func.func @transform_2(%arg0: i32) -> (i32, i32) {
    %c0_i32 = arith.constant 0 : i32
    %c0_i32_0 = arith.constant 0 : i32
    %c0_i32_1 = arith.constant 0 : i32
    return %c0_i32, %c0_i32_0 : i32, i32
  }
  func.func @transform_3(%arg0: i32) -> (i32, i32) {
    %c0_i32 = arith.constant 0 : i32
    %c0_i32_0 = arith.constant 0 : i32
    %c0_i32_1 = arith.constant 0 : i32
    return %c0_i32, %c0_i32_0 : i32, i32
  }
  func.func @transform_4(%arg0: i32) -> (i32, i32) {
    %c0_i32 = arith.constant 0 : i32
    %c0_i32_0 = arith.constant 0 : i32
    %c0_i32_1 = arith.constant 0 : i32
    return %c0_i32, %c0_i32_0 : i32, i32
  }
  func.func @transform_5(%arg0: i32) -> (i32, i32) {
    %c0_i32 = arith.constant 0 : i32
    %c0_i32_0 = arith.constant 0 : i32
    %c0_i32_1 = arith.constant 0 : i32
    return %c0_i32, %c0_i32_0 : i32, i32
  }
  func.func @transform_6(%arg0: i32) -> (i32, i32) {
    %c0_i32 = arith.constant 0 : i32
    %c0_i32_0 = arith.constant 0 : i32
    %c0_i32_1 = arith.constant 0 : i32
    return %c0_i32, %c0_i32_0 : i32, i32
  }
  func.func @transform_7(%arg0: i32) -> (i32, i32) {
    %c0_i32 = arith.constant 0 : i32
    %c0_i32_0 = arith.constant 0 : i32
    %c0_i32_1 = arith.constant 0 : i32
    return %c0_i32, %c0_i32_0 : i32, i32
  }
  func.func @transform_8(%arg0: i32) -> (i32, i32) {
    %c0_i32 = arith.constant 0 : i32
    %c0_i32_0 = arith.constant 0 : i32
    %c0_i32_1 = arith.constant 0 : i32
    return %c0_i32, %c0_i32_0 : i32, i32
  }
  func.func @transform_9(%arg0: i32) -> (i32, i32) {
    %c0_i32 = arith.constant 0 : i32
    %c0_i32_0 = arith.constant 0 : i32
    %c0_i32_1 = arith.constant 0 : i32
    return %c0_i32, %c0_i32_0 : i32, i32
  }
  func.func @transform_10(%arg0: i32) -> (i32, i32) {
    %c0_i32 = arith.constant 0 : i32
    %c0_i32_0 = arith.constant 0 : i32
    %c0_i32_1 = arith.constant 0 : i32
    return %c0_i32, %c0_i32_0 : i32, i32
  }
  func.func @transform_11(%arg0: i32) -> (i32, i32) {
    %c0_i32 = arith.constant 0 : i32
    %c0_i32_0 = arith.constant 0 : i32
    %c0_i32_1 = arith.constant 0 : i32
    return %c0_i32, %c0_i32_0 : i32, i32
  }
  func.func @transform_12(%arg0: i32) -> (i32, i32) {
    %c0_i32 = arith.constant 0 : i32
    %c0_i32_0 = arith.constant 0 : i32
    %c0_i32_1 = arith.constant 0 : i32
    return %c0_i32, %c0_i32_0 : i32, i32
  }
  func.func @transform_13(%arg0: i32) -> (i32, i32) {
    %c0_i32 = arith.constant 0 : i32
    %c0_i32_0 = arith.constant 0 : i32
    %c0_i32_1 = arith.constant 0 : i32
    return %c0_i32, %c0_i32_0 : i32, i32
  }
  func.func @transform_14(%arg0: i32) -> (i32, i32) {
    %c0_i32 = arith.constant 0 : i32
    %c0_i32_0 = arith.constant 0 : i32
    %c0_i32_1 = arith.constant 0 : i32
    return %c0_i32, %c0_i32_0 : i32, i32
  }
  func.func @transform_15(%arg0: i32) -> (i32, i32) {
    %c0_i32 = arith.constant 0 : i32
    %c0_i32_0 = arith.constant 0 : i32
    %c0_i32_1 = arith.constant 0 : i32
    return %c0_i32, %c0_i32_0 : i32, i32
  }
  func.func @transform_16(%arg0: i32) -> (i32, i32) {
    %c0_i32 = arith.constant 0 : i32
    %c0_i32_0 = arith.constant 0 : i32
    %c0_i32_1 = arith.constant 0 : i32
    return %c0_i32, %c0_i32_0 : i32, i32
  }
  func.func @transform_17(%arg0: i32) -> (i32, i32) {
    %c0_i32 = arith.constant 0 : i32
    %c0_i32_0 = arith.constant 0 : i32
    %c0_i32_1 = arith.constant 0 : i32
    return %c0_i32, %c0_i32_0 : i32, i32
  }
  func.func @transform_18(%arg0: i32) -> (i32, i32, i32) {
    %c0_i32 = arith.constant 0 : i32
    %c0_i32_0 = arith.constant 0 : i32
    %c0_i32_1 = arith.constant 0 : i32
    return %arg0, %c0_i32, %c0_i32_0 : i32, i32, i32
  }
}

</mosaic_0001>

<bundles_post_ra>
// kernel: tpu_custom_call.1
= control target key start
LH: loop header
LB: loop body
LE: loop exit
PB: predicated region body
PF: predicated region fallthrough
CT: control target
= control target key end

     0   :  { %s9202_s0 = inlined_call_operand.vmem [shape: f32[1,8,512], index: 0, kind: input, shape index: {}]   ;;  %s9203_s1 = inlined_call_operand.vmem [shape: f32[8,72], index: 1, kind: input, shape index: {}]   ;;  %s9204_s2 = inlined_call_operand.vmem [shape: f32[8,1], index: 2, kind: input, shape index: {}]   ;;  %s9205_s3 = inlined_call_operand.vmem [shape: f32[8,1], index: 3, kind: input, shape index: {}]   ;;  %s9206_s4 = inlined_call_operand.vmem [shape: f32[8,72], index: 4, kind: input, shape index: {}]   ;;  %s9207_s5 = inlined_call_operand.vmem [shape: f32[8,1], index: 5, kind: input, shape index: {}]   ;;  %s9208_s6 = inlined_call_operand.vmem [shape: f32[8,1], index: 6, kind: input, shape index: {}]   ;;  %s9209_s7 = inlined_call_operand.vmem [shape: f32[8,72], index: 7, kind: input, shape index: {}]   ;;  %s9210_s8 = inlined_call_operand.vmem [shape: f32[8,1], index: 8, kind: input, shape index: {}]   ;;  %s9211_s9 = inlined_call_operand.vmem [shape: f32[8,1], index: 9, kind: input, shape index: {}]   ;;  %s9212_s10 = inlined_call_operand.hbm [shape: f32[256,1024], index: 10, kind: input, shape index: {}]   ;;  %s9213_s11 = inlined_call_operand.hbm [shape: f32[8,72], index: 11, kind: input, shape index: {}]   ;;  %s9214_s12 = inlined_call_operand.vmem [shape: f32[8,1], index: 12, kind: input, shape index: {}]   ;;  %s9215_s13 = inlined_call_operand.vmem [shape: f32[8,1], index: 13, kind: input, shape index: {}]   ;;  %s9216_s14 = inlined_call_operand.vmem [shape: f32[8,8], index: 14, kind: input, shape index: {}]   ;;  %s9217_s15 = inlined_call_operand.vmem [shape: f32[8,1], index: 15, kind: input, shape index: {}]   ;;  %s9218_s16 = inlined_call_operand.vmem [shape: f32[9,512], index: 16, kind: input, shape index: {}]   ;;  %s9219_s17 = inlined_call_operand.hbm [shape: f32[9,2048], index: 17, kind: input, shape index: {}]   ;;  %s9220_s18 = inlined_call_operand.hbm [shape: f32[1,8,2048], index: 18, kind: output, shape index: {}]  }
   0x1   :  { %9365 = sst [smem:[#allocation99_spill]] %s9202_s0 }
   0x2   :  { %9366 = sst [smem:[#allocation100_spill]] %s9203_s1 }
   0x3   :  { %9367 = sst [smem:[#allocation101_spill]] %s9204_s2 }
   0x4   :  { %23 = vsyncpa [#allocation4], 0 }
   0x5   :  { %24 = vsyncpa [#allocation7], 0 }
   0x6   :  { %25 = vsyncpa [#allocation5], 0  ;;  %s6267_s27 = smov [#allocation6]   ;;  %s6268_s29 = smov [#allocation3]  }
   0x7   :  { %s64_s28 = sshll.u32 %s6267_s27, 4  ;;  %s51_s30 = sshll.u32 %s6268_s29, 4  ;;  %s65_s28 = int_to_ptr.vmem [resolvable:$true] %s64_s28  ;;  %s6386_s30 = int_to_ptr.vmem [resolvable:$true] %s51_s30 }
   0x8   :  { %s6173_s1 = scalar_lea.hbm %s9213_s11, 128 }
   0x9   :  { %p6174_p0 = scmp.ne.s32.totalorder %s9213_s11, %s6173_s1  ;;  %p6177_p1 = scmp.lt.u32.totalorder %s6173_s1, %s9213_s11 }
   0xb   :  { %p6179_p2 = pnand %p6177_p1, %p6174_p0 }
   0xd   :  { %6182 = shalt.err (!%p6179_p2)
}
   0xe   :  { %s6183_s23 = scalar_lea.vmem %s65_s28, 128  ;;  %p6188_p4 = scmp.lt.s32.totalorder %s65_s28, %s65_s28 }
   0xf   :  { %p6184_p3 = scmp.ne.s32.totalorder %s65_s28, %s6183_s23  ;;  %p6189_p5 = scmp.lt.s32.totalorder %s6183_s23, %s6183_s23 }
  0x11   :  { %p6190_p6 = por %p6189_p5, %p6188_p4 }
  0x13   :  { %p6191_p7 = pnand %p6190_p6, %p6184_p3 }
  0x15   :  { %6194 = shalt.err (!%p6191_p7)
}
  0x16   :  { %67 = dma.hbm_to_vmem [thread:$0]  %s9213_s11, 128, %s65_s28, [#allocation7]  }
  0x17   :  { %s6195_s29 = scalar_lea.hbm %s9212_s10, 32768 }
  0x18   :  { %p6196_p8 = scmp.ne.s32.totalorder %s9212_s10, %s6195_s29  ;;  %p6199_p9 = scmp.lt.u32.totalorder %s6195_s29, %s9212_s10 }
  0x1a   :  { %p6201_p10 = pnand %p6199_p9, %p6196_p8 }
  0x1c   :  { %6204 = shalt.err (!%p6201_p10)
}
  0x1d   :  { %s6205_s21 = scalar_lea.vmem %s6386_s30, 32768  ;;  %p6210_p12 = scmp.lt.s32.totalorder %s6386_s30, %s6386_s30 }
  0x1e   :  { %p6206_p11 = scmp.ne.s32.totalorder %s6386_s30, %s6205_s21  ;;  %p6211_p13 = scmp.lt.s32.totalorder %s6205_s21, %s6205_s21 }
  0x20   :  { %p6212_p0 = por %p6211_p13, %p6210_p12 }
  0x22   :  { %p6213_p1 = pnand %p6212_p0, %p6206_p11 }
  0x24   :  { %6216 = shalt.err (!%p6213_p1)
}
  0x25   :  { %s6269_s11 = smov 1024   ;;  %s6270_s28 = smov 64  }
  0x26   :  { %57 = dma.hbm_to_vmem [thread:$0]  %s9212_s10, 32768, %s6386_s30, [#allocation4], %s6269_s11, %s6269_s11, %s6270_s28  }
  0x27   :  { %s6271_s23 = smov [#allocation8]   ;;  %s6217_s27 = scalar_lea.hbm %s9219_s17, 4096 }
  0x28   :  { %s83_s24 = sshll.u32 %s6271_s23, 4  ;;  %p6218_p2 = scmp.ne.s32.totalorder %s9219_s17, %s6217_s27  ;;  %s84_s24 = int_to_ptr.vmem [resolvable:$true] %s83_s24 }
  0x29   :  { %p6221_p3 = scmp.lt.u32.totalorder %s6217_s27, %s9219_s17 }
  0x2b   :  { %p6223_p4 = pnand %p6221_p3, %p6218_p2 }
  0x2d   :  { %6226 = shalt.err (!%p6223_p4)
}
  0x2e   :  { %s6227_s20 = scalar_lea.vmem %s84_s24, 4096  ;;  %p6232_p6 = scmp.lt.s32.totalorder %s84_s24, %s84_s24 }
  0x2f   :  { %p6228_p5 = scmp.ne.s32.totalorder %s84_s24, %s6227_s20  ;;  %p6233_p7 = scmp.lt.s32.totalorder %s6227_s20, %s6227_s20 }
  0x31   :  { %p6234_p8 = por %p6233_p7, %p6232_p6 }
  0x33   :  { %p6235_p9 = pnand %p6234_p8, %p6228_p5 }
  0x35   :  { %6238 = shalt.err (!%p6235_p9)
}
  0x36   :  { %s6272_s10 = smov 2048   ;;  %s6273_s30 = smov 128  }
  0x37   :  { %89 = dma.hbm_to_vmem [thread:$0]  %s9219_s17, 4096, %s84_s24, [#allocation7], %s6272_s10, %s6272_s10, %s6273_s30  }
  0x38   :  { %6261 = dma.done.wait [#allocation4], 32768  }
  0x39   :  { %6262 = vsyncadd [#allocation4], 4294934528 }
  0x3a   :  { %6263 = dma.done.wait [#allocation7], 4224  }
  0x3b   :  { %6264 = vsyncadd [#allocation7], 4294963072  ;;  %s9368_s2 = sld [smem:[#allocation99_spill]]  ;;  %s6274_s23 = smov 16   ;;  %v9222_v4 = vmov 0.0   ;;  %v6282_v5 = vmov 0   ;;  %v111_v8 = vlaneseq }
  0x3c   :  { %s6275_s25 = smov 17   ;;  %s6276_s19 = smov 15   ;;  %565 = vmatprep.mubr.f32.mxu0 %v9222_v4  ;;  %636 = vmatprep.mubr.f32.mxu1 %v9222_v4  ;;  %v653_v7 = vld [vmem:[%s9205_s3] sm:$0xff]  ;;  %vm497_vm8 = vcmask 588800   ;;  %vm4747_vm15 = vcmask 64512  }
  0x3d   :  { %s6277_s1 = smov 1   ;;  %s6278_s20 = smov 127   ;;  %6170 = vset.pattern.permute.xlu0 %v6282_v5  ;;  %6171 = vset.pattern.permute.xlu1 %v6282_v5  ;;  %v6521_v9 = vshrl.u32 %v111_v8, 7  ;;  %v6523_v10 = vand.u32 127, %v111_v8 }
  0x3e   :  { %s6279_s10 = smov 113   ;;  %s6280_s30 = smov 112   ;;  %v118_v12 = vld [vmem:[%s9218_s16] ss:$8 sm:$0xf] }
  0x3f   :  { %s6283_s21 = smov 111   ;;  %s9369_s22 = sld [smem:[#allocation101_spill]]  ;;  %9370 = vst [vmem:[#allocation13_spill] sm:$0xff] %v6521_v9  ;;  %9371 = vst [vmem:[#allocation14_spill] sm:$0xff] %v6523_v10  ;;  %v6526_v11 = vsub.s32 1, %v6521_v9  ;;  %vm113_vm0 = vcmp.lt.s32.totalorder %v6523_v10, 17 }
  0x40   :  { %v5367_v13 = vld [vmem:[%s9218_s16 + $0x1] ss:$8 sm:$0xf]  ;;  %vm156_vm1 = vcmp.lt.s32.totalorder %v6523_v10, 16  ;;  %v6539_v20 = vsub.s32 0, %v6521_v9  ;;  %v6542_v21 = vsub.s32 2, %v6521_v9 }
  0x41   :  { %v6432_v0 = vld [vmem:[%s9368_s2] sm:$0xff]  ;;  %v6441_v1 = vld [vmem:[%s9368_s2 + $0x8] sm:$0xff]  ;;  %v6450_v2 = vld [vmem:[%s9368_s2 + $0x18] sm:$0xff]  ;;  %9372 = vst [vmem:[#allocation15_spill] sm:$0xff] %v6526_v11  ;;  %v127_v16 = vrot.slane %v118_v12, %v6526_v11  ;;  %v171_v17 = vrot.slane %v5367_v13, %v6526_v11  ;;  %v6545_v22 = vsub.s32 3, %v6521_v9  ;;  %vm200_vm2 = vcmp.lt.s32.totalorder %v6523_v10, 15 }
  0x42   :  { %148 = vrot.lane.b32.xlu1 %v6432_v0, %s6274_s23  ;;  %103 = vrot.lane.b32.xlu0 %v6432_v0, %s6275_s25  ;;  %v6455_v3 = vld [vmem:[%s9368_s2 + $0x10] sm:$0xff]  ;;  %9373 = vst [vmem:[#allocation16_spill] sm:$0xff] %v6539_v20  ;;  %9374 = vst [vmem:[#allocation17_spill] sm:$0xff] %v6542_v21  ;;  %v123_v30 = vrot.slane %v118_v12, %v6539_v20  ;;  %v131_v33 = vrot.slane %v118_v12, %v6542_v21  ;;  %vm244_vm3 = vcmp.lt.s32.totalorder %v6523_v10, 1  ;;  %s9376_s28 = sld [smem:[#allocation100_spill]] }
  0x43   :  { %9375 = vst [vmem:[#allocation18_spill] sm:$0xff] %v6545_v22  ;;  %v135_v32 = vrot.slane %v118_v12, %v6545_v22  ;;  %v167_v34 = vrot.slane %v5367_v13, %v6539_v20  ;;  %v179_v36 = vrot.slane %v5367_v13, %v6545_v22  ;;  %v175_v37 = vrot.slane %v5367_v13, %v6542_v21  ;;  %v5368_v50 = vld [vmem:[%s9218_s16 + $0x2] ss:$8 sm:$0xf] }
  0x44   :  { %v5369_v51 = vld [vmem:[%s9218_s16 + $0x3] ss:$8 sm:$0xf]  ;;  %v215_v57 = vrot.slane %v5368_v50, %v6526_v11  ;;  %vm292_vm4 = vcmp.lt.s32.totalorder %v6523_v10, 127  ;;  %vm336_vm5 = vcmp.lt.s32.totalorder %v6523_v10, 113  ;;  %vm380_vm6 = vcmp.lt.s32.totalorder %v6523_v10, 112 }
  0x45   :  { %v643_v6 = vld [vmem:[%s9369_s22] sm:$0xff]  ;;  %v259_v58 = vrot.slane %v5369_v51, %v6526_v11  ;;  %vm424_vm7 = vcmp.lt.s32.totalorder %v6523_v10, 111  ;;  %v1937_v9 = vld [vmem:[#allocation3 + $0x590] sm:$0xff] }
  0x46   :  { %150 = vrot.lane.b32.xlu1 %v6441_v1, %s6274_s23  ;;  %105 = vrot.lane.b32.xlu0 %v6441_v1, %s6275_s25  ;;  %v1969_v10 = vld [vmem:[#allocation3 + $0x690] sm:$0xff] }
  0x4a   :  { %109 = vrot.lane.b32.xlu1 %v6450_v2, %s6275_s25  ;;  %107 = vrot.lane.b32.xlu0 %v6455_v3, %s6275_s25 }
  0x4e   :  { %154 = vrot.lane.b32.xlu1 %v6450_v2, %s6274_s23  ;;  %152 = vrot.lane.b32.xlu0 %v6455_v3, %s6274_s23 }
  0x52   :  { %194 = vrot.lane.b32.xlu1 %v6441_v1, %s6276_s19  ;;  %192 = vrot.lane.b32.xlu0 %v6432_v0, %s6276_s19 }
  0x56   :  { %238 = vrot.lane.b32.xlu1 %v6441_v1, %s6277_s1  ;;  %236 = vrot.lane.b32.xlu0 %v6432_v0, %s6277_s1 }
  0x5a   :  { %198 = vrot.lane.b32.xlu1 %v6450_v2, %s6276_s19  ;;  %196 = vrot.lane.b32.xlu0 %v6455_v3, %s6276_s19 }
  0x5e   :  { %242 = vrot.lane.b32.xlu1 %v6450_v2, %s6277_s1  ;;  %240 = vrot.lane.b32.xlu0 %v6455_v3, %s6277_s1 }
  0x62   :  { %288 = vrot.lane.b32.xlu1 %v6455_v3, %s6278_s20  ;;  %286 = vrot.lane.b32.xlu0 %v6441_v1, %s6278_s20 }
  0x66   :  { %290 = vrot.lane.b32.xlu1 %v6450_v2, %s6278_s20  ;;  %284 = vrot.lane.b32.xlu0 %v6432_v0, %s6278_s20 }
  0x6a   :  { %332 = vrot.lane.b32.xlu1 %v6455_v3, %s6279_s10  ;;  %330 = vrot.lane.b32.xlu0 %v6441_v1, %s6279_s10 }
  0x6e   :  { %376 = vrot.lane.b32.xlu1 %v6455_v3, %s6280_s30  ;;  %374 = vrot.lane.b32.xlu0 %v6441_v1, %s6280_s30 }
  0x72   :  { %334 = vrot.lane.b32.xlu1 %v6450_v2, %s6279_s10  ;;  %328 = vrot.lane.b32.xlu0 %v6432_v0, %s6279_s10 }
  0x76   :  { %378 = vrot.lane.b32.xlu1 %v6450_v2, %s6280_s30  ;;  %372 = vrot.lane.b32.xlu0 %v6432_v0, %s6280_s30 }
  0x7a   :  { %420 = vrot.lane.b32.xlu1 %v6455_v3, %s6283_s21  ;;  %418 = vrot.lane.b32.xlu0 %v6441_v1, %s6283_s21 }
  0x7e   :  { %422 = vrot.lane.b32.xlu1 %v6450_v2, %s6283_s21  ;;  %416 = vrot.lane.b32.xlu0 %v6432_v0, %s6283_s21 }
  0x82   :  { %646 = vperm.xlu0 %6170, %v643_v6   ;;  %656 = vperm.xlu1 %6171, %v653_v7   ;;  %v211_v6 = vrot.slane %v5368_v50, %v6539_v20 }
  0xb4   :  { %v149_v14 = vpop.permute.xlu1 %148  ;;  %v104_v15 = vpop.permute.xlu0 %103 }
  0xb8   :  { %v151_v18 = vpop.permute.xlu1 %150  ;;  %v106_v19 = vpop.permute.xlu0 %105 }
  0xb9   :  { %v116_v23 = vsel %vm113_vm0, %v104_v15, %v106_v19  ;;  %v159_v24 = vsel %vm156_vm1, %v149_v14, %v151_v18 }
  0xba   :  { %v141_v25 = vmul.f32 %v127_v16, %v116_v23  ;;  %v185_v26 = vmul.f32 %v171_v17, %v159_v24  ;;  %v5370_v16 = vld [vmem:[%s9218_s16 + $0x5] ss:$8 sm:$0xf]  ;;  %v267_v23 = vrot.slane %v5369_v51, %v6545_v22 }
  0xbc   :  { %v110_v27 = vpop.permute.xlu1 %109  ;;  %v108_v28 = vpop.permute.xlu0 %107  ;;  %v5410_v29 = vpack.c.bf16 %v185_v26, %v141_v25 }
  0xbd   :  { %v117_v31 = vsel %vm113_vm0, %v110_v27, %v104_v15  ;;  %v114_v35 = vsel %vm113_vm0, %v108_v28, %v110_v27  ;;  %v115_v38 = vsel %vm113_vm0, %v106_v19, %v108_v28  ;;  %v223_v15 = vrot.slane %v5368_v50, %v6545_v22 }
  0xbe   :  { %5411 = vmatprep.subr.bf16.mxu0 %v5410_v29  ;;  %v140_v41 = vmul.f32 %v123_v30, %v117_v31  ;;  %v143_v44 = vmul.f32 %v135_v32, %v114_v35  ;;  %v142_v48 = vmul.f32 %v131_v33, %v115_v38  ;;  %v263_v19 = vrot.slane %v5369_v51, %v6542_v21 }
  0xbf   :  { %v307_v28 = vrot.slane %v5370_v16, %v6526_v11 }
  0xc0   :  { %v155_v39 = vpop.permute.xlu1 %154  ;;  %v153_v40 = vpop.permute.xlu0 %152 }
  0xc1   :  { %v160_v42 = vsel %vm156_vm1, %v155_v39, %v149_v14  ;;  %v158_v43 = vsel %vm156_vm1, %v151_v18, %v153_v40  ;;  %v157_v45 = vsel %vm156_vm1, %v153_v40, %v155_v39  ;;  %v219_v14 = vrot.slane %v5368_v50, %v6542_v21 }
  0xc2   :  { %v184_v46 = vmul.f32 %v167_v34, %v160_v42  ;;  %v187_v47 = vmul.f32 %v179_v36, %v157_v45  ;;  %v186_v49 = vmul.f32 %v175_v37, %v158_v43  ;;  %v255_v18 = vrot.slane %v5369_v51, %v6539_v20 }
  0xc3   :  { %v311_v43 = vrot.slane %v5370_v16, %v6542_v21  ;;  %v303_v45 = vrot.slane %v5370_v16, %v6539_v20 }
  0xc4   :  { %v195_v52 = vpop.permute.xlu1 %194  ;;  %v193_v53 = vpop.permute.xlu0 %192  ;;  %v5412_v54 = vpack.c.bf16 %v184_v46, %v140_v41  ;;  %v5426_v55 = vpack.c.bf16 %v187_v47, %v143_v44  ;;  %v5428_v56 = vpack.c.bf16 %v186_v49, %v142_v48  ;;  %v315_v46 = vrot.slane %v5370_v16, %v6545_v22 }
  0xc5   :  { %v203_v59 = vsel %vm200_vm2, %v193_v53, %v195_v52 }
  0xc6   :  { %5413 = vmatpush1.bf16.msra.mxu0 %v5412_v54  ;;  %5427 = vmatprep.subr.bf16.mxu1 %v5426_v55  ;;  %v229_v63 = vmul.f32 %v215_v57, %v203_v59 }
  0xc7   :  { %5429 = vmatpush1.bf16.msra.mxu1 %v5428_v56  ;;  %v5371_v56 = vld [vmem:[%s9218_s16 + $0x6] ss:$8 sm:$0xf] }
  0xc8   :  { %v239_v60 = vpop.permute.xlu1 %238  ;;  %v237_v61 = vpop.permute.xlu0 %236  ;;  %v347_v16 = vrot.slane %v5371_v56, %v6539_v20 }
  0xc9   :  { %v247_v62 = vsel %vm244_vm3, %v237_v61, %v239_v60 }
  0xca   :  { %v273_v5 = vmul.f32 %v259_v58, %v247_v62  ;;  %v351_v62 = vrot.slane %v5371_v56, %v6526_v11 }
  0xcc   :  { %v199_v7 = vpop.permute.xlu1 %198  ;;  %v197_v8 = vpop.permute.xlu0 %196  ;;  %v5414_v12 = vpack.c.bf16 %v273_v5, %v229_v63 }
  0xcd   :  { %v204_v13 = vsel %vm200_vm2, %v199_v7, %v193_v53  ;;  %v202_v17 = vsel %vm200_vm2, %v195_v52, %v197_v8  ;;  %v201_v24 = vsel %vm200_vm2, %v197_v8, %v199_v7 }
  0xce   :  { %5415 = vmatprep.subr.bf16.mxu0 %v5414_v12  ;;  %v228_v25 = vmul.f32 %v211_v6, %v204_v13  ;;  %v230_v29 = vmul.f32 %v219_v14, %v202_v17  ;;  %v231_v33 = vmul.f32 %v223_v15, %v201_v24  ;;  %v359_v17 = vrot.slane %v5371_v56, %v6545_v22 }
  0xd0   :  { %v243_v26 = vpop.permute.xlu1 %242  ;;  %v241_v27 = vpop.permute.xlu0 %240 }
  0xd1   :  { %v248_v30 = vsel %vm244_vm3, %v243_v26, %v237_v61  ;;  %v245_v31 = vsel %vm244_vm3, %v241_v27, %v243_v26  ;;  %v246_v32 = vsel %vm244_vm3, %v239_v60, %v241_v27 }
  0xd2   :  { %v272_v34 = vmul.f32 %v255_v18, %v248_v30  ;;  %v274_v35 = vmul.f32 %v263_v19, %v246_v32  ;;  %v275_v36 = vmul.f32 %v267_v23, %v245_v31  ;;  %v5373_v18 = vld [vmem:[%s9218_s16 + $0x20] ss:$8 sm:$0xf] }
  0xd3   :  { %v439_v30 = vrot.slane %v5373_v18, %v6526_v11 }
  0xd4   :  { %v289_v37 = vpop.permute.xlu1 %288  ;;  %v287_v38 = vpop.permute.xlu0 %286  ;;  %v5416_v39 = vpack.c.bf16 %v272_v34, %v228_v25  ;;  %v5430_v40 = vpack.c.bf16 %v275_v36, %v231_v33  ;;  %v5432_v41 = vpack.c.bf16 %v274_v35, %v230_v29 }
  0xd5   :  { %v294_v42 = vsel %vm292_vm4, %v287_v38, %v289_v37 }
  0xd6   :  { %v321_v44 = vmul.f32 %v307_v28, %v294_v42  ;;  %5417 = vmatpush1.bf16.msra.mxu0 %v5416_v39  ;;  %5431 = vmatprep.subr.bf16.mxu1 %v5430_v40 }
  0xd7   :  { %5433 = vmatpush1.bf16.msra.mxu1 %v5432_v41 }
  0xd8   :  { %v291_v47 = vpop.permute.xlu1 %290  ;;  %v285_v48 = vpop.permute.xlu0 %284  ;;  %v5418_v49 = vpack.c.bf16 %v321_v44, %v6441_v1  ;;  %v5372_v1 = vld [vmem:[%s9218_s16 + $0x7] ss:$8 sm:$0xf] }
  0xd9   :  { %v293_v50 = vsel %vm292_vm4, %v289_v37, %v291_v47  ;;  %v295_v51 = vsel %vm292_vm4, %v285_v48, %v287_v38  ;;  %v296_v52 = vsel %vm292_vm4, %v291_v47, %v285_v48  ;;  %v395_v63 = vrot.slane %v5372_v1, %v6526_v11 }
  0xda   :  { %v322_v53 = vmul.f32 %v311_v43, %v293_v50  ;;  %v320_v54 = vmul.f32 %v303_v45, %v295_v51  ;;  %v323_v55 = vmul.f32 %v315_v46, %v296_v52  ;;  %5419 = vmatprep.subr.bf16.mxu0 %v5418_v49  ;;  %v399_v23 = vrot.slane %v5372_v1, %v6542_v21 }
  0xdb   :  { %v391_v24 = vrot.slane %v5372_v1, %v6539_v20  ;;  %v403_v25 = vrot.slane %v5372_v1, %v6545_v22  ;;  %v435_v45 = vrot.slane %v5373_v18, %v6539_v20  ;;  %v447_v47 = vrot.slane %v5373_v18, %v6545_v22 }
  0xdc   :  { %v333_v57 = vpop.permute.xlu1 %332  ;;  %v331_v58 = vpop.permute.xlu0 %330  ;;  %v5420_v59 = vpack.c.bf16 %v320_v54, %v6432_v0  ;;  %v5434_v60 = vpack.c.bf16 %v323_v55, %v6450_v2  ;;  %v5436_v61 = vpack.c.bf16 %v322_v53, %v6455_v3  ;;  %v355_v3 = vrot.slane %v5371_v56, %v6542_v21  ;;  %v460_v56 = vld [vmem:[%s9376_s28] sm:$0xff] }
  0xdd   :  { %v338_v5 = vsel %vm336_vm5, %v331_v58, %v333_v57  ;;  %v443_v48 = vrot.slane %v5373_v18, %v6542_v21 }
  0xde   :  { %5421 = vmatpush1.bf16.msra.mxu0 %v5420_v59  ;;  %5435 = vmatprep.subr.bf16.mxu1 %v5434_v60  ;;  %v365_v2 = vmul.f32 %v351_v62, %v338_v5 }
  0xdf   :  { %5437 = vmatpush1.bf16.msra.mxu1 %v5436_v61 }
  0xe0   :  { %v377_v6 = vpop.permute.xlu1 %376  ;;  %v375_v7 = vpop.permute.xlu0 %374 }
  0xe1   :  { %v382_v0 = vsel %vm380_vm6, %v375_v7, %v377_v6 }
  0xe2   :  { %v409_v8 = vmul.f32 %v395_v63, %v382_v0 }
  0xe4   :  { %v335_v12 = vpop.permute.xlu1 %334  ;;  %v329_v13 = vpop.permute.xlu0 %328  ;;  %v5422_v14 = vpack.c.bf16 %v409_v8, %v365_v2 }
  0xe5   :  { %v337_v15 = vsel %vm336_vm5, %v333_v57, %v335_v12  ;;  %v339_v19 = vsel %vm336_vm5, %v329_v13, %v331_v58  ;;  %v340_v26 = vsel %vm336_vm5, %v335_v12, %v329_v13 }
  0xe6   :  { %5423 = vmatprep.subr.bf16.mxu0 %v5422_v14  ;;  %v366_v27 = vmul.f32 %v355_v3, %v337_v15  ;;  %v364_v31 = vmul.f32 %v347_v16, %v339_v19  ;;  %v367_v35 = vmul.f32 %v359_v17, %v340_v26  ;;  %v1189_v16 = vld [vmem:[%s9207_s5] sm:$0xff] }
  0xe7   :  { %v1199_v17 = vld [vmem:[%s9208_s6] sm:$0xff]  ;;  %s6285_s6 = smov 97  }
  0xe8   :  { %v379_v28 = vpop.permute.xlu1 %378  ;;  %v373_v29 = vpop.permute.xlu0 %372 }
  0xe9   :  { %v381_v32 = vsel %vm380_vm6, %v377_v6, %v379_v28  ;;  %v383_v33 = vsel %vm380_vm6, %v373_v29, %v375_v7  ;;  %v384_v34 = vsel %vm380_vm6, %v379_v28, %v373_v29  ;;  %v679_v28 = vld [vmem:[%s9218_s16] ss:$8 sm:$0xf]  ;;  %v5376_v29 = vld [vmem:[%s9218_s16 + $0x1] ss:$8 sm:$0xf] }
  0xea   :  { %v410_v36 = vmul.f32 %v399_v23, %v381_v32  ;;  %v408_v37 = vmul.f32 %v391_v24, %v383_v33  ;;  %v411_v38 = vmul.f32 %v403_v25, %v384_v34  ;;  %v730_v32 = vrot.slane %v5376_v29, %v6526_v11 }
  0xec   :  { %v421_v39 = vpop.permute.xlu1 %420  ;;  %v419_v40 = vpop.permute.xlu0 %418  ;;  %v5424_v41 = vpack.c.bf16 %v408_v37, %v364_v31  ;;  %v5438_v42 = vpack.c.bf16 %v411_v38, %v367_v35  ;;  %v5440_v43 = vpack.c.bf16 %v410_v36, %v366_v27  ;;  %v688_v31 = vrot.slane %v679_v28, %v6526_v11 }
  0xed   :  { %v426_v44 = vsel %vm424_vm7, %v419_v40, %v421_v39 }
  0xee   :  { %5425 = vmatpush1.bf16.msra.mxu0 %v5424_v41  ;;  %5439 = vmatprep.subr.bf16.mxu1 %v5438_v42  ;;  %v453_v46 = vmul.f32 %v439_v30, %v426_v44  ;;  %v734_v42 = vrot.slane %v5376_v29, %v6542_v21 }
  0xef   :  { %5441 = vmatpush1.bf16.msra.mxu1 %v5440_v43  ;;  %v684_v43 = vrot.slane %v679_v28, %v6539_v20 }
  0xf0   :  { %v423_v49 = vpop.permute.xlu1 %422  ;;  %517 = vmatprep.subr.mxu0 %v453_v46  ;;  %v417_v50 = vpop.permute.xlu0 %416  ;;  %v726_v46 = vrot.slane %v5376_v29, %v6539_v20 }
  0xf1   :  { %v425_v51 = vsel %vm424_vm7, %v421_v39, %v423_v49  ;;  %v427_v52 = vsel %vm424_vm7, %v417_v50, %v419_v40  ;;  %v428_v53 = vsel %vm424_vm7, %v423_v49, %v417_v50 }
  0xf2   :  { %v452_v54 = vmul.f32 %v435_v45, %v427_v52  ;;  %v455_v55 = vmul.f32 %v447_v47, %v428_v53  ;;  %v454_v1 = vmul.f32 %v443_v48, %v425_v51  ;;  %v696_v45 = vrot.slane %v679_v28, %v6545_v22 }
  0xf3   :  { %v738_v47 = vrot.slane %v5376_v29, %v6545_v22  ;;  %v692_v48 = vrot.slane %v679_v28, %v6542_v21 }
  0xf4   :  { %518 = vmatpush1.msra.mxu0 %v452_v54  ;;  %588 = vmatprep.subr.mxu1 %v455_v55 }
  0xf5   :  { %5374 = vmatmul.mubr.msk.f32.vlgmr.msra.gmra.mrb[0].mxu0 %vm497_vm8, %v460_v56  ;;  %589 = vmatpush1.msra.mxu1 %v454_v1 }
  0xf6   :  { %5375 = vmatmul.mubr.msk.f32.vlgmr.msra.gmra.mrb[0].mxu1 %vm497_vm8, %v460_v56  ;;  %1111 = vmatprep.mubr.f32.mxu0 %v9222_v4 }
  0xf7   :  { %1182 = vmatprep.mubr.f32.mxu1 %v9222_v4 }
 0x101   :  { %v647_v57 = vpop.permute.xlu0 %646  ;;  %v657_v59 = vpop.permute.xlu1 %656 }
 0x1c8   :  { %v567_v58 = vpop.f32.mrb[0].mxu0 }
 0x1c9   :  { %v649_v60 = vmul.f32 %v647_v57, %v567_v58  ;;  %v569_v61 = vpop.f32.mrb[1].mxu0  ;;  %v638_v62 = vpop.f32.mrb[0].mxu1 }
 0x1ca   :  { %v651_v63 = vmul.f32 %v647_v57, %v638_v62  ;;  %v640_v5 = vpop.f32.mrb[1].mxu1  ;;  %v650_v8 = vmul.f32 %v647_v57, %v569_v61  ;;  %v5377_v62 = vld [vmem:[%s9218_s16 + $0x2] ss:$8 sm:$0xf] }
 0x1cb   :  { %v659_v6 = vadd.f32 %v657_v59, %v649_v60  ;;  %v652_v13 = vmul.f32 %v647_v57, %v640_v5 }
 0x1cc   :  { %v661_v7 = vadd.f32 %v657_v59, %v651_v63  ;;  %v660_v3 = vadd.f32 %v657_v59, %v650_v8  ;;  %v5378_v63 = vld [vmem:[%s9218_s16 + $0x3] ss:$8 sm:$0xf] }
 0x1cd   :  { %v6676_v0 = vmax.f32 %v659_v6, 0.0  ;;  %v662_v14 = vadd.f32 %v657_v59, %v652_v13  ;;  %v814_v13 = vrot.slane %v5378_v63, %v6526_v11 }
 0x1ce   :  { %v6678_v2 = vmax.f32 %v661_v7, 0.0  ;;  %v6692_v12 = vmax.f32 %v660_v3, 0.0  ;;  %v772_v3 = vrot.slane %v5377_v62, %v6526_v11 }
 0x1cf   :  { %667 = vrot.lane.b32.xlu1 %v6676_v0, %s6275_s25  ;;  %v6702_v15 = vmax.f32 %v662_v14, 0.0 }
 0x1d0   :  { %843 = vrot.lane.b32.xlu0 %v6678_v2, %s6278_s20 }
 0x1d3   :  { %709 = vrot.lane.b32.xlu1 %v6676_v0, %s6274_s23 }
 0x1d4   :  { %885 = vrot.lane.b32.xlu0 %v6678_v2, %s6279_s10 }
 0x1d7   :  { %671 = vrot.lane.b32.xlu1 %v6678_v2, %s6275_s25 }
 0x1d8   :  { %927 = vrot.lane.b32.xlu0 %v6678_v2, %s6280_s30 }
 0x1db   :  { %713 = vrot.lane.b32.xlu1 %v6678_v2, %s6274_s23 }
 0x1dc   :  { %669 = vrot.lane.b32.xlu0 %v6692_v12, %s6275_s25 }
 0x1df   :  { %751 = vrot.lane.b32.xlu1 %v6676_v0, %s6276_s19 }
 0x1e0   :  { %711 = vrot.lane.b32.xlu0 %v6692_v12, %s6274_s23 }
 0x1e3   :  { %793 = vrot.lane.b32.xlu1 %v6676_v0, %s6277_s1 }
 0x1e4   :  { %673 = vrot.lane.b32.xlu0 %v6702_v15, %s6275_s25 }
 0x1e7   :  { %755 = vrot.lane.b32.xlu1 %v6678_v2, %s6276_s19 }
 0x1e8   :  { %715 = vrot.lane.b32.xlu0 %v6702_v15, %s6274_s23 }
 0x1eb   :  { %797 = vrot.lane.b32.xlu1 %v6678_v2, %s6277_s1 }
 0x1ec   :  { %753 = vrot.lane.b32.xlu0 %v6692_v12, %s6276_s19 }
 0x1ef   :  { %839 = vrot.lane.b32.xlu1 %v6676_v0, %s6278_s20 }
 0x1f0   :  { %795 = vrot.lane.b32.xlu0 %v6692_v12, %s6277_s1 }
 0x1f3   :  { %881 = vrot.lane.b32.xlu1 %v6676_v0, %s6279_s10 }
 0x1f4   :  { %757 = vrot.lane.b32.xlu0 %v6702_v15, %s6276_s19 }
 0x1f7   :  { %923 = vrot.lane.b32.xlu1 %v6676_v0, %s6280_s30 }
 0x1f8   :  { %799 = vrot.lane.b32.xlu0 %v6702_v15, %s6277_s1 }
 0x1fb   :  { %841 = vrot.lane.b32.xlu1 %v6692_v12, %s6278_s20 }
 0x1fc   :  { %845 = vrot.lane.b32.xlu0 %v6702_v15, %s6278_s20 }
 0x1ff   :  { %883 = vrot.lane.b32.xlu1 %v6692_v12, %s6279_s10 }
 0x200   :  { %887 = vrot.lane.b32.xlu0 %v6702_v15, %s6279_s10 }
 0x203   :  { %925 = vrot.lane.b32.xlu1 %v6692_v12, %s6280_s30 }
 0x204   :  { %929 = vrot.lane.b32.xlu0 %v6702_v15, %s6280_s30 }
 0x207   :  { %967 = vrot.lane.b32.xlu1 %v6692_v12, %s6283_s21 }
 0x208   :  { %969 = vrot.lane.b32.xlu0 %v6678_v2, %s6283_s21 }
 0x20b   :  { %965 = vrot.lane.b32.xlu1 %v6676_v0, %s6283_s21 }
 0x20c   :  { %971 = vrot.lane.b32.xlu0 %v6702_v15, %s6283_s21 }
 0x20f   :  { %1192 = vperm.xlu1 %6171, %v1189_v16  }
 0x210   :  { %1202 = vperm.xlu0 %6170, %v1199_v17  }
 0x241   :  { %v668_v18 = vpop.permute.xlu1 %667 }
 0x242   :  { %v6754_v19 = vpop.permute.xlu0 %843 }
 0x245   :  { %v710_v23 = vpop.permute.xlu1 %709 }
 0x246   :  { %v6756_v24 = vpop.permute.xlu0 %885 }
 0x249   :  { %v672_v25 = vpop.permute.xlu1 %671 }
 0x24a   :  { %v6758_v26 = vpop.permute.xlu0 %927 }
 0x24d   :  { %v714_v27 = vpop.permute.xlu1 %713 }
 0x24e   :  { %v670_v30 = vpop.permute.xlu0 %669 }
 0x24f   :  { %v677_v33 = vsel %vm113_vm0, %v668_v18, %v670_v30  ;;  %v676_v52 = vsel %vm113_vm0, %v670_v30, %v672_v25 }
 0x250   :  { %v702_v37 = vmul.f32 %v688_v31, %v677_v33  ;;  %v703_v60 = vmul.f32 %v692_v48, %v676_v52  ;;  %v768_v33 = vrot.slane %v5377_v62, %v6539_v20 }
 0x251   :  { %v6770_v34 = vpop.permute.xlu1 %751 }
 0x252   :  { %v712_v35 = vpop.permute.xlu0 %711 }
 0x253   :  { %v719_v36 = vsel %vm156_vm1, %v710_v23, %v712_v35  ;;  %v718_v44 = vsel %vm156_vm1, %v712_v35, %v714_v27  ;;  %v5379_v35 = vld [vmem:[%s9218_s16 + $0x5] ss:$8 sm:$0xf] }
 0x254   :  { %v744_v38 = vmul.f32 %v730_v32, %v719_v36  ;;  %v745_v54 = vmul.f32 %v734_v42, %v718_v44  ;;  %v776_v32 = vrot.slane %v5377_v62, %v6542_v21  ;;  %v864_v48 = vrot.slane %v5379_v35, %v6542_v21 }
 0x255   :  { %v6774_v39 = vpop.permute.xlu1 %793  ;;  %v868_v52 = vrot.slane %v5379_v35, %v6545_v22 }
 0x256   :  { %v674_v40 = vpop.permute.xlu0 %673  ;;  %v5442_v41 = vpack.c.bf16 %v744_v38, %v702_v37  ;;  %v5460_v8 = vpack.c.bf16 %v745_v54, %v703_v60  ;;  %v780_v37 = vrot.slane %v5377_v62, %v6545_v22  ;;  %v810_v38 = vrot.slane %v5378_v63, %v6539_v20 }
 0x257   :  { %v675_v49 = vsel %vm113_vm0, %v672_v25, %v674_v40  ;;  %v678_v50 = vsel %vm113_vm0, %v674_v40, %v668_v18  ;;  %v822_v40 = vrot.slane %v5378_v63, %v6545_v22 }
 0x258   :  { %5443 = vmatprep.subr.bf16.mxu0 %v5442_v41  ;;  %v701_v1 = vmul.f32 %v684_v43, %v678_v50  ;;  %v704_v57 = vmul.f32 %v696_v45, %v675_v49 }
 0x259   :  { %v756_v51 = vpop.permute.xlu1 %755 }
 0x25a   :  { %v716_v53 = vpop.permute.xlu0 %715 }
 0x25b   :  { %v717_v55 = vsel %vm156_vm1, %v714_v27, %v716_v53  ;;  %v720_v56 = vsel %vm156_vm1, %v716_v53, %v710_v23  ;;  %v818_v27 = vrot.slane %v5378_v63, %v6542_v21 }
 0x25c   :  { %v743_v58 = vmul.f32 %v726_v46, %v720_v56  ;;  %v746_v59 = vmul.f32 %v738_v47, %v717_v55  ;;  %v856_v46 = vrot.slane %v5379_v35, %v6539_v20  ;;  %v860_v47 = vrot.slane %v5379_v35, %v6526_v11 }
 0x25d   :  { %v798_v61 = vpop.permute.xlu1 %797 }
 0x25e   :  { %v5444_v5 = vpack.c.bf16 %v743_v58, %v701_v1  ;;  %v754_v6 = vpop.permute.xlu0 %753  ;;  %v5458_v7 = vpack.c.bf16 %v746_v59, %v704_v57 }
 0x25f   :  { %v761_v14 = vsel %vm200_vm2, %v6770_v34, %v754_v6  ;;  %v760_v36 = vsel %vm200_vm2, %v754_v6, %v756_v51 }
 0x260   :  { %5445 = vmatpush1.bf16.msra.mxu0 %v5444_v5  ;;  %5459 = vmatprep.subr.bf16.mxu1 %v5458_v7  ;;  %v786_v23 = vmul.f32 %v772_v3, %v761_v14  ;;  %v787_v49 = vmul.f32 %v776_v32, %v760_v36  ;;  %v5381_v3 = vld [vmem:[%s9218_s16 + $0x7] ss:$8 sm:$0xf] }
 0x261   :  { %5461 = vmatpush1.bf16.msra.mxu1 %v5460_v8  ;;  %v840_v16 = vpop.permute.xlu1 %839  ;;  %v952_v32 = vrot.slane %v5381_v3, %v6545_v22 }
 0x262   :  { %v796_v17 = vpop.permute.xlu0 %795 }
 0x263   :  { %v803_v18 = vsel %vm244_vm3, %v6774_v39, %v796_v17  ;;  %v802_v29 = vsel %vm244_vm3, %v796_v17, %v798_v61 }
 0x264   :  { %v828_v25 = vmul.f32 %v814_v13, %v803_v18  ;;  %v829_v41 = vmul.f32 %v818_v27, %v802_v29  ;;  %v5382_v29 = vld [vmem:[%s9218_s16 + $0x20] ss:$8 sm:$0xf] }
 0x265   :  { %v6809_v28 = vpop.permute.xlu1 %881 }
 0x266   :  { %v758_v30 = vpop.permute.xlu0 %757  ;;  %v5446_v31 = vpack.c.bf16 %v828_v25, %v786_v23  ;;  %v5464_v56 = vpack.c.bf16 %v829_v41, %v787_v49 }
 0x267   :  { %v759_v42 = vsel %vm200_vm2, %v756_v51, %v758_v30  ;;  %v762_v43 = vsel %vm200_vm2, %v758_v30, %v6770_v34  ;;  %v944_v30 = vrot.slane %v5381_v3, %v6526_v11 }
 0x268   :  { %5447 = vmatprep.subr.bf16.mxu0 %v5446_v31  ;;  %v785_v34 = vmul.f32 %v768_v33, %v762_v43  ;;  %v788_v53 = vmul.f32 %v780_v37, %v759_v42  ;;  %v986_v37 = vrot.slane %v5382_v29, %v6526_v11 }
 0x269   :  { %v6828_v44 = vpop.permute.xlu1 %923 }
 0x26a   :  { %v800_v45 = vpop.permute.xlu0 %799 }
 0x26b   :  { %v801_v50 = vsel %vm244_vm3, %v798_v61, %v800_v45  ;;  %v804_v51 = vsel %vm244_vm3, %v800_v45, %v6774_v39  ;;  %v5380_v39 = vld [vmem:[%s9218_s16 + $0x6] ss:$8 sm:$0xf] }
 0x26c   :  { %v827_v54 = vmul.f32 %v810_v38, %v804_v51  ;;  %v830_v55 = vmul.f32 %v822_v40, %v801_v50  ;;  %v898_v14 = vrot.slane %v5380_v39, %v6539_v20  ;;  %v906_v23 = vrot.slane %v5380_v39, %v6542_v21 }
 0x26d   :  { %v842_v1 = vpop.permute.xlu1 %841  ;;  %v910_v31 = vrot.slane %v5380_v39, %v6545_v22 }
 0x26e   :  { %v5448_v57 = vpack.c.bf16 %v827_v54, %v785_v34  ;;  %v848_v58 = vsel %vm292_vm4, %v842_v1, %v6754_v19  ;;  %v849_v59 = vsel %vm292_vm4, %v840_v16, %v842_v1  ;;  %v846_v60 = vpop.permute.xlu0 %845  ;;  %v5462_v61 = vpack.c.bf16 %v830_v55, %v788_v53 }
 0x26f   :  { %v873_v62 = vmul.f32 %v856_v46, %v849_v59  ;;  %v874_v63 = vmul.f32 %v860_v47, %v848_v58  ;;  %v847_v5 = vsel %vm292_vm4, %v6754_v19, %v846_v60  ;;  %v850_v6 = vsel %vm292_vm4, %v846_v60, %v840_v16 }
 0x270   :  { %v875_v7 = vmul.f32 %v864_v48, %v847_v5  ;;  %v876_v8 = vmul.f32 %v868_v52, %v850_v6  ;;  %5449 = vmatpush1.bf16.msra.mxu0 %v5448_v57  ;;  %5463 = vmatprep.subr.bf16.mxu1 %v5462_v61  ;;  %v902_v16 = vrot.slane %v5380_v39, %v6526_v11 }
 0x271   :  { %v5452_v13 = vpack.c.bf16 %v873_v62, %v6676_v0  ;;  %5465 = vmatpush1.bf16.msra.mxu1 %v5464_v56  ;;  %v884_v17 = vpop.permute.xlu1 %883  ;;  %v5450_v18 = vpack.c.bf16 %v874_v63, %v6692_v12  ;;  %v994_v57 = vrot.slane %v5382_v29, %v6545_v22  ;;  %v1007_v63 = vld [vmem:[%s9206_s4] sm:$0xff]  ;;  %s6286_s4 = smov 95  }
 0x272   :  { %v5468_v19 = vpack.c.bf16 %v875_v7, %v6678_v2  ;;  %v888_v25 = vpop.permute.xlu0 %887  ;;  %v5466_v27 = vpack.c.bf16 %v876_v8, %v6702_v15  ;;  %v890_v0 = vsel %vm336_vm5, %v884_v17, %v6756_v24  ;;  %v891_v12 = vsel %vm336_vm5, %v6809_v28, %v884_v17 }
 0x273   :  { %5451 = vmatprep.subr.bf16.mxu0 %v5450_v18  ;;  %v940_v2 = vrot.slane %v5381_v3, %v6539_v20  ;;  %v948_v15 = vrot.slane %v5381_v3, %v6542_v21  ;;  %v889_v33 = vsel %vm336_vm5, %v6756_v24, %v888_v25  ;;  %v892_v35 = vsel %vm336_vm5, %v888_v25, %v6809_v28 }
 0x274   :  { %5453 = vmatpush1.bf16.msra.mxu0 %v5452_v13  ;;  %5467 = vmatprep.subr.bf16.mxu1 %v5466_v27  ;;  %v915_v38 = vmul.f32 %v898_v14, %v891_v12  ;;  %v916_v40 = vmul.f32 %v902_v16, %v890_v0  ;;  %v917_v47 = vmul.f32 %v906_v23, %v889_v33 }
 0x275   :  { %5469 = vmatpush1.bf16.msra.mxu1 %v5468_v19  ;;  %v926_v36 = vpop.permute.xlu1 %925  ;;  %v918_v48 = vmul.f32 %v910_v31, %v892_v35 }
 0x276   :  { %v932_v41 = vsel %vm380_vm6, %v926_v36, %v6758_v26  ;;  %v933_v42 = vsel %vm380_vm6, %v6828_v44, %v926_v36  ;;  %v930_v43 = vpop.permute.xlu0 %929 }
 0x277   :  { %v957_v24 = vmul.f32 %v940_v2, %v933_v42  ;;  %v958_v45 = vmul.f32 %v944_v30, %v932_v41  ;;  %v931_v28 = vsel %vm380_vm6, %v6758_v26, %v930_v43  ;;  %v934_v46 = vsel %vm380_vm6, %v930_v43, %v6828_v44 }
 0x278   :  { %v959_v49 = vmul.f32 %v948_v15, %v931_v28  ;;  %v960_v50 = vmul.f32 %v952_v32, %v934_v46  ;;  %v982_v26 = vrot.slane %v5382_v29, %v6539_v20  ;;  %v990_v44 = vrot.slane %v5382_v29, %v6542_v21  ;;  %v1735_v15 = vld [vmem:[%s9210_s8] sm:$0xff] }
 0x279   :  { %v5456_v51 = vpack.c.bf16 %v957_v24, %v915_v38  ;;  %v968_v52 = vpop.permute.xlu1 %967  ;;  %v5454_v34 = vpack.c.bf16 %v958_v45, %v916_v40  ;;  %v1745_v32 = vld [vmem:[%s9211_s9] sm:$0xff] }
 0x27a   :  { %v5472_v53 = vpack.c.bf16 %v959_v49, %v917_v47  ;;  %v970_v54 = vpop.permute.xlu0 %969  ;;  %v5470_v55 = vpack.c.bf16 %v960_v50, %v918_v48  ;;  %v7001_v38 = vld [vmem:[%s9218_s16 + $0x1] ss:$8 sm:$0xf] }
 0x27b   :  { %v974_v56 = vsel %vm424_vm7, %v968_v52, %v970_v54  ;;  %5455 = vmatprep.subr.bf16.mxu0 %v5454_v34  ;;  %v1276_v43 = vrot.slane %v7001_v38, %v6526_v11  ;;  %v7026_v34 = vld [vmem:[%s9218_s16 + $0x3] ss:$8 sm:$0xf] }
 0x27c   :  { %5457 = vmatpush1.bf16.msra.mxu0 %v5456_v51  ;;  %5471 = vmatprep.subr.bf16.mxu1 %v5470_v55  ;;  %v1000_v1 = vmul.f32 %v986_v37, %v974_v56  ;;  %v6996_v37 = vld [vmem:[%s9218_s16] ss:$8 sm:$0xf]  ;;  %v1360_v55 = vrot.slane %v7026_v34, %v6526_v11  ;;  %v1272_v56 = vrot.slane %v7001_v38, %v6539_v20 }
 0x27d   :  { %5473 = vmatpush1.bf16.msra.mxu1 %v5472_v53  ;;  %v966_v58 = vpop.permute.xlu1 %965  ;;  %v1234_v41 = vrot.slane %v6996_v37, %v6526_v11  ;;  %v7031_v53 = vld [vmem:[%s9218_s16 + $0x2] ss:$8 sm:$0xf] }
 0x27e   :  { %v975_v59 = vsel %vm424_vm7, %v966_v58, %v968_v52  ;;  %v972_v60 = vpop.permute.xlu0 %971  ;;  %1063 = vmatprep.subr.mxu0 %v1000_v1 }
 0x27f   :  { %v999_v61 = vmul.f32 %v982_v26, %v975_v59  ;;  %v973_v39 = vsel %vm424_vm7, %v970_v54, %v972_v60  ;;  %v976_v62 = vsel %vm424_vm7, %v972_v60, %v966_v58 }
 0x280   :  { %v1001_v5 = vmul.f32 %v990_v44, %v973_v39  ;;  %v1002_v6 = vmul.f32 %v994_v57, %v976_v62  ;;  %v1230_v44 = vrot.slane %v6996_v37, %v6539_v20  ;;  %v1318_v57 = vrot.slane %v7031_v53, %v6526_v11 }
 0x281   :  { %1064 = vmatpush1.msra.mxu0 %v999_v61 }
 0x282   :  { %5383 = vmatmul.mubr.msk.f32.vlgmr.msra.gmra.mrb[2].mxu0 %vm497_vm8, %v1007_v63  ;;  %1134 = vmatprep.subr.mxu1 %v1002_v6 }
 0x283   :  { %1135 = vmatpush1.msra.mxu1 %v1001_v5  ;;  %1657 = vmatprep.mubr.f32.mxu0 %v9222_v4  ;;  %v1356_v5 = vrot.slane %v7026_v34, %v6539_v20 }
 0x284   :  { %5384 = vmatmul.mubr.msk.f32.vlgmr.msra.gmra.mrb[2].mxu1 %vm497_vm8, %v1007_v63 }
 0x285   :  { %1728 = vmatprep.mubr.f32.mxu1 %v9222_v4  ;;  %v1914_v4 = vld [vmem:[#allocation3 + $0x4d8] sm:$0xff] }
 0x28e   :  { %v1193_v7 = vpop.permute.xlu1 %1192 }
 0x28f   :  { %v1203_v14 = vpop.permute.xlu0 %1202 }
 0x355   :  { %v1113_v8 = vpop.f32.mrb[2].mxu0 }
 0x356   :  { %v1195_v3 = vmul.f32 %v1193_v7, %v1113_v8  ;;  %v1115_v13 = vpop.f32.mrb[3].mxu0 }
 0x357   :  { %v1184_v17 = vpop.f32.mrb[2].mxu1  ;;  %v1196_v19 = vmul.f32 %v1193_v7, %v1115_v13  ;;  %v7071_v13 = vld [vmem:[%s9218_s16 + $0x5] ss:$8 sm:$0xf] }
 0x358   :  { %v1205_v18 = vadd.f32 %v1203_v14, %v1195_v3  ;;  %v1197_v16 = vmul.f32 %v1193_v7, %v1184_v17  ;;  %v1186_v23 = vpop.f32.mrb[3].mxu1 }
 0x359   :  { %v1206_v29 = vadd.f32 %v1203_v14, %v1196_v19  ;;  %v1198_v2 = vmul.f32 %v1193_v7, %v1186_v23  ;;  %v1314_v7 = vrot.slane %v7031_v53, %v6539_v20 }
 0x35a   :  { %v6913_v25 = vmax.f32 %v1205_v18, 0.0  ;;  %v1207_v27 = vadd.f32 %v1203_v14, %v1197_v16 }
 0x35b   :  { %v6921_v12 = vmax.f32 %v1206_v29, 0.0  ;;  %v1208_v30 = vadd.f32 %v1203_v14, %v1198_v2  ;;  %v1402_v29 = vrot.slane %v7071_v13, %v6539_v20  ;;  %v1406_v2 = vrot.slane %v7071_v13, %v6526_v11 }
 0x35c   :  { %v6915_v0 = vmax.f32 %v1207_v27, 0.0  ;;  %1213 = vrot.lane.b32.xlu1 %v6913_v25, %s6275_s25 }
 0x35d   :  { %v6931_v31 = vmax.f32 %v1208_v30, 0.0 }
 0x35e   :  { %1389 = vrot.lane.b32.xlu0 %v6915_v0, %s6278_s20 }
 0x360   :  { %1255 = vrot.lane.b32.xlu1 %v6913_v25, %s6274_s23 }
 0x362   :  { %1215 = vrot.lane.b32.xlu0 %v6921_v12, %s6275_s25 }
 0x364   :  { %1297 = vrot.lane.b32.xlu1 %v6913_v25, %s6276_s19 }
 0x366   :  { %1257 = vrot.lane.b32.xlu0 %v6921_v12, %s6274_s23 }
 0x368   :  { %1339 = vrot.lane.b32.xlu1 %v6913_v25, %s6277_s1 }
 0x36a   :  { %1261 = vrot.lane.b32.xlu0 %v6931_v31, %s6274_s23 }
 0x36c   :  { %1385 = vrot.lane.b32.xlu1 %v6913_v25, %s6278_s20 }
 0x36e   :  { %1299 = vrot.lane.b32.xlu0 %v6921_v12, %s6276_s19 }
 0x370   :  { %1431 = vrot.lane.b32.xlu1 %v6915_v0, %s6279_s10 }
 0x372   :  { %1341 = vrot.lane.b32.xlu0 %v6921_v12, %s6277_s1 }
 0x374   :  { %1219 = vrot.lane.b32.xlu1 %v6931_v31, %s6275_s25 }
 0x376   :  { %1345 = vrot.lane.b32.xlu0 %v6931_v31, %s6277_s1 }
 0x378   :  { %1303 = vrot.lane.b32.xlu1 %v6931_v31, %s6276_s19 }
 0x37a   :  { %1427 = vrot.lane.b32.xlu0 %v6913_v25, %s6279_s10 }
 0x37c   :  { %1387 = vrot.lane.b32.xlu1 %v6921_v12, %s6278_s20 }
 0x37e   :  { %1429 = vrot.lane.b32.xlu0 %v6921_v12, %s6279_s10 }
 0x380   :  { %1473 = vrot.lane.b32.xlu1 %v6915_v0, %s6280_s30 }
 0x382   :  { %1471 = vrot.lane.b32.xlu0 %v6921_v12, %s6280_s30 }
 0x384   :  { %1469 = vrot.lane.b32.xlu1 %v6913_v25, %s6280_s30 }
 0x386   :  { %1513 = vrot.lane.b32.xlu0 %v6921_v12, %s6283_s21 }
 0x388   :  { %1515 = vrot.lane.b32.xlu1 %v6915_v0, %s6283_s21 }
 0x38a   :  { %1511 = vrot.lane.b32.xlu0 %v6913_v25, %s6283_s21 }
 0x38c   :  { %1217 = vrot.lane.b32.xlu1 %v6915_v0, %s6275_s25  ;;  %s6287_s25 = smov 32  }
 0x38e   :  { %1259 = vrot.lane.b32.xlu0 %v6915_v0, %s6274_s23  ;;  %s6288_s23 = smov 31  }
 0x390   :  { %1301 = vrot.lane.b32.xlu1 %v6915_v0, %s6276_s19  ;;  %s6289_s19 = smov 96  }
 0x392   :  { %1343 = vrot.lane.b32.xlu0 %v6915_v0, %s6277_s1 }
 0x394   :  { %1391 = vrot.lane.b32.xlu1 %v6931_v31, %s6278_s20 }
 0x396   :  { %1433 = vrot.lane.b32.xlu0 %v6931_v31, %s6279_s10 }
 0x398   :  { %1475 = vrot.lane.b32.xlu1 %v6931_v31, %s6280_s30 }
 0x39a   :  { %1517 = vrot.lane.b32.xlu0 %v6931_v31, %s6283_s21 }
 0x39c   :  { %1738 = vperm.xlu1 %6171, %v1735_v15  }
 0x39e   :  { %1748 = vperm.xlu0 %6170, %v1745_v32  }
 0x3ce   :  { %v1214_v33 = vpop.permute.xlu1 %1213 }
 0x3d0   :  { %v6991_v35 = vpop.permute.xlu0 %1389 }
 0x3d2   :  { %v1256_v36 = vpop.permute.xlu1 %1255 }
 0x3d4   :  { %v7003_v40 = vpop.permute.xlu0 %1215 }
 0x3d5   :  { %v1223_v24 = vsel %vm113_vm0, %v1214_v33, %v7003_v40 }
 0x3d6   :  { %v1298_v42 = vpop.permute.xlu1 %1297  ;;  %v1248_v46 = vmul.f32 %v1234_v41, %v1223_v24  ;;  %v7098_v41 = vld [vmem:[%s9218_s16 + $0x7] ss:$8 sm:$0xf] }
 0x3d8   :  { %v7012_v45 = vpop.permute.xlu0 %1257 }
 0x3d9   :  { %v1265_v28 = vsel %vm156_vm1, %v1256_v36, %v7012_v45 }
 0x3da   :  { %v1290_v47 = vmul.f32 %v1276_v43, %v1265_v28  ;;  %v1340_v48 = vpop.permute.xlu1 %1339 }
 0x3dc   :  { %v7017_v49 = vpop.permute.xlu0 %1261  ;;  %v5474_v50 = vpack.c.bf16 %v1290_v47, %v1248_v46 }
 0x3dd   :  { %v1266_v1 = vsel %vm156_vm1, %v7017_v49, %v1256_v36  ;;  %v7093_v36 = vld [vmem:[%s9218_s16 + $0x6] ss:$8 sm:$0xf] }
 0x3de   :  { %5475 = vmatprep.subr.bf16.mxu0 %v5474_v50  ;;  %v7019_v51 = vpop.permute.xlu1 %1385  ;;  %v1289_v62 = vmul.f32 %v1272_v56, %v1266_v1  ;;  %v1448_v46 = vrot.slane %v7093_v36, %v6526_v11  ;;  %v1444_v56 = vrot.slane %v7093_v36, %v6539_v20 }
 0x3e0   :  { %v7021_v52 = vpop.permute.xlu0 %1299 }
 0x3e1   :  { %v1307_v59 = vsel %vm200_vm2, %v1298_v42, %v7021_v52 }
 0x3e2   :  { %v7033_v54 = vpop.permute.xlu1 %1431  ;;  %v1332_v8 = vmul.f32 %v1318_v57, %v1307_v59  ;;  %v7124_v57 = vld [vmem:[%s9218_s16 + $0x20] ss:$8 sm:$0xf] }
 0x3e4   :  { %v7039_v26 = vpop.permute.xlu0 %1341 }
 0x3e5   :  { %v1349_v58 = vsel %vm244_vm3, %v1340_v48, %v7039_v26 }
 0x3e6   :  { %v7054_v60 = vpop.permute.xlu1 %1219  ;;  %v1374_v61 = vmul.f32 %v1360_v55, %v1349_v58 }
 0x3e7   :  { %v1224_v39 = vsel %vm113_vm0, %v7054_v60, %v1214_v33 }
 0x3e8   :  { %v1247_v63 = vmul.f32 %v1230_v44, %v1224_v39  ;;  %v7061_v6 = vpop.permute.xlu0 %1345  ;;  %v5478_v19 = vpack.c.bf16 %v1374_v61, %v1332_v8  ;;  %v1532_v8 = vrot.slane %v7124_v57, %v6526_v11 }
 0x3e9   :  { %v1350_v3 = vsel %vm244_vm3, %v7061_v6, %v1340_v48  ;;  %v1490_v48 = vrot.slane %v7098_v41, %v6526_v11  ;;  %v1961_v11 = vld [vmem:[#allocation3 + $0x650] sm:$0xff] }
 0x3ea   :  { %v5476_v14 = vpack.c.bf16 %v1289_v62, %v1247_v63  ;;  %v7073_v17 = vpop.permute.xlu1 %1303  ;;  %v1373_v16 = vmul.f32 %v1356_v5, %v1350_v3 }
 0x3eb   :  { %v1308_v18 = vsel %vm200_vm2, %v7073_v17, %v1298_v42 }
 0x3ec   :  { %v1331_v23 = vmul.f32 %v1314_v7, %v1308_v18  ;;  %v7078_v27 = vpop.permute.xlu0 %1427  ;;  %5477 = vmatpush1.bf16.msra.mxu0 %v5476_v14  ;;  %v1528_v18 = vrot.slane %v7124_v57, %v6539_v20 }
 0x3ed   :  { %5479 = vmatprep.subr.bf16.mxu0 %v5478_v19  ;;  %v1760_v19 = vld [vmem:[#allocation3 + $0x8] sm:$0xff] }
 0x3ee   :  { %v5480_v30 = vpack.c.bf16 %v1373_v16, %v1331_v23  ;;  %v1388_v15 = vpop.permute.xlu1 %1387  ;;  %v1768_v16 = vld [vmem:[#allocation3 + $0x48] sm:$0xff] }
 0x3ef   :  { %v1394_v32 = vsel %vm292_vm4, %v1388_v15, %v6991_v35  ;;  %v1395_v33 = vsel %vm292_vm4, %v7019_v51, %v1388_v15 }
 0x3f0   :  { %v1419_v42 = vmul.f32 %v1402_v29, %v1395_v33  ;;  %v1420_v43 = vmul.f32 %v1406_v2, %v1394_v32  ;;  %v1430_v24 = vpop.permute.xlu0 %1429  ;;  %5481 = vmatpush1.bf16.msra.mxu0 %v5480_v30  ;;  %v1759_v29 = vld [vmem:[#allocation3] sm:$0xff]  ;;  %v1776_v32 = vld [vmem:[#allocation3 + $0x88] sm:$0xff] }
 0x3f1   :  { %v1436_v55 = vsel %vm336_vm5, %v1430_v24, %v7033_v54  ;;  %v1437_v1 = vsel %vm336_vm5, %v7078_v27, %v1430_v24  ;;  %v1767_v2 = vld [vmem:[#allocation3 + $0x40] sm:$0xff]  ;;  %v1784_v33 = vld [vmem:[#allocation3 + $0xc8] sm:$0xff]  ;;  %v1242_v24 = vrot.slane %v6996_v37, %v6545_v22 }
 0x3f2   :  { %v5484_v28 = vpack.c.bf16 %v1419_v42, %v6913_v25  ;;  %v7103_v47 = vpop.permute.xlu1 %1473  ;;  %v5482_v50 = vpack.c.bf16 %v1420_v43, %v6921_v12  ;;  %v1486_v25 = vrot.slane %v7098_v41, %v6539_v20  ;;  %v1462_v58 = vmul.f32 %v1448_v46, %v1436_v55  ;;  %v1946_v20 = vld [vmem:[#allocation3 + $0x5d8] sm:$0xff] }
 0x3f3   :  { %v1461_v62 = vmul.f32 %v1444_v56, %v1437_v1  ;;  %v1238_v43 = vrot.slane %v6996_v37, %v6542_v21  ;;  %v1284_v55 = vrot.slane %v7001_v38, %v6545_v22  ;;  %v7158_v56 = vld [vmem:[%s9209_s7] sm:$0xff]  ;;  %s6284_s7 = smov 33  }
 0x3f4   :  { %v1472_v44 = vpop.permute.xlu0 %1471  ;;  %5483 = vmatprep.subr.bf16.mxu0 %v5482_v50  ;;  %v1280_v50 = vrot.slane %v7001_v38, %v6542_v21  ;;  %v1783_v37 = vld [vmem:[#allocation3 + $0xc0] sm:$0xff] }
 0x3f5   :  { %v1478_v12 = vsel %vm380_vm6, %v1472_v44, %v7103_v47  ;;  %5485 = vmatpush1.bf16.msra.mxu0 %v5484_v28  ;;  %v7149_v28 = vpack.c.bf16 %v1768_v16, %v1760_v19  ;;  %v1410_v16 = vrot.slane %v7071_v13, %v6542_v21 }
 0x3f6   :  { %v1504_v59 = vmul.f32 %v1490_v48, %v1478_v12  ;;  %v7126_v61 = vpop.permute.xlu1 %1469 }
 0x3f7   :  { %v1479_v39 = vsel %vm380_vm6, %v7126_v61, %v1472_v44  ;;  %v7160_v44 = vpack.c.bf16 %v1767_v2, %v1759_v29 }
 0x3f8   :  { %v1503_v63 = vmul.f32 %v1486_v25, %v1479_v39  ;;  %v1514_v5 = vpop.permute.xlu0 %1513  ;;  %v5486_v7 = vpack.c.bf16 %v1504_v59, %v1462_v58  ;;  %v1775_v25 = vld [vmem:[#allocation3 + $0x80] sm:$0xff]  ;;  %v7168_v58 = vpack.c.bf16 %v1784_v33, %v1776_v32  ;;  %v1322_v59 = vrot.slane %v7031_v53, %v6542_v21 }
 0x3f9   :  { %v1326_v39 = vrot.slane %v7031_v53, %v6545_v22  ;;  %v7187_v53 = vpack.c.bf16 %v1783_v37, %v1775_v25  ;;  %v1414_v32 = vrot.slane %v7071_v13, %v6545_v22  ;;  %v1791_v33 = vld [vmem:[#allocation3 + $0x100] sm:$0xff] }
 0x3fa   :  { %v5488_v3 = vpack.c.bf16 %v1503_v63, %v1461_v62  ;;  %5487 = vmatprep.subr.bf16.mxu0 %v5486_v7  ;;  %v7133_v14 = vpop.permute.xlu1 %1515  ;;  %v1364_v62 = vrot.slane %v7026_v34, %v6542_v21  ;;  %v1792_v63 = vld [vmem:[#allocation3 + $0x108] sm:$0xff] }
 0x3fb   :  { %v1520_v23 = vsel %vm424_vm7, %v1514_v5, %v7133_v14 }
 0x3fc   :  { %v7140_v30 = vpop.permute.xlu0 %1511  ;;  %5489 = vmatpush1.bf16.msra.mxu0 %v5488_v3  ;;  %v1546_v15 = vmul.f32 %v1532_v8, %v1520_v23 }
 0x3fd   :  { %v1521_v42 = vsel %vm424_vm7, %v7140_v30, %v1514_v5  ;;  %v1800_v5 = vld [vmem:[#allocation3 + $0x148] sm:$0xff] }
 0x3fe   :  { %v1545_v46 = vmul.f32 %v1528_v18, %v1521_v42  ;;  %1609 = vmatprep.subr.mxu0 %v1546_v15  ;;  %v1218_v48 = vpop.permute.xlu1 %1217  ;;  %v7199_v23 = vpack.c.bf16 %v1800_v5, %v1792_v63  ;;  %v1799_v42 = vld [vmem:[#allocation3 + $0x140] sm:$0xff]  ;;  %v1824_v5 = vld [vmem:[#allocation3 + $0x208] sm:$0xff] }
 0x3ff   :  { %v1221_v1 = vsel %vm113_vm0, %v1218_v48, %v7054_v60  ;;  %v1222_v12 = vsel %vm113_vm0, %v7003_v40, %v1218_v48  ;;  %v1368_v60 = vrot.slane %v7026_v34, %v6545_v22  ;;  %v1808_v48 = vld [vmem:[#allocation3 + $0x188] sm:$0xff] }
 0x400   :  { %v1260_v38 = vpop.permute.xlu0 %1259  ;;  %1610 = vmatpush1.msra.mxu0 %v1545_v46  ;;  %v1249_v8 = vmul.f32 %v1238_v43, %v1222_v12  ;;  %v1250_v3 = vmul.f32 %v1242_v24, %v1221_v1  ;;  %v1498_v46 = vrot.slane %v7098_v41, %v6545_v22  ;;  %v7221_v1 = vpack.c.bf16 %v1799_v42, %v1791_v33  ;;  %v1807_v12 = vld [vmem:[#allocation3 + $0x180] sm:$0xff] }
 0x401   :  { %v1263_v40 = vsel %vm156_vm1, %v1260_v38, %v7017_v49  ;;  %v1264_v7 = vsel %vm156_vm1, %v7012_v45, %v1260_v38  ;;  %5392 = vmatmul.mubr.msk.f32.vlgmr.msra.gmra.mrb[4].mxu0 %vm497_vm8, %v7158_v56  ;;  %5507 = vmatprep.subr.bf16.mxu0 %v7149_v28  ;;  %v1815_v38 = vld [vmem:[#allocation3 + $0x1c0] sm:$0xff]  ;;  %v1540_v33 = vrot.slane %v7124_v57, %v6545_v22 }
 0x402   :  { %v1291_v34 = vmul.f32 %v1280_v50, %v1264_v7  ;;  %v1292_v18 = vmul.f32 %v1284_v55, %v1263_v40  ;;  %v1302_v19 = vpop.permute.xlu1 %1301  ;;  %5509 = vmatpush1.bf16.msra.mxu0 %v7160_v44  ;;  %v1816_v50 = vld [vmem:[#allocation3 + $0x1c8] sm:$0xff]  ;;  %v1494_v7 = vrot.slane %v7098_v41, %v6542_v21 }
 0x403   :  { %v1305_v49 = vsel %vm200_vm2, %v1302_v19, %v7073_v17  ;;  %v1306_v45 = vsel %vm200_vm2, %v7021_v52, %v1302_v19  ;;  %5511 = vmatprep.subr.bf16.mxu0 %v7168_v58  ;;  %v1456_v17 = vrot.slane %v7093_v36, %v6545_v22  ;;  %v7223_v63 = vpack.c.bf16 %v1816_v50, %v1808_v48  ;;  %v1832_v40 = vld [vmem:[#allocation3 + $0x248] sm:$0xff]  ;;  %v1762_v48 = vld [vmem:[#allocation3 + $0x18] sm:$0xff]  ;;  %v1953_v22 = vld [vmem:[#allocation3 + $0x610] sm:$0xff] }
 0x404   :  { %v5492_v29 = vpack.c.bf16 %v1291_v34, %v1249_v8  ;;  %v1344_v2 = vpop.permute.xlu0 %1343  ;;  %v5490_v15 = vpack.c.bf16 %v1292_v18, %v1250_v3  ;;  %v1333_v43 = vmul.f32 %v1322_v59, %v1306_v45  ;;  %v1334_v13 = vmul.f32 %v1326_v39, %v1305_v49  ;;  %v1770_v50 = vld [vmem:[#allocation3 + $0x58] sm:$0xff] }
 0x405   :  { %v1347_v52 = vsel %vm244_vm3, %v1344_v2, %v7061_v6  ;;  %v1348_v24 = vsel %vm244_vm3, %v7039_v26, %v1344_v2  ;;  %v1452_v8 = vrot.slane %v7093_v36, %v6542_v21  ;;  %v7233_v18 = vpack.c.bf16 %v1815_v38, %v1807_v12  ;;  %v1840_v2 = vld [vmem:[#allocation3 + $0x288] sm:$0xff]  ;;  %v1786_v12 = vld [vmem:[#allocation3 + $0xd8] sm:$0xff] }
 0x406   :  { %v1375_v55 = vmul.f32 %v1364_v62, %v1348_v24  ;;  %v1376_v25 = vmul.f32 %v1368_v60, %v1347_v52  ;;  %5491 = vmatprep.subr.bf16.mxu1 %v5490_v15  ;;  %v1392_v37 = vpop.permute.xlu1 %1391  ;;  %5513 = vmatpush1.bf16.msra.mxu0 %v7187_v53  ;;  %v7242_v41 = vpack.c.bf16 %v1832_v40, %v1824_v5  ;;  %v1848_v15 = vld [vmem:[#allocation3 + $0x2c8] sm:$0xff]  ;;  %v1847_v52 = vld [vmem:[#allocation3 + $0x2c0] sm:$0xff] }
 0x407   :  { %v1393_v6 = vsel %vm292_vm4, %v6991_v35, %v1392_v37  ;;  %v1396_v26 = vsel %vm292_vm4, %v1392_v37, %v7019_v51  ;;  %5493 = vmatpush1.bf16.msra.mxu1 %v5492_v29  ;;  %5515 = vmatprep.subr.bf16.mxu0 %v7199_v23  ;;  %v1856_v37 = vld [vmem:[#allocation3 + $0x308] sm:$0xff] }
 0x408   :  { %v5496_v59 = vpack.c.bf16 %v1375_v55, %v1333_v43  ;;  %v1422_v39 = vmul.f32 %v1414_v32, %v1396_v26  ;;  %v1434_v62 = vpop.permute.xlu0 %1433  ;;  %v5494_v60 = vpack.c.bf16 %v1376_v25, %v1334_v13  ;;  %v1421_v35 = vmul.f32 %v1410_v16, %v1393_v6  ;;  %v1831_v16 = vld [vmem:[#allocation3 + $0x240] sm:$0xff]  ;;  %v1761_v13 = vld [vmem:[#allocation3 + $0x10] sm:$0xff]  ;;  %v1864_v6 = vld [vmem:[#allocation3 + $0x348] sm:$0xff] }
 0x409   :  { %v1438_v51 = vsel %vm336_vm5, %v1434_v62, %v7078_v27  ;;  %v1435_v36 = vsel %vm336_vm5, %v7033_v54, %v1434_v62  ;;  %v1839_v43 = vld [vmem:[#allocation3 + $0x280] sm:$0xff]  ;;  %v1769_v25 = vld [vmem:[#allocation3 + $0x50] sm:$0xff]  ;;  %v1778_v26 = vld [vmem:[#allocation3 + $0x98] sm:$0xff] }
 0x40a   :  { %5495 = vmatprep.subr.bf16.mxu1 %v5494_v60  ;;  %v1476_v3 = vpop.permute.xlu1 %1475  ;;  %v5498_v34 = vpack.c.bf16 %v1422_v39, %v6931_v31  ;;  %5517 = vmatpush1.bf16.msra.mxu0 %v7221_v1  ;;  %v1464_v31 = vmul.f32 %v1456_v17, %v1438_v51  ;;  %v5500_v29 = vpack.c.bf16 %v1421_v35, %v6915_v0  ;;  %v1863_v39 = vld [vmem:[#allocation3 + $0x340] sm:$0xff]  ;;  %v1872_v5 = vld [vmem:[#allocation3 + $0x388] sm:$0xff]  ;;  %v1777_v51 = vld [vmem:[#allocation3 + $0x90] sm:$0xff] }
 0x40b   :  { %v1477_v19 = vsel %vm380_vm6, %v7103_v47, %v1476_v3  ;;  %v1480_v27 = vsel %vm380_vm6, %v1476_v3, %v7126_v61  ;;  %5497 = vmatpush1.bf16.msra.mxu1 %v5496_v59  ;;  %5519 = vmatprep.subr.bf16.mxu0 %v7223_v63  ;;  %v1823_v47 = vld [vmem:[#allocation3 + $0x200] sm:$0xff]  ;;  %v1463_v42 = vmul.f32 %v1452_v8, %v1435_v36  ;;  %v1880_v40 = vld [vmem:[#allocation3 + $0x3c8] sm:$0xff]  ;;  %v1794_v8 = vld [vmem:[#allocation3 + $0x118] sm:$0xff] }
 0x40c   :  { %v1506_v49 = vmul.f32 %v1498_v46, %v1480_v27  ;;  %v1518_v45 = vpop.permute.xlu0 %1517  ;;  %5499 = vmatprep.subr.bf16.mxu1 %v5498_v34  ;;  %v1505_v61 = vmul.f32 %v1494_v7, %v1477_v19  ;;  %v7255_v17 = vpack.c.bf16 %v1831_v16, %v1823_v47  ;;  %v7258_v0 = vpack.c.bf16 %v1848_v15, %v1840_v2  ;;  %v1855_v59 = vld [vmem:[#allocation3 + $0x300] sm:$0xff]  ;;  %v1785_v7 = vld [vmem:[#allocation3 + $0xd0] sm:$0xff]  ;;  %v1802_v3 = vld [vmem:[#allocation3 + $0x158] sm:$0xff] }
 0x40d   :  { %v1522_v54 = vsel %vm424_vm7, %v1518_v45, %v7140_v30  ;;  %v1536_v46 = vrot.slane %v7124_v57, %v6542_v21  ;;  %v1519_v30 = vsel %vm424_vm7, %v7133_v14, %v1518_v45  ;;  %v7266_v38 = vpack.c.bf16 %v1847_v52, %v1839_v43  ;;  %v1871_v27 = vld [vmem:[#allocation3 + $0x380] sm:$0xff]  ;;  %v1896_v45 = vld [vmem:[#allocation3 + $0x448] sm:$0xff]  ;;  %v1793_v16 = vld [vmem:[#allocation3 + $0x110] sm:$0xff] }
 0x40e   :  { %v5502_v32 = vpack.c.bf16 %v1506_v49, %v1464_v31  ;;  %5521 = vmatpush1.bf16.msra.mxu0 %v7233_v18  ;;  %v5504_v24 = vpack.c.bf16 %v1505_v61, %v1463_v42  ;;  %v1548_v55 = vmul.f32 %v1540_v33, %v1522_v54  ;;  %v7268_v57 = vpack.c.bf16 %v1770_v50, %v1762_v48  ;;  %v1879_v36 = vld [vmem:[#allocation3 + $0x3c0] sm:$0xff]  ;;  %v1888_v49 = vld [vmem:[#allocation3 + $0x408] sm:$0xff]  ;;  %v1818_v61 = vld [vmem:[#allocation3 + $0x1d8] sm:$0xff] }
 0x40f   :  { %5501 = vmatpush1.bf16.msra.mxu1 %v5500_v29  ;;  %5523 = vmatprep.subr.bf16.mxu0 %v7242_v41  ;;  %v1547_v62 = vmul.f32 %v1536_v46, %v1519_v30  ;;  %v7271_v14 = vpack.c.bf16 %v1769_v25, %v1761_v13  ;;  %v7273_v60 = vpack.c.bf16 %v1864_v6, %v1856_v37  ;;  %v1810_v29 = vld [vmem:[#allocation3 + $0x198] sm:$0xff]  ;;  %v1895_v33 = vld [vmem:[#allocation3 + $0x440] sm:$0xff]  ;;  %v1904_v54 = vld [vmem:[#allocation3 + $0x488] sm:$0xff] }
 0x410   :  { %5503 = vmatprep.subr.bf16.mxu1 %v5502_v32  ;;  %v7275_v35 = vpack.c.bf16 %v1786_v12, %v1778_v26  ;;  %v7278_v34 = vpack.c.bf16 %v1863_v39, %v1855_v59  ;;  %v7283_v19 = vpack.c.bf16 %v1880_v40, %v1872_v5  ;;  %v7286_v31 = vpack.c.bf16 %v1785_v7, %v1777_v51  ;;  %v1887_v32 = vld [vmem:[#allocation3 + $0x400] sm:$0xff]  ;;  %v1912_v43 = vld [vmem:[#allocation3 + $0x4c8] sm:$0xff]  ;;  %v1817_v46 = vld [vmem:[#allocation3 + $0x1d0] sm:$0xff] }
 0x411   :  { %v7290_v47 = vpack.c.bf16 %v1802_v3, %v1794_v8  ;;  %v7293_v2 = vpack.c.bf16 %v1879_v36, %v1871_v27  ;;  %v7296_v15 = vpack.c.bf16 %v1896_v45, %v1888_v49  ;;  %v7302_v52 = vpack.c.bf16 %v1818_v61, %v1810_v29  ;;  %v1826_v48 = vld [vmem:[#allocation3 + $0x218] sm:$0xff]  ;;  %v1911_v25 = vld [vmem:[#allocation3 + $0x4c0] sm:$0xff]  ;;  %v1920_v6 = vld [vmem:[#allocation3 + $0x508] sm:$0xff] }
 0x412   :  { %5525 = vmatpush1.bf16.msra.mxu0 %v7255_v17  ;;  %v1834_v50 = vld [vmem:[#allocation3 + $0x258] sm:$0xff]  ;;  %v7305_v13 = vpack.c.bf16 %v1895_v33, %v1887_v32  ;;  %v7308_v30 = vpack.c.bf16 %v1912_v43, %v1904_v54  ;;  %v1928_v26 = vld [vmem:[#allocation3 + $0x548] sm:$0xff]  ;;  %v1825_v59 = vld [vmem:[#allocation3 + $0x210] sm:$0xff] }
 0x413   :  { %5505 = vmatpush1.bf16.msra.mxu1 %v5504_v24  ;;  %5527 = vmatprep.subr.bf16.mxu0 %v7258_v0  ;;  %v1809_v24 = vld [vmem:[#allocation3 + $0x190] sm:$0xff]  ;;  %v7314_v12 = vpack.c.bf16 %v1834_v50, %v1826_v48  ;;  %v1850_v5 = vld [vmem:[#allocation3 + $0x2d8] sm:$0xff]  ;;  %v7320_v51 = vpack.c.bf16 %v1928_v26, %v1920_v6  ;;  %v1919_v7 = vld [vmem:[#allocation3 + $0x500] sm:$0xff] }
 0x414   :  { %1680 = vmatprep.subr.mxu1 %v1548_v55  ;;  %v1903_v55 = vld [vmem:[#allocation3 + $0x480] sm:$0xff]  ;;  %v7311_v37 = vpack.c.bf16 %v1817_v46, %v1809_v24  ;;  %v1833_v39 = vld [vmem:[#allocation3 + $0x250] sm:$0xff]  ;;  %v1936_v27 = vld [vmem:[#allocation3 + $0x588] sm:$0xff] }
 0x415   :  { %v7317_v40 = vpack.c.bf16 %v1911_v25, %v1903_v55  ;;  %9378 = vst [vmem:[#allocation20_spill] sm:$0xff] %v7320_v51  ;;  %v1927_v8 = vld [vmem:[#allocation3 + $0x540] sm:$0xff]  ;;  %v7323_v3 = vpack.c.bf16 %v1833_v39, %v1825_v59  ;;  %v1944_v36 = vld [vmem:[#allocation3 + $0x5c8] sm:$0xff]  ;;  %v1841_v45 = vld [vmem:[#allocation3 + $0x290] sm:$0xff] }
 0x416   :  { %5529 = vmatpush1.bf16.msra.mxu0 %v7266_v38  ;;  %v1866_v29 = vld [vmem:[#allocation3 + $0x358] sm:$0xff]  ;;  %v7329_v61 = vpack.c.bf16 %v1927_v8, %v1919_v7  ;;  %v7332_v32 = vpack.c.bf16 %v1944_v36, %v1936_v27  ;;  %v1935_v33 = vld [vmem:[#allocation3 + $0x580] sm:$0xff]  ;;  %v1952_v24 = vld [vmem:[#allocation3 + $0x608] sm:$0xff] }
 0x417   :  { %1681 = vmatpush1.msra.mxu1 %v1547_v62  ;;  %5531 = vmatprep.subr.bf16.mxu0 %v7273_v60  ;;  %v1842_v62 = vld [vmem:[#allocation3 + $0x298] sm:$0xff]  ;;  %9377 = vst [vmem:[#allocation19_spill] sm:$0xff] %v7317_v40  ;;  %v1943_v54 = vld [vmem:[#allocation3 + $0x5c0] sm:$0xff]  ;;  %v1960_v46 = vld [vmem:[#allocation3 + $0x648] sm:$0xff] }
 0x418   :  { %5393 = vmatmul.mubr.msk.f32.vlgmr.msra.gmra.mrb[4].mxu1 %vm497_vm8, %v7158_v56  ;;  %5571 = vmatprep.subr.bf16.mxu1 %v7268_v57  ;;  %v1801_v56 = vld [vmem:[#allocation3 + $0x150] sm:$0xff]  ;;  %v7326_v49 = vpack.c.bf16 %v1850_v5, %v1842_v62  ;;  %9379 = vst [vmem:[#allocation21_spill] sm:$0xff] %v7329_v61  ;;  %9380 = vst [vmem:[#allocation22_spill] sm:$0xff] %v7332_v32  ;;  %v1874_v25 = vld [vmem:[#allocation3 + $0x398] sm:$0xff]  ;;  %v7341_v26 = vpack.c.bf16 %v1943_v54, %v1935_v33 }
 0x419   :  { %5573 = vmatpush1.bf16.msra.mxu1 %v7271_v14  ;;  %v7299_v42 = vpack.c.bf16 %v1801_v56, %v1793_v16  ;;  %v1849_v16 = vld [vmem:[#allocation3 + $0x2d0] sm:$0xff]  ;;  %v1858_v56 = vld [vmem:[#allocation3 + $0x318] sm:$0xff]  ;;  %v7344_v59 = vpack.c.bf16 %v1960_v46, %v1952_v24  ;;  %v1951_v39 = vld [vmem:[#allocation3 + $0x600] sm:$0xff] }
 0x41a   :  { %5575 = vmatprep.subr.bf16.mxu1 %v7275_v35  ;;  %5533 = vmatpush1.bf16.msra.mxu0 %v7278_v34  ;;  %v7335_v43 = vpack.c.bf16 %v1849_v16, %v1841_v45  ;;  %v7338_v48 = vpack.c.bf16 %v1866_v29, %v1858_v56  ;;  %v1857_v50 = vld [vmem:[#allocation3 + $0x310] sm:$0xff]  ;;  %v1882_v6 = vld [vmem:[#allocation3 + $0x3d8] sm:$0xff]  ;;  %9381 = vst [vmem:[#allocation23_spill] sm:$0xff] %v7341_v26  ;;  %v1959_v62 = vld [vmem:[#allocation3 + $0x640] sm:$0xff] }
 0x41b   :  { %5535 = vmatprep.subr.bf16.mxu0 %v7283_v19  ;;  %v1865_v55 = vld [vmem:[#allocation3 + $0x350] sm:$0xff]  ;;  %9382 = vst [vmem:[#allocation24_spill] sm:$0xff] %v7344_v59  ;;  %v1968_v7 = vld [vmem:[#allocation3 + $0x688] sm:$0xff]  ;;  %v7350_v27 = vpack.c.bf16 %v1882_v6, %v1874_v25  ;;  %v1890_v16 = vld [vmem:[#allocation3 + $0x418] sm:$0xff]  ;;  %v7353_v29 = vpack.c.bf16 %v1959_v62, %v1951_v39 }
 0x41c   :  { %v7347_v5 = vpack.c.bf16 %v1865_v55, %v1857_v50  ;;  %v1976_v8 = vld [vmem:[#allocation3 + $0x6c8] sm:$0xff]  ;;  %v1873_v36 = vld [vmem:[#allocation3 + $0x390] sm:$0xff]  ;;  %v1898_v56 = vld [vmem:[#allocation3 + $0x458] sm:$0xff] }
 0x41d   :  { %5577 = vmatpush1.bf16.msra.mxu1 %v7286_v31  ;;  %v1881_v45 = vld [vmem:[#allocation3 + $0x3d0] sm:$0xff]  ;;  %9383 = vst [vmem:[#allocation25_spill] sm:$0xff] %v7353_v29  ;;  %v7356_v33 = vpack.c.bf16 %v1976_v8, %v1968_v7  ;;  %v1967_v54 = vld [vmem:[#allocation3 + $0x680] sm:$0xff]  ;;  %v7362_v50 = vpack.c.bf16 %v1898_v56, %v1890_v16  ;;  %v1906_v6 = vld [vmem:[#allocation3 + $0x498] sm:$0xff] }
 0x41e   :  { %5579 = vmatprep.subr.bf16.mxu1 %v7290_v47  ;;  %5537 = vmatpush1.bf16.msra.mxu0 %v7293_v2  ;;  %v1975_v24 = vld [vmem:[#allocation3 + $0x6c0] sm:$0xff]  ;;  %v7359_v46 = vpack.c.bf16 %v1881_v45, %v1873_v36  ;;  %v1889_v55 = vld [vmem:[#allocation3 + $0x410] sm:$0xff]  ;;  %v7372_v7 = vpack.c.bf16 %v1914_v4, %v1906_v6  ;;  %v1922_v45 = vld [vmem:[#allocation3 + $0x518] sm:$0xff] }
 0x41f   :  { %5539 = vmatprep.subr.bf16.mxu0 %v7296_v15  ;;  %9384 = vst [vmem:[#allocation26_spill] sm:$0xff] %v7356_v33  ;;  %v1897_v25 = vld [vmem:[#allocation3 + $0x450] sm:$0xff]  ;;  %v7365_v39 = vpack.c.bf16 %v1975_v24, %v1967_v54  ;;  %v1930_v16 = vld [vmem:[#allocation3 + $0x558] sm:$0xff] }
 0x420   :  { %v7369_v62 = vpack.c.bf16 %v1897_v25, %v1889_v55  ;;  %v1905_v8 = vld [vmem:[#allocation3 + $0x490] sm:$0xff]  ;;  %v7379_v54 = vpack.c.bf16 %v1930_v16, %v1922_v45  ;;  %v1938_v25 = vld [vmem:[#allocation3 + $0x598] sm:$0xff] }
 0x421   :  { %5581 = vmatpush1.bf16.msra.mxu1 %v7299_v42  ;;  %9385 = vst [vmem:[#allocation27_spill] sm:$0xff] %v7365_v39  ;;  %v1913_v36 = vld [vmem:[#allocation3 + $0x4d0] sm:$0xff]  ;;  %v7385_v6 = vpack.c.bf16 %v1946_v20, %v1938_v25  ;;  %v7394_v20 = vpack.c.bf16 %v1961_v11, %v1953_v22  ;;  %v1994_v11 = vld [vmem:[#allocation3 + $0x758] sm:$0xff]  ;;  %v1983_v22 = vld [vmem:[#allocation3 + $0x700] sm:$0xff] }
 0x422   :  { %5583 = vmatprep.subr.bf16.mxu1 %v7302_v52  ;;  %5541 = vmatpush1.bf16.msra.mxu0 %v7305_v13  ;;  %v7376_v56 = vpack.c.bf16 %v1913_v36, %v1905_v8  ;;  %9387 = vst [vmem:[#allocation29_spill] sm:$0xff] %v7379_v54  ;;  %v1921_v24 = vld [vmem:[#allocation3 + $0x510] sm:$0xff]  ;;  %v1954_v8 = vld [vmem:[#allocation3 + $0x618] sm:$0xff] }
 0x423   :  { %5543 = vmatprep.subr.bf16.mxu0 %v7308_v30  ;;  %v1929_v55 = vld [vmem:[#allocation3 + $0x550] sm:$0xff]  ;;  %9389 = vst [vmem:[#allocation31_spill] sm:$0xff] %v7385_v6  ;;  %v1962_v36 = vld [vmem:[#allocation3 + $0x658] sm:$0xff]  ;;  %9392 = vst [vmem:[#allocation34_spill] sm:$0xff] %v7394_v20 }
 0x424   :  { %9386 = vst [vmem:[#allocation28_spill] sm:$0xff] %v7376_v56  ;;  %v7382_v4 = vpack.c.bf16 %v1929_v55, %v1921_v24  ;;  %v1945_v21 = vld [vmem:[#allocation3 + $0x5d0] sm:$0xff]  ;;  %v7391_v16 = vpack.c.bf16 %v1962_v36, %v1954_v8  ;;  %v1970_v24 = vld [vmem:[#allocation3 + $0x698] sm:$0xff]  ;;  %v1992_v8 = vld [vmem:[#allocation3 + $0x748] sm:$0xff] }
 0x425   :  { %5585 = vmatpush1.bf16.msra.mxu1 %v7311_v37  ;;  %v7388_v45 = vpack.c.bf16 %v1945_v21, %v1937_v9  ;;  %v1978_v55 = vld [vmem:[#allocation3 + $0x6d8] sm:$0xff]  ;;  %v1984_v21 = vld [vmem:[#allocation3 + $0x708] sm:$0xff] }
 0x426   :  { %5587 = vmatprep.subr.bf16.mxu1 %v7314_v12  ;;  %5545 = vmatpush1.bf16.msra.mxu0 %v7317_v40  ;;  %9388 = vst [vmem:[#allocation30_spill] sm:$0xff] %v7382_v4  ;;  %9391 = vst [vmem:[#allocation33_spill] sm:$0xff] %v7391_v16  ;;  %v7397_v25 = vpack.c.bf16 %v1978_v55, %v1970_v24  ;;  %v1986_v36 = vld [vmem:[#allocation3 + $0x718] sm:$0xff] }
 0x427   :  { %5547 = vmatprep.subr.bf16.mxu0 %v7320_v51  ;;  %9390 = vst [vmem:[#allocation32_spill] sm:$0xff] %v7388_v45  ;;  %v7406_v24 = vpack.c.bf16 %v1994_v11, %v1986_v36  ;;  %v2010_v36 = vld [vmem:[#allocation3 + $0x7d8] sm:$0xff]  ;;  %v2007_v11 = vld [vmem:[#allocation3 + $0x7c0] sm:$0xff]  ;;  %v1804_v51 = vld [vmem:[#allocation3 + $0x168] sm:$0xff] }
 0x428   :  { %9393 = vst [vmem:[#allocation35_spill] sm:$0xff] %v7397_v25  ;;  %v1878_v40 = vld [vmem:[#allocation3 + $0x3b8] sm:$0xff] }
 0x429   :  { %5589 = vmatpush1.bf16.msra.mxu1 %v7323_v3  ;;  %9396 = vst [vmem:[#allocation38_spill] sm:$0xff] %v7406_v24 }
 0x42a   :  { %5591 = vmatprep.subr.bf16.mxu1 %v7326_v49  ;;  %5549 = vmatpush1.bf16.msra.mxu0 %v7329_v61  ;;  %v1796_v61 = vld [vmem:[#allocation3 + $0x128] sm:$0xff] }
 0x42b   :  { %5551 = vmatprep.subr.bf16.mxu0 %v7332_v32  ;;  %v1787_v32 = vld [vmem:[#allocation3 + $0xe0] sm:$0xff] }
 0x42d   :  { %5593 = vmatpush1.bf16.msra.mxu1 %v7335_v43 }
 0x42e   :  { %5595 = vmatprep.subr.bf16.mxu1 %v7338_v48  ;;  %5553 = vmatpush1.bf16.msra.mxu0 %v7341_v26 }
 0x42f   :  { %5555 = vmatprep.subr.bf16.mxu0 %v7344_v59  ;;  %v1790_v59 = vld [vmem:[#allocation3 + $0xf8] sm:$0xff] }
 0x431   :  { %5597 = vmatpush1.bf16.msra.mxu1 %v7347_v5 }
 0x432   :  { %5599 = vmatprep.subr.bf16.mxu1 %v7350_v27  ;;  %5557 = vmatpush1.bf16.msra.mxu0 %v7353_v29  ;;  %v1991_v29 = vld [vmem:[#allocation3 + $0x740] sm:$0xff] }
 0x433   :  { %5559 = vmatprep.subr.bf16.mxu0 %v7356_v33  ;;  %v7404_v33 = vpack.c.bf16 %v1992_v8, %v1984_v21  ;;  %v7408_v55 = vpack.c.bf16 %v1991_v29, %v1983_v22  ;;  %v2008_v21 = vld [vmem:[#allocation3 + $0x7c8] sm:$0xff]  ;;  %v2002_v8 = vld [vmem:[#allocation3 + $0x798] sm:$0xff]  ;;  %v1999_v29 = vld [vmem:[#allocation3 + $0x780] sm:$0xff] }
 0x434   :  { %v7418_v22 = vpack.c.bf16 %v2010_v36, %v2002_v8  ;;  %v1774_v8 = vld [vmem:[#allocation3 + $0x78] sm:$0xff] }
 0x435   :  { %5601 = vmatpush1.bf16.msra.mxu1 %v7359_v46  ;;  %9395 = vst [vmem:[#allocation37_spill] sm:$0xff] %v7404_v33  ;;  %9397 = vst [vmem:[#allocation39_spill] sm:$0xff] %v7408_v55 }
 0x436   :  { %5603 = vmatprep.subr.bf16.mxu1 %v7362_v50  ;;  %5561 = vmatpush1.bf16.msra.mxu0 %v7365_v39  ;;  %v1977_v39 = vld [vmem:[#allocation3 + $0x6d0] sm:$0xff]  ;;  %9400 = vst [vmem:[#allocation42_spill] sm:$0xff] %v7418_v22 }
 0x437   :  { %v7400_v9 = vpack.c.bf16 %v1977_v39, %v1969_v10  ;;  %5563 = vmatprep.subr.bf16.mxu0 %v7404_v33  ;;  %v2000_v39 = vld [vmem:[#allocation3 + $0x788] sm:$0xff]  ;;  %v1782_v33 = vld [vmem:[#allocation3 + $0xb8] sm:$0xff] }
 0x439   :  { %5605 = vmatpush1.bf16.msra.mxu1 %v7369_v62  ;;  %9394 = vst [vmem:[#allocation36_spill] sm:$0xff] %v7400_v9 }
 0x43a   :  { %5607 = vmatprep.subr.bf16.mxu1 %v7372_v7  ;;  %5565 = vmatpush1.bf16.msra.mxu0 %v7408_v55 }
 0x43d   :  { %5609 = vmatpush1.bf16.msra.mxu1 %v7376_v56  ;;  %v1798_v56 = vld [vmem:[#allocation3 + $0x138] sm:$0xff] }
 0x43e   :  { %5611 = vmatprep.subr.bf16.mxu1 %v7379_v54 }
 0x441   :  { %5613 = vmatpush1.bf16.msra.mxu1 %v7382_v4  ;;  %v1781_v4 = vld [vmem:[#allocation3 + $0xb0] sm:$0xff] }
 0x442   :  { %5615 = vmatprep.subr.bf16.mxu1 %v7385_v6  ;;  %v1779_v6 = vld [vmem:[#allocation3 + $0xa0] sm:$0xff] }
 0x445   :  { %5617 = vmatpush1.bf16.msra.mxu1 %v7388_v45 }
 0x446   :  { %5619 = vmatprep.subr.bf16.mxu1 %v7391_v16  ;;  %v1985_v16 = vld [vmem:[#allocation3 + $0x710] sm:$0xff] }
 0x449   :  { %5621 = vmatpush1.bf16.msra.mxu1 %v7394_v20  ;;  %v1993_v20 = vld [vmem:[#allocation3 + $0x750] sm:$0xff] }
 0x44a   :  { %5623 = vmatprep.subr.bf16.mxu1 %v7397_v25  ;;  %v7411_v10 = vpack.c.bf16 %v1993_v20, %v1985_v16  ;;  %v7420_v25 = vpack.c.bf16 %v2007_v11, %v1999_v29  ;;  %v2001_v16 = vld [vmem:[#allocation3 + $0x790] sm:$0xff]  ;;  %v7434_v29 = vpop.permute.xlu1 %1738 }
 0x44b   :  { %v2009_v20 = vld [vmem:[#allocation3 + $0x7d0] sm:$0xff] }
 0x44c   :  { %9398 = vst [vmem:[#allocation40_spill] sm:$0xff] %v7411_v10  ;;  %9401 = vst [vmem:[#allocation43_spill] sm:$0xff] %v7420_v25 }
 0x44d   :  { %5625 = vmatpush1.bf16.msra.mxu1 %v7400_v9  ;;  %v7416_v9 = vpack.c.bf16 %v2008_v21, %v2000_v39  ;;  %v1772_v39 = vld [vmem:[#allocation3 + $0x68] sm:$0xff]  ;;  %v1766_v21 = vld [vmem:[#allocation3 + $0x38] sm:$0xff] }
 0x44e   :  { %5627 = vmatprep.subr.bf16.mxu1 %v7406_v24  ;;  %v7423_v24 = vpack.c.bf16 %v2009_v20, %v2001_v16  ;;  %v7430_v36 = vpack.c.bf16 %v1774_v8, %v1766_v21  ;;  %v1765_v21 = vld [vmem:[#allocation3 + $0x30] sm:$0xff] }
 0x44f   :  { %9399 = vst [vmem:[#allocation41_spill] sm:$0xff] %v7416_v9  ;;  %5567 = vmatprep.subr.bf16.mxu0 %v7416_v9  ;;  %v1773_v8 = vld [vmem:[#allocation3 + $0x70] sm:$0xff]  ;;  %v1780_v9 = vld [vmem:[#allocation3 + $0xa8] sm:$0xff] }
 0x450   :  { %9402 = vst [vmem:[#allocation44_spill] sm:$0xff] %v7423_v24  ;;  %5569 = vmatpush1.bf16.msra.mxu0 %v7420_v25  ;;  %9404 = vst [vmem:[#allocation46_spill] sm:$0xff] %v7430_v36  ;;  %v7437_v25 = vpop.permute.xlu0 %1748 }
 0x451   :  { %5629 = vmatpush1.bf16.msra.mxu1 %v7411_v10  ;;  %v1764_v10 = vld [vmem:[#allocation3 + $0x28] sm:$0xff] }
 0x452   :  { %5631 = vmatprep.subr.bf16.mxu1 %v7418_v22  ;;  %v7428_v55 = vpack.c.bf16 %v1772_v39, %v1764_v10  ;;  %v1771_v39 = vld [vmem:[#allocation3 + $0x60] sm:$0xff] }
 0x454   :  { %9403 = vst [vmem:[#allocation45_spill] sm:$0xff] %v7428_v55  ;;  %5635 = vmatprep.subr.bf16.mxu0 %v7428_v55 }
 0x455   :  { %5633 = vmatpush1.bf16.msra.mxu1 %v7423_v24  ;;  %v1763_v24 = vld [vmem:[#allocation3 + $0x20] sm:$0xff] }
 0x456   :  { %5699 = vmatprep.subr.bf16.mxu1 %v7430_v36  ;;  %v1788_v36 = vld [vmem:[#allocation3 + $0xe8] sm:$0xff]  ;;  %v7442_v26 = vpack.c.bf16 %v1771_v39, %v1763_v24  ;;  %v7456_v24 = vpack.c.bf16 %v1787_v32, %v1779_v6  ;;  %v1795_v39 = vld [vmem:[#allocation3 + $0x120] sm:$0xff]  ;;  %v1814_v32 = vld [vmem:[#allocation3 + $0x1b8] sm:$0xff] }
 0x457   :  { %v7448_v54 = vpack.c.bf16 %v1788_v36, %v1780_v9  ;;  %v1803_v9 = vld [vmem:[#allocation3 + $0x160] sm:$0xff]  ;;  %v1797_v36 = vld [vmem:[#allocation3 + $0x130] sm:$0xff]  ;;  %v1822_v6 = vld [vmem:[#allocation3 + $0x1f8] sm:$0xff] }
 0x458   :  { %9405 = vst [vmem:[#allocation47_spill] sm:$0xff] %v7442_v26  ;;  %9409 = vst [vmem:[#allocation51_spill] sm:$0xff] %v7456_v24 }
 0x459   :  { %9407 = vst [vmem:[#allocation49_spill] sm:$0xff] %v7448_v54 }
 0x4d4   :  { %v1659_v11 = vpop.f32.mrb[4].mxu0 }
 0x4d5   :  { %v1741_v16 = vmul.f32 %v7434_v29, %v1659_v11  ;;  %v1661_v20 = vpop.f32.mrb[5].mxu0  ;;  %v7444_v11 = vpack.c.bf16 %v1773_v8, %v1765_v21  ;;  %v1805_v21 = vld [vmem:[#allocation3 + $0x170] sm:$0xff]  ;;  %v1812_v8 = vld [vmem:[#allocation3 + $0x1a8] sm:$0xff] }
 0x4d6   :  { %v1742_v22 = vmul.f32 %v7434_v29, %v1661_v20 }
 0x4d7   :  { %v1751_v10 = vadd.f32 %v7437_v25, %v1741_v16  ;;  %9406 = vst [vmem:[#allocation48_spill] sm:$0xff] %v7444_v11  ;;  %v1789_v16 = vld [vmem:[#allocation3 + $0xf0] sm:$0xff] }
 0x4d8   :  { %v1752_v55 = vadd.f32 %v7437_v25, %v1742_v22  ;;  %v7450_v22 = vpack.c.bf16 %v1790_v59, %v1782_v33  ;;  %v7460_v59 = vpack.c.bf16 %v1804_v51, %v1796_v61  ;;  %v7470_v51 = vpack.c.bf16 %v1805_v21, %v1797_v36  ;;  %v1811_v61 = vld [vmem:[#allocation3 + $0x1a0] sm:$0xff] }
 0x4d9   :  { %v7446_v20 = vmax.f32 %v1751_v10, 0.0  ;;  %v7458_v10 = vpack.c.bf16 %v1789_v16, %v1781_v4  ;;  %v7468_v4 = vpack.c.bf16 %v1803_v9, %v1795_v39  ;;  %v7476_v16 = vpack.c.bf16 %v1822_v6, %v1814_v32  ;;  %v1827_v36 = vld [vmem:[#allocation3 + $0x220] sm:$0xff]  ;;  %v1829_v32 = vld [vmem:[#allocation3 + $0x230] sm:$0xff] }
 0x4da   :  { %v1756_v45 = vmax.f32 %v1752_v55, 0.0  ;;  %9408 = vst [vmem:[#allocation50_spill] sm:$0xff] %v7450_v22  ;;  %v1806_v55 = vld [vmem:[#allocation3 + $0x178] sm:$0xff]  ;;  %9411 = vst [vmem:[#allocation53_spill] sm:$0xff] %v7460_v59  ;;  %v1835_v21 = vld [vmem:[#allocation3 + $0x260] sm:$0xff] }
 0x4db   :  { %9410 = vst [vmem:[#allocation52_spill] sm:$0xff] %v7458_v10  ;;  %v7462_v33 = vpack.c.bf16 %v1806_v55, %v1798_v56  ;;  %9413 = vst [vmem:[#allocation55_spill] sm:$0xff] %v7468_v4  ;;  %v1819_v56 = vld [vmem:[#allocation3 + $0x1e0] sm:$0xff]  ;;  %v1813_v55 = vld [vmem:[#allocation3 + $0x1b0] sm:$0xff] }
 0x4dc   :  { %2079 = vmatprep.mubr.f32.mxu0 %v1756_v45  ;;  %2150 = vmatprep.mubr.f32.mxu1 %v1756_v45  ;;  %9414 = vst [vmem:[#allocation56_spill] sm:$0xff] %v7470_v51  ;;  %9416 = vst [vmem:[#allocation58_spill] sm:$0xff] %v7476_v16  ;;  %v7480_v39 = vpack.c.bf16 %v1819_v56, %v1811_v61  ;;  %v1837_v6 = vld [vmem:[#allocation3 + $0x270] sm:$0xff]  ;;  %v1843_v56 = vld [vmem:[#allocation3 + $0x2a0] sm:$0xff] }
 0x4dd   :  { %2080 = vmatmul.mubr.f32.vlgmr.msra.gmra.mrb[6].mxu0 %v7446_v20  ;;  %2151 = vmatmul.mubr.f32.vlgmr.msra.gmra.mrb[6].mxu1 %v7446_v20  ;;  %9412 = vst [vmem:[#allocation54_spill] sm:$0xff] %v7462_v33  ;;  %v7494_v61 = vpack.c.bf16 %v1837_v6, %v1829_v32  ;;  %v1870_v32 = vld [vmem:[#allocation3 + $0x378] sm:$0xff] }
 0x4de   :  { %5637 = vmatpush1.bf16.msra.mxu0 %v7442_v26  ;;  %5701 = vmatpush1.bf16.msra.mxu1 %v7444_v11  ;;  %v1820_v11 = vld [vmem:[#allocation3 + $0x1e8] sm:$0xff]  ;;  %v1830_v26 = vld [vmem:[#allocation3 + $0x238] sm:$0xff]  ;;  %9417 = vst [vmem:[#allocation59_spill] sm:$0xff] %v7480_v39 }
 0x4df   :  { %2221 = vmatprep.mubr.f32.mxu0 %v1756_v45  ;;  %2292 = vmatprep.mubr.f32.mxu1 %v1756_v45  ;;  %v7474_v45 = vpack.c.bf16 %v1820_v11, %v1812_v8  ;;  %9422 = vst [vmem:[#allocation64_spill] sm:$0xff] %v7494_v61 }
 0x4e0   :  { %5639 = vmatprep.subr.bf16.mxu0 %v7448_v54  ;;  %5703 = vmatprep.subr.bf16.mxu1 %v7450_v22  ;;  %v1821_v22 = vld [vmem:[#allocation3 + $0x1f0] sm:$0xff]  ;;  %v1828_v54 = vld [vmem:[#allocation3 + $0x228] sm:$0xff] }
 0x4e1   :  { %9415 = vst [vmem:[#allocation57_spill] sm:$0xff] %v7474_v45  ;;  %v7482_v9 = vpack.c.bf16 %v1821_v22, %v1813_v55  ;;  %v7492_v22 = vpack.c.bf16 %v1835_v21, %v1827_v36  ;;  %v1851_v55 = vld [vmem:[#allocation3 + $0x2e0] sm:$0xff]  ;;  %v1868_v36 = vld [vmem:[#allocation3 + $0x368] sm:$0xff]  ;;  %v1862_v21 = vld [vmem:[#allocation3 + $0x338] sm:$0xff] }
 0x4e2   :  { %5641 = vmatpush1.bf16.msra.mxu0 %v7456_v24  ;;  %5705 = vmatpush1.bf16.msra.mxu1 %v7458_v10  ;;  %v1836_v24 = vld [vmem:[#allocation3 + $0x268] sm:$0xff]  ;;  %v1838_v10 = vld [vmem:[#allocation3 + $0x278] sm:$0xff]  ;;  %v7508_v6 = vpack.c.bf16 %v1851_v55, %v1843_v56  ;;  %v1875_v55 = vld [vmem:[#allocation3 + $0x3a0] sm:$0xff] }
 0x4e3   :  { %5643 = vmatprep.subr.bf16.mxu0 %v7460_v59  ;;  %5707 = vmatprep.subr.bf16.mxu1 %v7462_v33  ;;  %9418 = vst [vmem:[#allocation60_spill] sm:$0xff] %v7482_v9  ;;  %v7486_v11 = vpack.c.bf16 %v1836_v24, %v1828_v54  ;;  %v7488_v8 = vpack.c.bf16 %v1838_v10, %v1830_v26  ;;  %v1844_v33 = vld [vmem:[#allocation3 + $0x2a8] sm:$0xff]  ;;  %v1846_v59 = vld [vmem:[#allocation3 + $0x2b8] sm:$0xff]  ;;  %9421 = vst [vmem:[#allocation63_spill] sm:$0xff] %v7492_v22 }
 0x4e4   :  { %v1845_v10 = vld [vmem:[#allocation3 + $0x2b0] sm:$0xff]  ;;  %9426 = vst [vmem:[#allocation68_spill] sm:$0xff] %v7508_v6 }
 0x4e5   :  { %9419 = vst [vmem:[#allocation61_spill] sm:$0xff] %v7486_v11  ;;  %9420 = vst [vmem:[#allocation62_spill] sm:$0xff] %v7488_v8 }
 0x4e6   :  { %5645 = vmatpush1.bf16.msra.mxu0 %v7468_v4  ;;  %5709 = vmatpush1.bf16.msra.mxu1 %v7470_v51  ;;  %v1852_v4 = vld [vmem:[#allocation3 + $0x2e8] sm:$0xff]  ;;  %v1854_v51 = vld [vmem:[#allocation3 + $0x2f8] sm:$0xff] }
 0x4e7   :  { %5647 = vmatprep.subr.bf16.mxu0 %v7474_v45  ;;  %5711 = vmatprep.subr.bf16.mxu1 %v7476_v16  ;;  %v7500_v26 = vpack.c.bf16 %v1852_v4, %v1844_v33  ;;  %v7502_v24 = vpack.c.bf16 %v1854_v51, %v1846_v59  ;;  %v1860_v16 = vld [vmem:[#allocation3 + $0x328] sm:$0xff]  ;;  %v1859_v33 = vld [vmem:[#allocation3 + $0x320] sm:$0xff]  ;;  %v7516_v51 = vpack.c.bf16 %v1870_v32, %v1862_v21  ;;  %v1869_v45 = vld [vmem:[#allocation3 + $0x370] sm:$0xff] }
 0x4e8   :  { %v1867_v4 = vld [vmem:[#allocation3 + $0x360] sm:$0xff]  ;;  %v7514_v59 = vpack.c.bf16 %v1868_v36, %v1860_v16  ;;  %v1877_v21 = vld [vmem:[#allocation3 + $0x3b0] sm:$0xff] }
 0x4e9   :  { %9424 = vst [vmem:[#allocation66_spill] sm:$0xff] %v7500_v26  ;;  %9425 = vst [vmem:[#allocation67_spill] sm:$0xff] %v7502_v24  ;;  %v1885_v32 = vld [vmem:[#allocation3 + $0x3f0] sm:$0xff] }
 0x4ea   :  { %5649 = vmatpush1.bf16.msra.mxu0 %v7480_v39  ;;  %5713 = vmatpush1.bf16.msra.mxu1 %v7482_v9  ;;  %v1853_v39 = vld [vmem:[#allocation3 + $0x2f0] sm:$0xff]  ;;  %9428 = vst [vmem:[#allocation70_spill] sm:$0xff] %v7514_v59  ;;  %9429 = vst [vmem:[#allocation71_spill] sm:$0xff] %v7516_v51 }
 0x4eb   :  { %v7496_v54 = vpop.f32.mrb[4].mxu1  ;;  %5651 = vmatprep.subr.bf16.mxu0 %v7486_v11  ;;  %5715 = vmatprep.subr.bf16.mxu1 %v7488_v8  ;;  %v7510_v11 = vpack.c.bf16 %v1853_v39, %v1845_v10  ;;  %v1861_v8 = vld [vmem:[#allocation3 + $0x330] sm:$0xff]  ;;  %v7520_v39 = vpack.c.bf16 %v1867_v4, %v1859_v33  ;;  %v1883_v10 = vld [vmem:[#allocation3 + $0x3e0] sm:$0xff] }
 0x4ec   :  { %9423 = vst [vmem:[#allocation65_spill] sm:$0xff] %v7496_v54  ;;  %v7504_v9 = vpop.f32.mrb[5].mxu1  ;;  %v1876_v54 = vld [vmem:[#allocation3 + $0x3a8] sm:$0xff]  ;;  %v7522_v56 = vpack.c.bf16 %v1869_v45, %v1861_v8  ;;  %v7532_v45 = vpack.c.bf16 %v1883_v10, %v1875_v55  ;;  %v7534_v8 = vpack.c.bf16 %v1885_v32, %v1877_v21  ;;  %v1891_v33 = vld [vmem:[#allocation3 + $0x420] sm:$0xff] }
 0x4ed   :  { %9427 = vst [vmem:[#allocation69_spill] sm:$0xff] %v7510_v11  ;;  %9430 = vst [vmem:[#allocation72_spill] sm:$0xff] %v7520_v39  ;;  %v1899_v4 = vld [vmem:[#allocation3 + $0x460] sm:$0xff] }
 0x4ee   :  { %5653 = vmatpush1.bf16.msra.mxu0 %v7492_v22  ;;  %5717 = vmatpush1.bf16.msra.mxu1 %v7494_v61  ;;  %v1884_v22 = vld [vmem:[#allocation3 + $0x3e8] sm:$0xff]  ;;  %v1886_v61 = vld [vmem:[#allocation3 + $0x3f8] sm:$0xff]  ;;  %9431 = vst [vmem:[#allocation73_spill] sm:$0xff] %v7522_v56  ;;  %9434 = vst [vmem:[#allocation76_spill] sm:$0xff] %v7532_v45  ;;  %v7544_v55 = vpack.c.bf16 %v1899_v4, %v1891_v33 }
 0x4ef   :  { %5655 = vmatprep.subr.bf16.mxu0 %v7500_v26  ;;  %5719 = vmatprep.subr.bf16.mxu1 %v7502_v24  ;;  %v7526_v16 = vpack.c.bf16 %v1884_v22, %v1876_v54  ;;  %v7528_v36 = vpack.c.bf16 %v1886_v61, %v1878_v40  ;;  %v1892_v24 = vld [vmem:[#allocation3 + $0x428] sm:$0xff]  ;;  %v1894_v26 = vld [vmem:[#allocation3 + $0x438] sm:$0xff]  ;;  %9435 = vst [vmem:[#allocation77_spill] sm:$0xff] %v7534_v8  ;;  %v1893_v61 = vld [vmem:[#allocation3 + $0x430] sm:$0xff] }
 0x4f0   :  { %v1901_v54 = vld [vmem:[#allocation3 + $0x470] sm:$0xff]  ;;  %9438 = vst [vmem:[#allocation80_spill] sm:$0xff] %v7544_v55  ;;  %v1907_v21 = vld [vmem:[#allocation3 + $0x4a0] sm:$0xff] }
 0x4f1   :  { %9432 = vst [vmem:[#allocation74_spill] sm:$0xff] %v7526_v16  ;;  %9433 = vst [vmem:[#allocation75_spill] sm:$0xff] %v7528_v36  ;;  %v7546_v10 = vpack.c.bf16 %v1901_v54, %v1893_v61  ;;  %v1915_v32 = vld [vmem:[#allocation3 + $0x4e0] sm:$0xff] }
 0x4f2   :  { %5657 = vmatpush1.bf16.msra.mxu0 %v7508_v6  ;;  %5721 = vmatpush1.bf16.msra.mxu1 %v7510_v11  ;;  %v1900_v6 = vld [vmem:[#allocation3 + $0x468] sm:$0xff]  ;;  %v1902_v11 = vld [vmem:[#allocation3 + $0x478] sm:$0xff]  ;;  %v7556_v33 = vpack.c.bf16 %v1915_v32, %v1907_v21  ;;  %v1923_v61 = vld [vmem:[#allocation3 + $0x520] sm:$0xff] }
 0x4f3   :  { %5659 = vmatprep.subr.bf16.mxu0 %v7514_v59  ;;  %5723 = vmatprep.subr.bf16.mxu1 %v7516_v51  ;;  %v7538_v40 = vpack.c.bf16 %v1900_v6, %v1892_v24  ;;  %v7540_v22 = vpack.c.bf16 %v1902_v11, %v1894_v26  ;;  %v1908_v51 = vld [vmem:[#allocation3 + $0x4a8] sm:$0xff]  ;;  %v1910_v59 = vld [vmem:[#allocation3 + $0x4b8] sm:$0xff]  ;;  %9439 = vst [vmem:[#allocation81_spill] sm:$0xff] %v7546_v10  ;;  %v1909_v24 = vld [vmem:[#allocation3 + $0x4b0] sm:$0xff] }
 0x4f4   :  { %v1917_v6 = vld [vmem:[#allocation3 + $0x4f0] sm:$0xff]  ;;  %9442 = vst [vmem:[#allocation84_spill] sm:$0xff] %v7556_v33  ;;  %v1931_v54 = vld [vmem:[#allocation3 + $0x560] sm:$0xff] }
 0x4f5   :  { %9436 = vst [vmem:[#allocation78_spill] sm:$0xff] %v7538_v40  ;;  %9437 = vst [vmem:[#allocation79_spill] sm:$0xff] %v7540_v22  ;;  %v7558_v4 = vpack.c.bf16 %v1917_v6, %v1909_v24  ;;  %v7568_v21 = vpack.c.bf16 %v1931_v54, %v1923_v61  ;;  %v1939_v24 = vld [vmem:[#allocation3 + $0x5a0] sm:$0xff] }
 0x4f6   :  { %5661 = vmatpush1.bf16.msra.mxu0 %v7520_v39  ;;  %5725 = vmatpush1.bf16.msra.mxu1 %v7522_v56  ;;  %v1916_v39 = vld [vmem:[#allocation3 + $0x4e8] sm:$0xff]  ;;  %v1918_v56 = vld [vmem:[#allocation3 + $0x4f8] sm:$0xff]  ;;  %v1947_v6 = vld [vmem:[#allocation3 + $0x5e0] sm:$0xff] }
 0x4f7   :  { %5663 = vmatprep.subr.bf16.mxu0 %v7526_v16  ;;  %5727 = vmatprep.subr.bf16.mxu1 %v7528_v36  ;;  %v7550_v11 = vpack.c.bf16 %v1916_v39, %v1908_v51  ;;  %v7552_v26 = vpack.c.bf16 %v1918_v56, %v1910_v59  ;;  %v1924_v36 = vld [vmem:[#allocation3 + $0x528] sm:$0xff]  ;;  %v1926_v16 = vld [vmem:[#allocation3 + $0x538] sm:$0xff]  ;;  %9443 = vst [vmem:[#allocation85_spill] sm:$0xff] %v7558_v4  ;;  %v1925_v39 = vld [vmem:[#allocation3 + $0x530] sm:$0xff] }
 0x4f8   :  { %v1933_v56 = vld [vmem:[#allocation3 + $0x570] sm:$0xff]  ;;  %9446 = vst [vmem:[#allocation88_spill] sm:$0xff] %v7568_v21  ;;  %v7580_v61 = vpack.c.bf16 %v1947_v6, %v1939_v24 }
 0x4f9   :  { %9440 = vst [vmem:[#allocation82_spill] sm:$0xff] %v7550_v11  ;;  %9441 = vst [vmem:[#allocation83_spill] sm:$0xff] %v7552_v26  ;;  %v7570_v32 = vpack.c.bf16 %v1933_v56, %v1925_v39  ;;  %v1955_v39 = vld [vmem:[#allocation3 + $0x620] sm:$0xff] }
 0x4fa   :  { %5665 = vmatpush1.bf16.msra.mxu0 %v7532_v45  ;;  %5729 = vmatpush1.bf16.msra.mxu1 %v7534_v8  ;;  %v1932_v45 = vld [vmem:[#allocation3 + $0x568] sm:$0xff]  ;;  %v1934_v8 = vld [vmem:[#allocation3 + $0x578] sm:$0xff]  ;;  %9450 = vst [vmem:[#allocation92_spill] sm:$0xff] %v7580_v61  ;;  %v1963_v56 = vld [vmem:[#allocation3 + $0x660] sm:$0xff] }
 0x4fb   :  { %5667 = vmatprep.subr.bf16.mxu0 %v7538_v40  ;;  %5731 = vmatprep.subr.bf16.mxu1 %v7540_v22  ;;  %v7562_v59 = vpack.c.bf16 %v1932_v45, %v1924_v36  ;;  %v7564_v51 = vpack.c.bf16 %v1934_v8, %v1926_v16  ;;  %v1940_v22 = vld [vmem:[#allocation3 + $0x5a8] sm:$0xff]  ;;  %v1942_v40 = vld [vmem:[#allocation3 + $0x5b8] sm:$0xff]  ;;  %9447 = vst [vmem:[#allocation89_spill] sm:$0xff] %v7570_v32  ;;  %v1941_v45 = vld [vmem:[#allocation3 + $0x5b0] sm:$0xff] }
 0x4fc   :  { %v1949_v8 = vld [vmem:[#allocation3 + $0x5f0] sm:$0xff]  ;;  %v7592_v24 = vpack.c.bf16 %v1963_v56, %v1955_v39 }
 0x4fd   :  { %9444 = vst [vmem:[#allocation86_spill] sm:$0xff] %v7562_v59  ;;  %9445 = vst [vmem:[#allocation87_spill] sm:$0xff] %v7564_v51  ;;  %v7582_v54 = vpack.c.bf16 %v1949_v8, %v1941_v45  ;;  %v1971_v45 = vld [vmem:[#allocation3 + $0x6a0] sm:$0xff] }
 0x4fe   :  { %5669 = vmatpush1.bf16.msra.mxu0 %v7544_v55  ;;  %5733 = vmatpush1.bf16.msra.mxu1 %v7546_v10  ;;  %v1948_v55 = vld [vmem:[#allocation3 + $0x5e8] sm:$0xff]  ;;  %v1950_v10 = vld [vmem:[#allocation3 + $0x5f8] sm:$0xff]  ;;  %9454 = vst [vmem:[#allocation96_spill] sm:$0xff] %v7592_v24  ;;  %v1979_v8 = vld [vmem:[#allocation3 + $0x6e0] sm:$0xff] }
 0x4ff   :  { %5671 = vmatprep.subr.bf16.mxu0 %v7550_v11  ;;  %5735 = vmatprep.subr.bf16.mxu1 %v7552_v26  ;;  %v7574_v16 = vpack.c.bf16 %v1948_v55, %v1940_v22  ;;  %v7576_v36 = vpack.c.bf16 %v1950_v10, %v1942_v40  ;;  %v1956_v26 = vld [vmem:[#allocation3 + $0x628] sm:$0xff]  ;;  %v1958_v11 = vld [vmem:[#allocation3 + $0x638] sm:$0xff]  ;;  %9451 = vst [vmem:[#allocation93_spill] sm:$0xff] %v7582_v54  ;;  %v1957_v55 = vld [vmem:[#allocation3 + $0x630] sm:$0xff] }
 0x500   :  { %v1965_v10 = vld [vmem:[#allocation3 + $0x670] sm:$0xff]  ;;  %v7604_v39 = vpack.c.bf16 %v1979_v8, %v1971_v45 }
 0x501   :  { %9448 = vst [vmem:[#allocation90_spill] sm:$0xff] %v7574_v16  ;;  %9449 = vst [vmem:[#allocation91_spill] sm:$0xff] %v7576_v36  ;;  %v7594_v6 = vpack.c.bf16 %v1965_v10, %v1957_v55  ;;  %v1987_v55 = vld [vmem:[#allocation3 + $0x720] sm:$0xff] }
 0x502   :  { %5673 = vmatpush1.bf16.msra.mxu0 %v7556_v33  ;;  %5737 = vmatpush1.bf16.msra.mxu1 %v7558_v4  ;;  %v1964_v33 = vld [vmem:[#allocation3 + $0x668] sm:$0xff]  ;;  %v1966_v4 = vld [vmem:[#allocation3 + $0x678] sm:$0xff]  ;;  %9456 = vst [vmem:[#allocation98_spill] sm:$0xff] %v7604_v39  ;;  %v1995_v10 = vld [vmem:[#allocation3 + $0x760] sm:$0xff] }
 0x503   :  { %5675 = vmatprep.subr.bf16.mxu0 %v7562_v59  ;;  %5739 = vmatprep.subr.bf16.mxu1 %v7564_v51  ;;  %v7586_v40 = vpack.c.bf16 %v1964_v33, %v1956_v26  ;;  %v7588_v22 = vpack.c.bf16 %v1966_v4, %v1958_v11  ;;  %v1972_v51 = vld [vmem:[#allocation3 + $0x6a8] sm:$0xff]  ;;  %v1974_v59 = vld [vmem:[#allocation3 + $0x6b8] sm:$0xff]  ;;  %9455 = vst [vmem:[#allocation97_spill] sm:$0xff] %v7594_v6  ;;  %v1973_v33 = vld [vmem:[#allocation3 + $0x6b0] sm:$0xff] }
 0x504   :  { %v1981_v4 = vld [vmem:[#allocation3 + $0x6f0] sm:$0xff]  ;;  %v7616_v45 = vpack.c.bf16 %v1995_v10, %v1987_v55 }
 0x505   :  { %9452 = vst [vmem:[#allocation94_spill] sm:$0xff] %v7586_v40  ;;  %9453 = vst [vmem:[#allocation95_spill] sm:$0xff] %v7588_v22  ;;  %v7606_v56 = vpack.c.bf16 %v1981_v4, %v1973_v33  ;;  %v2003_v33 = vld [vmem:[#allocation3 + $0x7a0] sm:$0xff]  ;;  %v2013_v4 = vld [vmem:[#allocation3 + $0x7f0] sm:$0xff] }
 0x506   :  { %5677 = vmatpush1.bf16.msra.mxu0 %v7568_v21  ;;  %5741 = vmatpush1.bf16.msra.mxu1 %v7570_v32  ;;  %v1980_v21 = vld [vmem:[#allocation3 + $0x6e8] sm:$0xff]  ;;  %v1982_v32 = vld [vmem:[#allocation3 + $0x6f8] sm:$0xff] }
 0x507   :  { %5679 = vmatprep.subr.bf16.mxu0 %v7574_v16  ;;  %5743 = vmatprep.subr.bf16.mxu1 %v7576_v36  ;;  %v7598_v11 = vpack.c.bf16 %v1980_v21, %v1972_v51  ;;  %v7600_v26 = vpack.c.bf16 %v1982_v32, %v1974_v59  ;;  %v1988_v36 = vld [vmem:[#allocation3 + $0x728] sm:$0xff]  ;;  %v1990_v16 = vld [vmem:[#allocation3 + $0x738] sm:$0xff]  ;;  %v1989_v21 = vld [vmem:[#allocation3 + $0x730] sm:$0xff] }
 0x508   :  { %v1997_v32 = vld [vmem:[#allocation3 + $0x770] sm:$0xff] }
 0x509   :  { %v7618_v8 = vpack.c.bf16 %v1997_v32, %v1989_v21  ;;  %v9499_v21 = vld [vmem:[#allocation60_spill] sm:$0xff]  ;;  %v9500_v32 = vld [vmem:[#allocation61_spill] sm:$0xff] }
 0x50a   :  { %5681 = vmatpush1.bf16.msra.mxu0 %v7580_v61  ;;  %5745 = vmatpush1.bf16.msra.mxu1 %v7582_v54  ;;  %v1996_v61 = vld [vmem:[#allocation3 + $0x768] sm:$0xff]  ;;  %v1998_v54 = vld [vmem:[#allocation3 + $0x778] sm:$0xff] }
 0x50b   :  { %5683 = vmatprep.subr.bf16.mxu0 %v7586_v40  ;;  %5747 = vmatprep.subr.bf16.mxu1 %v7588_v22  ;;  %v7610_v59 = vpack.c.bf16 %v1996_v61, %v1988_v36  ;;  %v7612_v51 = vpack.c.bf16 %v1998_v54, %v1990_v16  ;;  %v2004_v22 = vld [vmem:[#allocation3 + $0x7a8] sm:$0xff]  ;;  %v2006_v40 = vld [vmem:[#allocation3 + $0x7b8] sm:$0xff]  ;;  %v2011_v61 = vld [vmem:[#allocation3 + $0x7e0] sm:$0xff] }
 0x50c   :  { %v2005_v54 = vld [vmem:[#allocation3 + $0x7b0] sm:$0xff]  ;;  %v7630_v55 = vpack.c.bf16 %v2011_v61, %v2003_v33  ;;  %v9502_v61 = vld [vmem:[#allocation63_spill] sm:$0xff] }
 0x50d   :  { %v7632_v10 = vpack.c.bf16 %v2013_v4, %v2005_v54  ;;  %v9501_v33 = vld [vmem:[#allocation62_spill] sm:$0xff]  ;;  %v9503_v54 = vld [vmem:[#allocation64_spill] sm:$0xff] }
 0x50e   :  { %5685 = vmatpush1.bf16.msra.mxu0 %v7592_v24  ;;  %5749 = vmatpush1.bf16.msra.mxu1 %v7594_v6  ;;  %v2012_v24 = vld [vmem:[#allocation3 + $0x7e8] sm:$0xff]  ;;  %v2014_v6 = vld [vmem:[#allocation3 + $0x7f8] sm:$0xff]  ;;  %v9504_v4 = vld [vmem:[#allocation66_spill] sm:$0xff] }
 0x50f   :  { %5687 = vmatprep.subr.bf16.mxu0 %v7598_v11  ;;  %5751 = vmatprep.subr.bf16.mxu1 %v7600_v26  ;;  %v7622_v16 = vpack.c.bf16 %v2012_v24, %v2004_v22  ;;  %v7624_v36 = vpack.c.bf16 %v2014_v6, %v2006_v40  ;;  %v9495_v22 = vld [vmem:[#allocation56_spill] sm:$0xff]  ;;  %v9496_v24 = vld [vmem:[#allocation57_spill] sm:$0xff]  ;;  %v9497_v6 = vld [vmem:[#allocation58_spill] sm:$0xff] }
 0x512   :  { %5689 = vmatpush1.bf16.msra.mxu0 %v7604_v39  ;;  %5753 = vmatpush1.bf16.msra.mxu1 %v7606_v56  ;;  %v1744_v39 = vmul.f32 %v7434_v29, %v7504_v9 }
 0x513   :  { %5691 = vmatprep.subr.bf16.mxu0 %v7610_v59  ;;  %5755 = vmatprep.subr.bf16.mxu1 %v7612_v51 }
 0x514   :  { %v1754_v40 = vadd.f32 %v7437_v25, %v1744_v39  ;;  %v9498_v39 = vld [vmem:[#allocation59_spill] sm:$0xff] }
 0x516   :  { %5693 = vmatpush1.bf16.msra.mxu0 %v7616_v45  ;;  %5757 = vmatpush1.bf16.msra.mxu1 %v7618_v8  ;;  %v7641_v9 = vmax.f32 %v1754_v40, 0.0  ;;  %v9505_v40 = vld [vmem:[#allocation67_spill] sm:$0xff] }
 0x517   :  { %5695 = vmatprep.subr.bf16.mxu0 %v7622_v16  ;;  %5759 = vmatprep.subr.bf16.mxu1 %v7624_v36 }
 0x51a   :  { %5697 = vmatpush1.bf16.msra.mxu0 %v7630_v55  ;;  %5761 = vmatpush1.bf16.msra.mxu1 %v7632_v10 }
 0x51b   :  { %5763 = vmatprep.subr.bf16.mxu0 %v7149_v28  ;;  %5827 = vmatprep.subr.bf16.mxu1 %v7268_v57  ;;  %v9457_v28 = vld [vmem:[#allocation19_spill] sm:$0xff]  ;;  %v9469_v57 = vld [vmem:[#allocation25_spill] sm:$0xff] }
 0x51d   :  { %2222 = vmatmul.mubr.f32.vlgmr.msra.gmra.mrb[8].mxu0 %v7446_v20  ;;  %2293 = vmatmul.mubr.f32.vlgmr.msra.gmra.mrb[8].mxu1 %v7446_v20  ;;  %v9494_v20 = vld [vmem:[#allocation55_spill] sm:$0xff] }
 0x51e   :  { %5765 = vmatpush1.bf16.msra.mxu0 %v7160_v44  ;;  %2363 = vmatprep.mubr.f32.mxu0 %v7641_v9  ;;  %v9458_v44 = vld [vmem:[#allocation28_spill] sm:$0xff] }
 0x51f   :  { %5829 = vmatpush1.bf16.msra.mxu1 %v7271_v14  ;;  %2434 = vmatprep.mubr.f32.mxu1 %v7641_v9  ;;  %v9470_v14 = vld [vmem:[#allocation34_spill] sm:$0xff] }
 0x520   :  { %5767 = vmatprep.subr.bf16.mxu0 %v7168_v58  ;;  %5831 = vmatprep.subr.bf16.mxu1 %v7275_v35  ;;  %v9459_v58 = vld [vmem:[#allocation20_spill] sm:$0xff]  ;;  %v9472_v35 = vld [vmem:[#allocation35_spill] sm:$0xff] }
 0x522   :  { %5769 = vmatpush1.bf16.msra.mxu0 %v7187_v53  ;;  %v9460_v53 = vld [vmem:[#allocation29_spill] sm:$0xff] }
 0x523   :  { %5833 = vmatpush1.bf16.msra.mxu1 %v7286_v31  ;;  %5771 = vmatprep.subr.bf16.mxu0 %v7199_v23  ;;  %v9461_v23 = vld [vmem:[#allocation21_spill] sm:$0xff] }
 0x524   :  { %5835 = vmatprep.subr.bf16.mxu1 %v7290_v47  ;;  %v9475_v47 = vld [vmem:[#allocation36_spill] sm:$0xff] }
 0x526   :  { %5773 = vmatpush1.bf16.msra.mxu0 %v7221_v1  ;;  %v9462_v1 = vld [vmem:[#allocation30_spill] sm:$0xff] }
 0x527   :  { %5837 = vmatpush1.bf16.msra.mxu1 %v7299_v42  ;;  %5775 = vmatprep.subr.bf16.mxu0 %v7223_v63  ;;  %v9463_v63 = vld [vmem:[#allocation22_spill] sm:$0xff]  ;;  %v9478_v42 = vld [vmem:[#allocation39_spill] sm:$0xff] }
 0x528   :  { %5839 = vmatprep.subr.bf16.mxu1 %v7302_v52 }
 0x52a   :  { %5777 = vmatpush1.bf16.msra.mxu0 %v7233_v18  ;;  %v9464_v18 = vld [vmem:[#allocation31_spill] sm:$0xff] }
 0x52b   :  { %5841 = vmatpush1.bf16.msra.mxu1 %v7311_v37  ;;  %5779 = vmatprep.subr.bf16.mxu0 %v7242_v41  ;;  %v9465_v41 = vld [vmem:[#allocation23_spill] sm:$0xff]  ;;  %v9481_v37 = vld [vmem:[#allocation42_spill] sm:$0xff] }
 0x52c   :  { %5843 = vmatprep.subr.bf16.mxu1 %v7314_v12  ;;  %v9482_v12 = vld [vmem:[#allocation43_spill] sm:$0xff] }
 0x52e   :  { %5781 = vmatpush1.bf16.msra.mxu0 %v7255_v17  ;;  %v9466_v17 = vld [vmem:[#allocation32_spill] sm:$0xff] }
 0x52f   :  { %5845 = vmatpush1.bf16.msra.mxu1 %v7323_v3  ;;  %5783 = vmatprep.subr.bf16.mxu0 %v7258_v0  ;;  %v9467_v0 = vld [vmem:[#allocation24_spill] sm:$0xff] }
 0x530   :  { %5847 = vmatprep.subr.bf16.mxu1 %v7326_v49  ;;  %v9483_v49 = vld [vmem:[#allocation44_spill] sm:$0xff] }
 0x532   :  { %5785 = vmatpush1.bf16.msra.mxu0 %v7266_v38  ;;  %v9468_v38 = vld [vmem:[#allocation33_spill] sm:$0xff] }
 0x533   :  { %5849 = vmatpush1.bf16.msra.mxu1 %v7335_v43  ;;  %5787 = vmatprep.subr.bf16.mxu0 %v7273_v60  ;;  %v9471_v60 = vld [vmem:[#allocation26_spill] sm:$0xff]  ;;  %v9484_v43 = vld [vmem:[#allocation45_spill] sm:$0xff] }
 0x534   :  { %5851 = vmatprep.subr.bf16.mxu1 %v7338_v48  ;;  %v9485_v48 = vld [vmem:[#allocation46_spill] sm:$0xff] }
 0x536   :  { %5789 = vmatpush1.bf16.msra.mxu0 %v7278_v34  ;;  %v9473_v34 = vld [vmem:[#allocation27_spill] sm:$0xff] }
 0x537   :  { %5853 = vmatpush1.bf16.msra.mxu1 %v7347_v5  ;;  %5791 = vmatprep.subr.bf16.mxu0 %v7283_v19  ;;  %v9474_v19 = vld [vmem:[#allocation65_spill] sm:$0xff]  ;;  %v9486_v5 = vld [vmem:[#allocation47_spill] sm:$0xff] }
 0x538   :  { %5855 = vmatprep.subr.bf16.mxu1 %v7350_v27  ;;  %v1743_v31 = vmul.f32 %v7434_v29, %v9474_v19  ;;  %v9487_v27 = vld [vmem:[#allocation48_spill] sm:$0xff]  ;;  %v9493_v29 = vld [vmem:[#allocation54_spill] sm:$0xff] }
 0x539   :  { %v9524_v19 = vld [vmem:[#allocation86_spill] sm:$0xff] }
 0x53a   :  { %5793 = vmatpush1.bf16.msra.mxu0 %v7293_v2  ;;  %v9476_v2 = vld [vmem:[#allocation37_spill] sm:$0xff]  ;;  %v1753_v52 = vadd.f32 %v7437_v25, %v1743_v31  ;;  %v9525_v31 = vld [vmem:[#allocation87_spill] sm:$0xff] }
 0x53b   :  { %5857 = vmatpush1.bf16.msra.mxu1 %v7359_v46  ;;  %5795 = vmatprep.subr.bf16.mxu0 %v7296_v15  ;;  %v9477_v15 = vld [vmem:[#allocation38_spill] sm:$0xff]  ;;  %v9488_v46 = vld [vmem:[#allocation49_spill] sm:$0xff] }
 0x53c   :  { %5859 = vmatprep.subr.bf16.mxu1 %v7362_v50  ;;  %v7711_v3 = vmax.f32 %v1753_v52, 0.0  ;;  %v9489_v50 = vld [vmem:[#allocation50_spill] sm:$0xff]  ;;  %v9492_v25 = vld [vmem:[#allocation53_spill] sm:$0xff]  ;;  %v9530_v52 = vld [vmem:[#allocation92_spill] sm:$0xff] }
 0x53e   :  { %5797 = vmatpush1.bf16.msra.mxu0 %v7305_v13  ;;  %v9479_v13 = vld [vmem:[#allocation40_spill] sm:$0xff] }
 0x53f   :  { %5861 = vmatpush1.bf16.msra.mxu1 %v7369_v62  ;;  %5799 = vmatprep.subr.bf16.mxu0 %v7308_v30  ;;  %v9480_v30 = vld [vmem:[#allocation41_spill] sm:$0xff]  ;;  %v9490_v62 = vld [vmem:[#allocation51_spill] sm:$0xff] }
 0x540   :  { %5863 = vmatprep.subr.bf16.mxu1 %v7372_v7  ;;  %v9491_v7 = vld [vmem:[#allocation52_spill] sm:$0xff] }
 0x542   :  { %5801 = vmatpush1.bf16.msra.mxu0 %v9457_v28  ;;  %v9507_v28 = vld [vmem:[#allocation69_spill] sm:$0xff] }
 0x543   :  { %5865 = vmatpush1.bf16.msra.mxu1 %v9458_v44  ;;  %5803 = vmatprep.subr.bf16.mxu0 %v9459_v58  ;;  %v9508_v44 = vld [vmem:[#allocation70_spill] sm:$0xff]  ;;  %v9509_v58 = vld [vmem:[#allocation71_spill] sm:$0xff] }
 0x544   :  { %5867 = vmatprep.subr.bf16.mxu1 %v9460_v53  ;;  %v9510_v53 = vld [vmem:[#allocation72_spill] sm:$0xff] }
 0x546   :  { %5805 = vmatpush1.bf16.msra.mxu0 %v9461_v23  ;;  %v9511_v23 = vld [vmem:[#allocation73_spill] sm:$0xff] }
 0x547   :  { %5869 = vmatpush1.bf16.msra.mxu1 %v9462_v1  ;;  %5807 = vmatprep.subr.bf16.mxu0 %v9463_v63  ;;  %v9512_v1 = vld [vmem:[#allocation74_spill] sm:$0xff]  ;;  %v9513_v63 = vld [vmem:[#allocation75_spill] sm:$0xff] }
 0x548   :  { %5871 = vmatprep.subr.bf16.mxu1 %v9464_v18  ;;  %v9514_v18 = vld [vmem:[#allocation76_spill] sm:$0xff] }
 0x54a   :  { %5809 = vmatpush1.bf16.msra.mxu0 %v9465_v41  ;;  %v9515_v41 = vld [vmem:[#allocation77_spill] sm:$0xff] }
 0x54b   :  { %5873 = vmatpush1.bf16.msra.mxu1 %v9466_v17  ;;  %5811 = vmatprep.subr.bf16.mxu0 %v9467_v0  ;;  %v9516_v17 = vld [vmem:[#allocation78_spill] sm:$0xff]  ;;  %v9517_v0 = vld [vmem:[#allocation79_spill] sm:$0xff] }
 0x54c   :  { %5875 = vmatprep.subr.bf16.mxu1 %v9468_v38  ;;  %v9518_v38 = vld [vmem:[#allocation80_spill] sm:$0xff] }
 0x54e   :  { %5813 = vmatpush1.bf16.msra.mxu0 %v9469_v57  ;;  %v9519_v57 = vld [vmem:[#allocation81_spill] sm:$0xff] }
 0x54f   :  { %5877 = vmatpush1.bf16.msra.mxu1 %v9470_v14  ;;  %5815 = vmatprep.subr.bf16.mxu0 %v9471_v60  ;;  %v9520_v14 = vld [vmem:[#allocation82_spill] sm:$0xff]  ;;  %v9521_v60 = vld [vmem:[#allocation83_spill] sm:$0xff] }
 0x550   :  { %5879 = vmatprep.subr.bf16.mxu1 %v9472_v35  ;;  %v9522_v35 = vld [vmem:[#allocation84_spill] sm:$0xff] }
 0x552   :  { %5817 = vmatpush1.bf16.msra.mxu0 %v9473_v34  ;;  %v9523_v34 = vld [vmem:[#allocation85_spill] sm:$0xff] }
 0x553   :  { %5881 = vmatpush1.bf16.msra.mxu1 %v9475_v47  ;;  %5819 = vmatprep.subr.bf16.mxu0 %v9476_v2  ;;  %v9526_v47 = vld [vmem:[#allocation88_spill] sm:$0xff]  ;;  %v9527_v2 = vld [vmem:[#allocation89_spill] sm:$0xff] }
 0x554   :  { %5883 = vmatprep.subr.bf16.mxu1 %v9477_v15  ;;  %v9528_v15 = vld [vmem:[#allocation90_spill] sm:$0xff] }
 0x556   :  { %5821 = vmatpush1.bf16.msra.mxu0 %v9478_v42  ;;  %v9529_v42 = vld [vmem:[#allocation91_spill] sm:$0xff] }
 0x557   :  { %5885 = vmatpush1.bf16.msra.mxu1 %v9479_v13  ;;  %5823 = vmatprep.subr.bf16.mxu0 %v9480_v30  ;;  %v9531_v13 = vld [vmem:[#allocation93_spill] sm:$0xff]  ;;  %v9532_v30 = vld [vmem:[#allocation94_spill] sm:$0xff] }
 0x558   :  { %5887 = vmatprep.subr.bf16.mxu1 %v9481_v37  ;;  %v9533_v37 = vld [vmem:[#allocation95_spill] sm:$0xff] }
 0x55a   :  { %5825 = vmatpush1.bf16.msra.mxu0 %v9482_v12  ;;  %v9534_v12 = vld [vmem:[#allocation96_spill] sm:$0xff] }
 0x55b   :  { %5889 = vmatpush1.bf16.msra.mxu1 %v9483_v49  ;;  %5891 = vmatprep.subr.bf16.mxu0 %v9484_v43  ;;  %v9535_v49 = vld [vmem:[#allocation97_spill] sm:$0xff]  ;;  %v9536_v43 = vld [vmem:[#allocation98_spill] sm:$0xff] }
 0x55c   :  { %5955 = vmatprep.subr.bf16.mxu1 %v9485_v48 }
 0x55d   :  { %2364 = vmatmul.mubr.f32.vlgmr.msra.gmra.mrb[10].mxu0 %v7711_v3 }
 0x55e   :  { %2435 = vmatmul.mubr.f32.vlgmr.msra.gmra.mrb[10].mxu1 %v7711_v3  ;;  %5893 = vmatpush1.bf16.msra.mxu0 %v9486_v5 }
 0x55f   :  { %2505 = vmatprep.mubr.f32.mxu0 %v7641_v9  ;;  %5957 = vmatpush1.bf16.msra.mxu1 %v9487_v27 }
 0x560   :  { %2576 = vmatprep.mubr.f32.mxu1 %v7641_v9  ;;  %5895 = vmatprep.subr.bf16.mxu0 %v9488_v46  ;;  %v9506_v9 = vld [vmem:[#allocation68_spill] sm:$0xff] }
 0x561   :  { %5959 = vmatprep.subr.bf16.mxu1 %v9489_v50  ;;  %v2632_v46 = vld [vmem:[#allocation8] ss:$8 sm:$0xf] }
 0x562   :  { %5897 = vmatpush1.bf16.msra.mxu0 %v9490_v62  ;;  %v2633_v50 = vld [vmem:[#allocation8] ss:$8 sm:$0xf0]  ;;  %v2803_v62 = vld [vmem:[#allocation8 + $0x1] ss:$8 sm:$0xf] }
 0x563   :  { %5961 = vmatpush1.bf16.msra.mxu1 %v9491_v7  ;;  %5899 = vmatprep.subr.bf16.mxu0 %v9492_v25  ;;  %v2804_v7 = vld [vmem:[#allocation8 + $0x1] ss:$8 sm:$0xf0] }
 0x564   :  { %5963 = vmatprep.subr.bf16.mxu1 %v9493_v29 }
 0x566   :  { %5901 = vmatpush1.bf16.msra.mxu0 %v9494_v20 }
 0x567   :  { %5965 = vmatpush1.bf16.msra.mxu1 %v9495_v22  ;;  %5903 = vmatprep.subr.bf16.mxu0 %v9496_v24  ;;  %v7938_v24 = vor.u32 %v2633_v50, %v2632_v46  ;;  %v2975_v46 = vld [vmem:[#allocation8 + $0x2] ss:$8 sm:$0xf0] }
 0x568   :  { %5967 = vmatprep.subr.bf16.mxu1 %v9497_v6 }
 0x56a   :  { %5905 = vmatpush1.bf16.msra.mxu0 %v9498_v39  ;;  %v7946_v39 = vor.u32 %v2804_v7, %v2803_v62 }
 0x56b   :  { %5969 = vmatpush1.bf16.msra.mxu1 %v9499_v21  ;;  %5907 = vmatprep.subr.bf16.mxu0 %v9500_v32  ;;  %v9548_v32 = vld [vmem:[#allocation14_spill] sm:$0xff] }
 0x56c   :  { %5971 = vmatprep.subr.bf16.mxu1 %v9501_v33  ;;  %vm2615_vm9 = vcmp.lt.s32.totalorder %v9548_v32, 33  ;;  %vm2785_vm10 = vcmp.lt.s32.totalorder %v9548_v32, 32  ;;  %vm2956_vm11 = vcmp.lt.s32.totalorder %v9548_v32, 31  ;;  %vm3483_vm12 = vcmp.lt.s32.totalorder %v9548_v32, 97 }
 0x56d   :  { %vm3654_vm13 = vcmp.lt.s32.totalorder %v9548_v32, 96  ;;  %vm3825_vm14 = vcmp.lt.s32.totalorder %v9548_v32, 95 }
 0x56e   :  { %5909 = vmatpush1.bf16.msra.mxu0 %v9502_v61 }
 0x56f   :  { %5973 = vmatpush1.bf16.msra.mxu1 %v9503_v54  ;;  %5911 = vmatprep.subr.bf16.mxu0 %v9504_v4  ;;  %v9550_v54 = vld [vmem:[#allocation15_spill] sm:$0xff] }
 0x570   :  { %5975 = vmatprep.subr.bf16.mxu1 %v9505_v40  ;;  %v2648_v4 = vrot.slane %v7938_v24, %v9550_v54  ;;  %v2819_v40 = vrot.slane %v7946_v39, %v9550_v54 }
 0x572   :  { %5913 = vmatpush1.bf16.msra.mxu0 %v9506_v9 }
 0x573   :  { %5977 = vmatpush1.bf16.msra.mxu1 %v9507_v28  ;;  %5915 = vmatprep.subr.bf16.mxu0 %v9508_v44 }
 0x574   :  { %5979 = vmatprep.subr.bf16.mxu1 %v9509_v58  ;;  %v9551_v58 = vld [vmem:[#allocation18_spill] sm:$0xff] }
 0x576   :  { %5917 = vmatpush1.bf16.msra.mxu0 %v9510_v53  ;;  %v2656_v53 = vrot.slane %v7938_v24, %v9551_v58 }
 0x577   :  { %5981 = vmatpush1.bf16.msra.mxu1 %v9511_v23  ;;  %5919 = vmatprep.subr.bf16.mxu0 %v9512_v1  ;;  %v9552_v23 = vld [vmem:[#allocation17_spill] sm:$0xff] }
 0x578   :  { %5983 = vmatprep.subr.bf16.mxu1 %v9513_v63  ;;  %v2823_v1 = vrot.slane %v7946_v39, %v9552_v23 }
 0x57a   :  { %5921 = vmatpush1.bf16.msra.mxu0 %v9514_v18 }
 0x57b   :  { %5985 = vmatpush1.bf16.msra.mxu1 %v9515_v41  ;;  %5923 = vmatprep.subr.bf16.mxu0 %v9516_v17  ;;  %v2827_v17 = vrot.slane %v7946_v39, %v9551_v58 }
 0x57c   :  { %5987 = vmatprep.subr.bf16.mxu1 %v9517_v0 }
 0x57e   :  { %5925 = vmatpush1.bf16.msra.mxu0 %v9518_v38 }
 0x57f   :  { %5989 = vmatpush1.bf16.msra.mxu1 %v9519_v57  ;;  %5927 = vmatprep.subr.bf16.mxu0 %v9520_v14  ;;  %v2652_v57 = vrot.slane %v7938_v24, %v9552_v23 }
 0x580   :  { %5991 = vmatprep.subr.bf16.mxu1 %v9521_v60 }
 0x582   :  { %5929 = vmatpush1.bf16.msra.mxu0 %v9522_v35 }
 0x583   :  { %5993 = vmatpush1.bf16.msra.mxu1 %v9523_v34  ;;  %5931 = vmatprep.subr.bf16.mxu0 %v9524_v19 }
 0x584   :  { %5995 = vmatprep.subr.bf16.mxu1 %v9525_v31 }
 0x586   :  { %5933 = vmatpush1.bf16.msra.mxu0 %v9526_v47 }
 0x587   :  { %5997 = vmatpush1.bf16.msra.mxu1 %v9527_v2  ;;  %5935 = vmatprep.subr.bf16.mxu0 %v9528_v15 }
 0x588   :  { %5999 = vmatprep.subr.bf16.mxu1 %v9529_v42 }
 0x58a   :  { %5937 = vmatpush1.bf16.msra.mxu0 %v9530_v52 }
 0x58b   :  { %6001 = vmatpush1.bf16.msra.mxu1 %v9531_v13  ;;  %5939 = vmatprep.subr.bf16.mxu0 %v9532_v30 }
 0x58c   :  { %6003 = vmatprep.subr.bf16.mxu1 %v9533_v37  ;;  %v3144_v37 = vld [vmem:[#allocation8 + $0x3] ss:$8 sm:$0xf] }
 0x58e   :  { %5941 = vmatpush1.bf16.msra.mxu0 %v9534_v12  ;;  %v3145_v12 = vld [vmem:[#allocation8 + $0x3] ss:$8 sm:$0xf0] }
 0x58f   :  { %6005 = vmatpush1.bf16.msra.mxu1 %v9535_v49  ;;  %5943 = vmatprep.subr.bf16.mxu0 %v7598_v11  ;;  %v9537_v11 = vmov 0.0   ;;  %v8014_v50 = vor.u32 %v3145_v12, %v3144_v37 }
 0x590   :  { %6007 = vmatprep.subr.bf16.mxu1 %v7600_v26 }
 0x592   :  { %5945 = vmatpush1.bf16.msra.mxu0 %v9536_v43 }
 0x593   :  { %6009 = vmatpush1.bf16.msra.mxu1 %v7606_v56  ;;  %5947 = vmatprep.subr.bf16.mxu0 %v7610_v59 }
 0x594   :  { %6011 = vmatprep.subr.bf16.mxu1 %v7612_v51 }
 0x596   :  { %5949 = vmatpush1.bf16.msra.mxu0 %v7616_v45 }
 0x597   :  { %6013 = vmatpush1.bf16.msra.mxu1 %v7618_v8  ;;  %5951 = vmatprep.subr.bf16.mxu0 %v7622_v16 }
 0x598   :  { %6015 = vmatprep.subr.bf16.mxu1 %v7624_v36 }
 0x59a   :  { %5953 = vmatpush1.bf16.msra.mxu0 %v7630_v55 }
 0x59b   :  { %6017 = vmatpush1.bf16.msra.mxu1 %v7632_v10 }
 0x59d   :  { %2506 = vmatmul.mubr.f32.vlgmr.msra.gmra.mrb[12].mxu0 %v7711_v3 }
 0x59e   :  { %2577 = vmatmul.mubr.f32.vlgmr.msra.gmra.mrb[12].mxu1 %v7711_v3  ;;  %4176 = vmatprep.mubr.f32.mxu0 %v9537_v11 }
 0x59f   :  { %4247 = vmatprep.mubr.f32.mxu1 %v9537_v11 }
 0x5b0   :  { %v7786_v26 = vpop.f32.mrb[6].mxu0  ;;  %v7788_v56 = vpop.f32.mrb[6].mxu1 }
 0x5b1   :  { %9538 = vst [vmem:[#allocation19_spill] sm:$0xff] %v7786_v26  ;;  %3285 = vrot.lane.b32.xlu0 %v7788_v56, %s6278_s20  ;;  %v7792_v59 = vpop.f32.mrb[7].mxu1  ;;  %2583 = vrot.lane.b32.xlu1 %v7786_v26, %s6284_s7  ;;  %v7796_v51 = vpop.f32.mrb[7].mxu0 }
 0x5b2   :  { %9539 = vst [vmem:[#allocation28_spill] sm:$0xff] %v7796_v51 }
 0x5b5   :  { %3451 = vrot.lane.b32.xlu0 %v7786_v26, %s6285_s6  ;;  %2587 = vrot.lane.b32.xlu1 %v7788_v56, %s6284_s7 }
 0x5b9   :  { %3793 = vrot.lane.b32.xlu0 %v7786_v26, %s6286_s4  ;;  %2753 = vrot.lane.b32.xlu1 %v7786_v26, %s6287_s25 }
 0x5bd   :  { %2757 = vrot.lane.b32.xlu1 %v7788_v56, %s6287_s25  ;;  %2585 = vrot.lane.b32.xlu0 %v7796_v51, %s6284_s7 }
 0x5c1   :  { %2924 = vrot.lane.b32.xlu1 %v7786_v26, %s6288_s23  ;;  %2589 = vrot.lane.b32.xlu0 %v7792_v59, %s6284_s7 }
 0x5c5   :  { %2928 = vrot.lane.b32.xlu1 %v7788_v56, %s6288_s23  ;;  %2755 = vrot.lane.b32.xlu0 %v7796_v51, %s6287_s25 }
 0x5c9   :  { %3095 = vrot.lane.b32.xlu1 %v7786_v26, %s6277_s1  ;;  %2759 = vrot.lane.b32.xlu0 %v7792_v59, %s6287_s25 }
 0x5cd   :  { %3099 = vrot.lane.b32.xlu1 %v7788_v56, %s6277_s1  ;;  %2926 = vrot.lane.b32.xlu0 %v7796_v51, %s6288_s23 }
 0x5d1   :  { %3281 = vrot.lane.b32.xlu1 %v7786_v26, %s6278_s20  ;;  %2930 = vrot.lane.b32.xlu0 %v7792_v59, %s6288_s23 }
 0x5d5   :  { %3455 = vrot.lane.b32.xlu1 %v7788_v56, %s6285_s6  ;;  %3097 = vrot.lane.b32.xlu0 %v7796_v51, %s6277_s1 }
 0x5d9   :  { %3626 = vrot.lane.b32.xlu1 %v7788_v56, %s6289_s19  ;;  %3101 = vrot.lane.b32.xlu0 %v7792_v59, %s6277_s1 }
 0x5dd   :  { %3622 = vrot.lane.b32.xlu1 %v7786_v26, %s6289_s19  ;;  %3453 = vrot.lane.b32.xlu0 %v7796_v51, %s6285_s6 }
 0x5e1   :  { %3797 = vrot.lane.b32.xlu1 %v7788_v56, %s6286_s4  ;;  %3457 = vrot.lane.b32.xlu0 %v7792_v59, %s6285_s6 }
 0x5e5   :  { %3283 = vrot.lane.b32.xlu1 %v7796_v51, %s6278_s20  ;;  %3624 = vrot.lane.b32.xlu0 %v7796_v51, %s6289_s19 }
 0x5e9   :  { %3287 = vrot.lane.b32.xlu1 %v7792_v59, %s6278_s20  ;;  %3628 = vrot.lane.b32.xlu0 %v7792_v59, %s6289_s19 }
 0x5ed   :  { %3795 = vrot.lane.b32.xlu0 %v7796_v51, %s6286_s4 }
 0x5f0   :  { %v7856_v45 = vpop.f32.mrb[8].mxu0  ;;  %v7858_v8 = vpop.f32.mrb[8].mxu1 }
 0x5f1   :  { %9540 = vst [vmem:[#allocation20_spill] sm:$0xff] %v7856_v45  ;;  %v7860_v16 = vpop.f32.mrb[9].mxu1  ;;  %3459 = vrot.lane.b32.xlu1 %v7856_v45, %s6285_s6  ;;  %v7864_v36 = vpop.f32.mrb[9].mxu0  ;;  %3799 = vrot.lane.b32.xlu0 %v7792_v59, %s6286_s4 }
 0x5f2   :  { %9541 = vst [vmem:[#allocation29_spill] sm:$0xff] %v7864_v36 }
 0x5f5   :  { %3630 = vrot.lane.b32.xlu1 %v7856_v45, %s6289_s19  ;;  %3289 = vrot.lane.b32.xlu0 %v7856_v45, %s6278_s20 }
 0x5f9   :  { %3801 = vrot.lane.b32.xlu1 %v7856_v45, %s6286_s4  ;;  %2591 = vrot.lane.b32.xlu0 %v7856_v45, %s6284_s7 }
 0x5fd   :  { %2932 = vrot.lane.b32.xlu1 %v7856_v45, %s6288_s23  ;;  %2595 = vrot.lane.b32.xlu0 %v7858_v8, %s6284_s7 }
 0x601   :  { %2936 = vrot.lane.b32.xlu1 %v7858_v8, %s6288_s23  ;;  %2761 = vrot.lane.b32.xlu0 %v7856_v45, %s6287_s25 }
 0x605   :  { %3103 = vrot.lane.b32.xlu1 %v7856_v45, %s6277_s1  ;;  %2765 = vrot.lane.b32.xlu0 %v7858_v8, %s6287_s25 }
 0x609   :  { %3107 = vrot.lane.b32.xlu1 %v7858_v8, %s6277_s1  ;;  %3293 = vrot.lane.b32.xlu0 %v7858_v8, %s6278_s20 }
 0x60d   :  { %2593 = vrot.lane.b32.xlu1 %v7864_v36, %s6284_s7  ;;  %3463 = vrot.lane.b32.xlu0 %v7858_v8, %s6285_s6 }
 0x611   :  { %2597 = vrot.lane.b32.xlu1 %v7860_v16, %s6284_s7  ;;  %3634 = vrot.lane.b32.xlu0 %v7858_v8, %s6289_s19 }
 0x615   :  { %2763 = vrot.lane.b32.xlu1 %v7864_v36, %s6287_s25  ;;  %3805 = vrot.lane.b32.xlu0 %v7858_v8, %s6286_s4 }
 0x619   :  { %2767 = vrot.lane.b32.xlu1 %v7860_v16, %s6287_s25  ;;  %2934 = vrot.lane.b32.xlu0 %v7864_v36, %s6288_s23 }
 0x61d   :  { %3291 = vrot.lane.b32.xlu1 %v7864_v36, %s6278_s20  ;;  %2938 = vrot.lane.b32.xlu0 %v7860_v16, %s6288_s23 }
 0x621   :  { %3295 = vrot.lane.b32.xlu1 %v7860_v16, %s6278_s20  ;;  %3105 = vrot.lane.b32.xlu0 %v7864_v36, %s6277_s1 }
 0x623   :  { %v7916_v55 = vpop.permute.xlu0 %3285  ;;  %v7918_v10 = vpop.permute.xlu1 %2583 }
 0x624   :  { %9542 = vst [vmem:[#allocation21_spill] sm:$0xff] %v7916_v55  ;;  %9543 = vst [vmem:[#allocation30_spill] sm:$0xff] %v7918_v10 }
 0x625   :  { %3461 = vrot.lane.b32.xlu1 %v7864_v36, %s6285_s6  ;;  %3109 = vrot.lane.b32.xlu0 %v7860_v16, %s6277_s1 }
 0x627   :  { %v7924_v3 = vpop.permute.xlu0 %3451  ;;  %v2588_v48 = vpop.permute.xlu1 %2587 }
 0x628   :  { %9544 = vst [vmem:[#allocation22_spill] sm:$0xff] %v7924_v3 }
 0x629   :  { %3465 = vrot.lane.b32.xlu1 %v7860_v16, %s6285_s6 }
 0x62b   :  { %v7928_v5 = vpop.permute.xlu0 %3793  ;;  %v7930_v27 = vpop.permute.xlu1 %2753 }
 0x62c   :  { %9545 = vst [vmem:[#allocation31_spill] sm:$0xff] %v7928_v5  ;;  %9546 = vst [vmem:[#allocation23_spill] sm:$0xff] %v7930_v27 }
 0x62d   :  { %3632 = vrot.lane.b32.xlu1 %v7864_v36, %s6289_s19 }
 0x62f   :  { %v2758_v25 = vpop.permute.xlu1 %2757  ;;  %v2586_v29 = vpop.permute.xlu0 %2585 }
 0x630   :  { %v7934_v20 = vpop.f32.mrb[10].mxu0  ;;  %v2630_v9 = vsel %vm2615_vm9, %v7918_v10, %v2586_v29  ;;  %v2629_v34 = vsel %vm2615_vm9, %v2586_v29, %v2588_v48 }
 0x631   :  { %9547 = vst [vmem:[#allocation32_spill] sm:$0xff] %v7934_v20  ;;  %v7936_v22 = vpop.f32.mrb[10].mxu1  ;;  %3636 = vrot.lane.b32.xlu1 %v7860_v16, %s6289_s19  ;;  %3297 = vrot.lane.b32.xlu0 %v7934_v20, %s6278_s20  ;;  %v7944_v6 = vpop.f32.mrb[11].mxu0  ;;  %v2722_v18 = vmul.f32 %v2648_v4, %v2630_v9  ;;  %v2723_v15 = vmul.f32 %v2652_v57, %v2629_v34 }
 0x632   :  { %v7948_v21 = vpop.f32.mrb[11].mxu1  ;;  %v3164_v4 = vrot.slane %v8014_v50, %v9552_v23 }
 0x633   :  { %v7951_v33 = vpop.permute.xlu1 %2924  ;;  %v7953_v61 = vpop.permute.xlu0 %2589 }
 0x634   :  { %9549 = vst [vmem:[#allocation24_spill] sm:$0xff] %v7951_v33  ;;  %v2628_v0 = vsel %vm2615_vm9, %v2588_v48, %v7953_v61  ;;  %v2974_v48 = vld [vmem:[#allocation8 + $0x2] ss:$8 sm:$0xf] }
 0x635   :  { %3803 = vrot.lane.b32.xlu1 %v7864_v36, %s6286_s4  ;;  %3467 = vrot.lane.b32.xlu0 %v7934_v20, %s6285_s6  ;;  %v2724_v31 = vmul.f32 %v2656_v53, %v2628_v0  ;;  %v8016_v62 = vor.u32 %v2975_v46, %v2974_v48  ;;  %v3672_v48 = vld [vmem:[#allocation8 + $0x7] ss:$8 sm:$0xf] }
 0x636   :  { %v3673_v46 = vld [vmem:[#allocation8 + $0x7] ss:$8 sm:$0xf0] }
 0x637   :  { %v2929_v28 = vpop.permute.xlu1 %2928  ;;  %v2756_v44 = vpop.permute.xlu0 %2755  ;;  %v2998_v29 = vrot.slane %v8016_v62, %v9551_v58  ;;  %v2994_v53 = vrot.slane %v8016_v62, %v9552_v23 }
 0x638   :  { %v2800_v63 = vsel %vm2785_vm10, %v7930_v27, %v2756_v44  ;;  %v2799_v38 = vsel %vm2785_vm10, %v2756_v44, %v2758_v25 }
 0x639   :  { %v2893_v41 = vmul.f32 %v2819_v40, %v2800_v63  ;;  %3807 = vrot.lane.b32.xlu1 %v7860_v16, %s6286_s4  ;;  %3638 = vrot.lane.b32.xlu0 %v7934_v20, %s6289_s19  ;;  %v2894_v47 = vmul.f32 %v2823_v1, %v2799_v38  ;;  %v3168_v40 = vrot.slane %v8014_v50, %v9551_v58 }
 0x63b   :  { %v7987_v14 = vpop.permute.xlu1 %3095  ;;  %v7989_v60 = vpop.permute.xlu0 %2759  ;;  %v6018_v35 = vpack.c.bf16 %v2893_v41, %v2722_v18  ;;  %v6036_v30 = vpack.c.bf16 %v2894_v47, %v2723_v15 }
 0x63c   :  { %v2798_v19 = vsel %vm2785_vm10, %v2758_v25, %v7989_v60 }
 0x63d   :  { %v2895_v2 = vmul.f32 %v2827_v17, %v2798_v19  ;;  %2599 = vrot.lane.b32.xlu1 %v7934_v20, %s6284_s7  ;;  %3809 = vrot.lane.b32.xlu0 %v7934_v20, %s6286_s4 }
 0x63e   :  { %6019 = vmatprep.subr.bf16.mxu0 %v6018_v35 }
 0x63f   :  { %v3100_v42 = vpop.permute.xlu1 %3099  ;;  %v8000_v52 = vpop.permute.xlu0 %2926  ;;  %v6034_v13 = vpack.c.bf16 %v2895_v2, %v2724_v31 }
 0x640   :  { %9553 = vst [vmem:[#allocation33_spill] sm:$0xff] %v8000_v52  ;;  %v2970_v18 = vsel %vm2956_vm11, %v8000_v52, %v2929_v28 }
 0x641   :  { %2603 = vrot.lane.b32.xlu1 %v7936_v22, %s6284_s7  ;;  %3301 = vrot.lane.b32.xlu0 %v7936_v22, %s6278_s20  ;;  %v3065_v57 = vmul.f32 %v2994_v53, %v2970_v18 }
 0x642   :  { %6035 = vmatprep.subr.bf16.mxu1 %v6034_v13  ;;  %v3330_v13 = vld [vmem:[#allocation8 + $0x5] ss:$8 sm:$0xf] }
 0x643   :  { %6037 = vmatpush1.bf16.msra.mxu1 %v6036_v30  ;;  %v8006_v49 = vpop.permute.xlu1 %3281  ;;  %v8008_v43 = vpop.permute.xlu0 %2930  ;;  %v3331_v30 = vld [vmem:[#allocation8 + $0x5] ss:$8 sm:$0xf0] }
 0x644   :  { %9554 = vst [vmem:[#allocation25_spill] sm:$0xff] %v8006_v49  ;;  %v2969_v9 = vsel %vm2956_vm11, %v2929_v28, %v8008_v43 }
 0x645   :  { %2769 = vrot.lane.b32.xlu1 %v7934_v20, %s6287_s25  ;;  %3471 = vrot.lane.b32.xlu0 %v7936_v22, %s6285_s6  ;;  %v3066_v17 = vmul.f32 %v2998_v29, %v2969_v9  ;;  %v3501_v29 = vld [vmem:[#allocation8 + $0x6] ss:$8 sm:$0xf]  ;;  %v8089_v9 = vor.u32 %v3673_v46, %v3672_v48  ;;  %v3843_v48 = vld [vmem:[#allocation8 + $0x80] ss:$8 sm:$0xf] }
 0x646   :  { %v3844_v46 = vld [vmem:[#allocation8 + $0x80] ss:$8 sm:$0xf0] }
 0x647   :  { %v8018_v7 = vpop.permute.xlu1 %3455  ;;  %v8020_v25 = vpop.permute.xlu0 %3097  ;;  %v8135_v51 = vor.u32 %v3844_v46, %v3843_v48 }
 0x648   :  { %9555 = vst [vmem:[#allocation34_spill] sm:$0xff] %v8018_v7  ;;  %v3140_v44 = vsel %vm244_vm3, %v8020_v25, %v3100_v42 }
 0x649   :  { %2773 = vrot.lane.b32.xlu1 %v7936_v22, %s6287_s25  ;;  %2601 = vrot.lane.b32.xlu0 %v7944_v6, %s6284_s7  ;;  %v3235_v0 = vmul.f32 %v3164_v4, %v3140_v44  ;;  %v3502_v4 = vld [vmem:[#allocation8 + $0x6] ss:$8 sm:$0xf0] }
 0x64b   :  { %v8041_v1 = vpop.permute.xlu1 %3626  ;;  %v8043_v63 = vpop.permute.xlu0 %3101  ;;  %v6040_v28 = vpack.c.bf16 %v3235_v0, %v3065_v57  ;;  %v3696_v0 = vrot.slane %v8089_v9, %v9551_v58  ;;  %v3692_v57 = vrot.slane %v8089_v9, %v9552_v23 }
 0x64c   :  { %9556 = vst [vmem:[#allocation26_spill] sm:$0xff] %v8041_v1  ;;  %v3139_v41 = vsel %vm244_vm3, %v3100_v42, %v8043_v63 }
 0x64d   :  { %v3236_v38 = vmul.f32 %v3168_v40, %v3139_v41  ;;  %2940 = vrot.lane.b32.xlu1 %v7934_v20, %s6288_s23  ;;  %2605 = vrot.lane.b32.xlu0 %v7948_v21, %s6284_s7  ;;  %v8085_v40 = vor.u32 %v3331_v30, %v3330_v13  ;;  %v8095_v41 = vor.u32 %v3502_v4, %v3501_v29 }
 0x64f   :  { %v8055_v35 = vpop.permute.xlu1 %3622  ;;  %v8057_v34 = vpop.permute.xlu0 %3453  ;;  %v6038_v19 = vpack.c.bf16 %v3236_v38, %v3066_v17  ;;  %v3350_v18 = vrot.slane %v8085_v40, %v9552_v23  ;;  %v3354_v38 = vrot.slane %v8085_v40, %v9551_v58 }
 0x650   :  { %9557 = vst [vmem:[#allocation35_spill] sm:$0xff] %v8055_v35  ;;  %9558 = vst [vmem:[#allocation27_spill] sm:$0xff] %v8057_v34 }
 0x651   :  { %2944 = vrot.lane.b32.xlu1 %v7936_v22, %s6288_s23  ;;  %2771 = vrot.lane.b32.xlu0 %v7944_v6, %s6287_s25 }
 0x652   :  { %6039 = vmatprep.subr.bf16.mxu1 %v6038_v19  ;;  %v3525_v19 = vrot.slane %v8095_v41, %v9551_v58 }
 0x653   :  { %6041 = vmatpush1.bf16.msra.mxu1 %v6040_v28  ;;  %v8063_v31 = vpop.permute.xlu1 %3797  ;;  %v3458_v47 = vpop.permute.xlu0 %3457 }
 0x654   :  { %9559 = vst [vmem:[#allocation65_spill] sm:$0xff] %v8063_v31  ;;  %v3496_v3 = vsel %vm3483_vm12, %v8018_v7, %v3458_v47 }
 0x655   :  { %3111 = vrot.lane.b32.xlu1 %v7934_v20, %s6277_s1  ;;  %2775 = vrot.lane.b32.xlu0 %v7948_v21, %s6287_s25 }
 0x657   :  { %v8069_v2 = vpop.permute.xlu0 %3624  ;;  %v8071_v15 = vpop.permute.xlu1 %3283 }
 0x658   :  { %9560 = vst [vmem:[#allocation36_spill] sm:$0xff] %v8069_v2  ;;  %9561 = vst [vmem:[#allocation37_spill] sm:$0xff] %v8071_v15 }
 0x659   :  { %3115 = vrot.lane.b32.xlu1 %v7936_v22, %s6277_s1  ;;  %2942 = vrot.lane.b32.xlu0 %v7944_v6, %s6288_s23 }
 0x65b   :  { %v3629_v42 = vpop.permute.xlu0 %3628  ;;  %v3288_v37 = vpop.permute.xlu1 %3287 }
 0x65c   :  { %v3325_v17 = vsel %vm292_vm4, %v7916_v55, %v3288_v37 }
 0x65d   :  { %3299 = vrot.lane.b32.xlu1 %v7944_v6, %s6278_s20  ;;  %2946 = vrot.lane.b32.xlu0 %v7948_v21, %s6288_s23  ;;  %v3421_v30 = vmul.f32 %v3350_v18, %v3325_v17  ;;  %v3521_v17 = vrot.slane %v8095_v41, %v9552_v23 }
 0x65f   :  { %v8081_v12 = vpop.permute.xlu0 %3795  ;;  %v6044_v49 = vpack.c.bf16 %v3421_v30, %v7788_v56  ;;  %v3592_v48 = vmul.f32 %v3521_v17, %v3496_v3 }
 0x660   :  { %9562 = vst [vmem:[#allocation38_spill] sm:$0xff] %v8081_v12  ;;  %v3667_v12 = vsel %vm3654_vm13, %v8041_v1, %v3629_v42 }
 0x661   :  { %3303 = vrot.lane.b32.xlu1 %v7948_v21, %s6278_s20  ;;  %3113 = vrot.lane.b32.xlu0 %v7944_v6, %s6277_s1 }
 0x663   :  { %v8091_v44 = vpop.permute.xlu1 %3459  ;;  %v3800_v53 = vpop.permute.xlu0 %3799 }
 0x664   :  { %v3495_v29 = vsel %vm3483_vm12, %v3458_v47, %v8091_v44 }
 0x665   :  { %3469 = vrot.lane.b32.xlu1 %v7944_v6, %s6285_s6  ;;  %3117 = vrot.lane.b32.xlu0 %v7948_v21, %s6277_s1  ;;  %v3593_v35 = vmul.f32 %v3525_v19, %v3495_v29 }
 0x667   :  { %v8114_v28 = vpop.permute.xlu1 %3630  ;;  %v8116_v13 = vpop.permute.xlu0 %3289 }
 0x668   :  { %v3666_v4 = vsel %vm3654_vm13, %v3629_v42, %v8114_v28  ;;  %v3324_v5 = vsel %vm292_vm4, %v3288_v37, %v8116_v13  ;;  %v3763_v42 = vmul.f32 %v3692_v57, %v3667_v12  ;;  %v3863_v57 = vrot.slane %v8135_v51, %v9552_v23 }
 0x669   :  { %v3764_v26 = vmul.f32 %v3696_v0, %v3666_v4  ;;  %v3422_v18 = vmul.f32 %v3354_v38, %v3324_v5  ;;  %v3867_v5 = vrot.slane %v8135_v51, %v9551_v58  ;;  %v9563_v0 = vld [vmem:[#allocation13_spill] sm:$0xff] }
 0x66a   :  { %v8145_v38 = vsub.s32 4, %v9563_v0  ;;  %v6048_v12 = vpack.c.bf16 %v3763_v42, %v3592_v48 }
 0x66b   :  { %v8137_v34 = vpop.permute.xlu1 %3801  ;;  %v2592_v2 = vpop.permute.xlu0 %2591  ;;  %v6042_v37 = vpack.c.bf16 %v3422_v18, %v7792_v59  ;;  %v6046_v47 = vpack.c.bf16 %v3764_v26, %v3593_v35  ;;  %v3838_v26 = vsel %vm3825_vm14, %v8063_v31, %v3800_v53 }
 0x66c   :  { %v3837_v19 = vsel %vm3825_vm14, %v3800_v53, %v8137_v34  ;;  %v2660_v35 = vrot.slane %v7938_v24, %v8145_v38  ;;  %v2831_v29 = vrot.slane %v7946_v39, %v8145_v38  ;;  %v2627_v4 = vsel %vm2615_vm9, %v7953_v61, %v2592_v2 }
 0x66d   :  { %6043 = vmatprep.subr.bf16.mxu1 %v6042_v37  ;;  %v3935_v3 = vmul.f32 %v3867_v5, %v3837_v19  ;;  %v3934_v37 = vmul.f32 %v3863_v57, %v3838_v26  ;;  %v8183_v5 = vld [vmem:[#allocation6] sm:$0xff]  ;;  %v3002_v61 = vrot.slane %v8016_v62, %v8145_v38  ;;  %v3172_v19 = vrot.slane %v8014_v50, %v8145_v38 }
 0x66e   :  { %6045 = vmatpush1.bf16.msra.mxu1 %v6044_v49 }
 0x66f   :  { %v8150_v59 = vpop.permute.xlu1 %2932  ;;  %6047 = vmatprep.subr.bf16.mxu1 %v6046_v47  ;;  %v8152_v56 = vpop.permute.xlu0 %2595  ;;  %v8185_v47 = vmul.f32 %v2660_v35, %v2627_v4 }
 0x670   :  { %v8156_v30 = vpop.f32.mrb[12].mxu0 }
 0x671   :  { %9564 = vst [vmem:[#allocation39_spill] sm:$0xff] %v8156_v30  ;;  %v8163_v49 = vpop.f32.mrb[12].mxu1  ;;  %3305 = vrot.lane.b32.xlu0 %v8156_v30, %s6278_s20  ;;  %v8167_v46 = vpop.f32.mrb[13].mxu0  ;;  %9568 = vst [vmem:[#allocation43_spill] sm:$0xff] %v8185_v47 }
 0x672   :  { %9565 = vst [vmem:[#allocation40_spill] sm:$0xff] %v8163_v49  ;;  %9566 = vst [vmem:[#allocation41_spill] sm:$0xff] %v8167_v46  ;;  %v8174_v18 = vpop.f32.mrb[13].mxu1  ;;  %6049 = vmatpush1.bf16.msra.mxu1 %v6048_v12 }
 0x673   :  { %9567 = vst [vmem:[#allocation42_spill] sm:$0xff] %v8174_v18  ;;  %2613 = vrot.lane.b32.xlu1 %v8174_v18, %s6284_s7  ;;  %v8178_v53 = vpop.permute.xlu1 %2936  ;;  %4199 = vmatprep.subr.mxu1 %v3935_v3  ;;  %v2762_v17 = vpop.permute.xlu0 %2761 }
 0x674   :  { %v2797_v42 = vsel %vm2785_vm10, %v7989_v60, %v2762_v17  ;;  %v2968_v60 = vsel %vm2956_vm11, %v8008_v43, %v8150_v59 }
 0x675   :  { %v8189_v48 = vmul.f32 %v2831_v29, %v2797_v42  ;;  %2783 = vrot.lane.b32.xlu0 %v8174_v18, %s6287_s25  ;;  %v8212_v43 = vmul.f32 %v3002_v61, %v2968_v60  ;;  %v8246_v29 = vsub.s32 7, %v9563_v0 }
 0x676   :  { %4200 = vmatpush1.msra.mxu1 %v3934_v37 }
 0x677   :  { %9569 = vst [vmem:[#allocation44_spill] sm:$0xff] %v8189_v48  ;;  %2954 = vrot.lane.b32.xlu1 %v8174_v18, %s6288_s23  ;;  %v8203_v57 = vpop.permute.xlu1 %3103  ;;  %5395 = vmatmul.mubr.msk.f32.vlgmr.msra.gmra.mrb[14].mxu1 %vm497_vm8, %v8183_v5  ;;  %v2766_v26 = vpop.permute.xlu0 %2765  ;;  %9570 = vst [vmem:[#allocation45_spill] sm:$0xff] %v8212_v43  ;;  %v8255_v43 = vsub.s32 6, %v9563_v0  ;;  %v2672_v48 = vrot.slane %v7938_v24, %v8246_v29  ;;  %v2843_v15 = vrot.slane %v7946_v39, %v8246_v29 }
 0x678   :  { %v3138_v3 = vsel %vm244_vm3, %v8043_v63, %v8203_v57  ;;  %4389 = vmatprep.mubr.f32.mxu1 %v9537_v11 }
 0x679   :  { %v8214_v35 = vmul.f32 %v3172_v19, %v3138_v3  ;;  %3125 = vrot.lane.b32.xlu0 %v8174_v18, %s6277_s1  ;;  %v8235_v19 = vsub.s32 5, %v9563_v0  ;;  %9573 = vst [vmem:[#allocation48_spill] sm:$0xff] %v8255_v43  ;;  %v2839_v31 = vrot.slane %v7946_v39, %v8255_v43  ;;  %v2668_v55 = vrot.slane %v7938_v24, %v8255_v43 }
 0x67b   :  { %9571 = vst [vmem:[#allocation46_spill] sm:$0xff] %v8214_v35  ;;  %3473 = vrot.lane.b32.xlu1 %v7948_v21, %s6285_s6  ;;  %v8222_v4 = vpop.permute.xlu1 %3107  ;;  %v8224_v37 = vpop.permute.xlu0 %3293  ;;  %9572 = vst [vmem:[#allocation47_spill] sm:$0xff] %v8235_v19  ;;  %v2664_v12 = vrot.slane %v7938_v24, %v8235_v19  ;;  %v3533_v36 = vrot.slane %v8095_v41, %v8235_v19 }
 0x67d   :  { %3475 = vrot.lane.b32.xlu0 %v8156_v30, %s6285_s6 }
 0x67f   :  { %3640 = vrot.lane.b32.xlu1 %v7944_v6, %s6289_s19  ;;  %v2594_v63 = vpop.permute.xlu1 %2593  ;;  %v8230_v42 = vpop.permute.xlu0 %3463 }
 0x680   :  { %v2626_v61 = vsel %vm2615_vm9, %v2592_v2, %v2594_v63  ;;  %v2835_v2 = vrot.slane %v7946_v39, %v8235_v19 }
 0x681   :  { %3642 = vrot.lane.b32.xlu0 %v7936_v22, %s6289_s19  ;;  %v8267_v1 = vmul.f32 %v2664_v12, %v2626_v61  ;;  %v2625_v12 = vsel %vm2615_vm9, %v2594_v63, %v8152_v56  ;;  %v3358_v63 = vrot.slane %v8085_v40, %v8145_v38  ;;  %v3362_v61 = vrot.slane %v8085_v40, %v8235_v19 }
 0x683   :  { %3644 = vrot.lane.b32.xlu1 %v7948_v21, %s6289_s19  ;;  %v8241_v60 = vpop.permute.xlu1 %2597  ;;  %v8243_v3 = vpop.permute.xlu0 %3634  ;;  %9574 = vst [vmem:[#allocation49_spill] sm:$0xff] %v8267_v1 }
 0x685   :  { %3646 = vrot.lane.b32.xlu0 %v8156_v30, %s6289_s19 }
 0x687   :  { %2607 = vrot.lane.b32.xlu1 %v8156_v30, %s6284_s7  ;;  %v2764_v35 = vpop.permute.xlu1 %2763  ;;  %v8259_v47 = vpop.permute.xlu0 %3805 }
 0x688   :  { %v2796_v7 = vsel %vm2785_vm10, %v2762_v17, %v2764_v35  ;;  %v2795_v0 = vsel %vm2785_vm10, %v2764_v35, %v2766_v26  ;;  %v2624_v17 = vsel %vm2615_vm9, %v8152_v56, %v8241_v60 }
 0x689   :  { %v8271_v27 = vmul.f32 %v2835_v2, %v2796_v7  ;;  %2777 = vrot.lane.b32.xlu0 %v8156_v30, %s6287_s25  ;;  %v2898_v2 = vmul.f32 %v2839_v31, %v2795_v0  ;;  %v2728_v10 = vmul.f32 %v2672_v48, %v2624_v17  ;;  %v2727_v31 = vmul.f32 %v2668_v55, %v2625_v12 }
 0x68b   :  { %2611 = vrot.lane.b32.xlu1 %v8163_v49, %s6284_s7  ;;  %v8288_v7 = vpop.permute.xlu1 %2767  ;;  %v2935_v35 = vpop.permute.xlu0 %2934 }
 0x68c   :  { %v2794_v33 = vsel %vm2785_vm10, %v2766_v26, %v8288_v7  ;;  %v2967_v52 = vsel %vm2956_vm11, %v8150_v59, %v2935_v35  ;;  %v6068_v59 = vpack.c.bf16 %v2898_v2, %v2727_v31 }
 0x68d   :  { %v2899_v56 = vmul.f32 %v2843_v15, %v2794_v33  ;;  %2781 = vrot.lane.b32.xlu0 %v8163_v49, %s6287_s25  ;;  %v3006_v33 = vrot.slane %v8016_v62, %v8235_v19 }
 0x68f   :  { %3811 = vrot.lane.b32.xlu1 %v7944_v6, %s6286_s4  ;;  %v3292_v26 = vpop.permute.xlu1 %3291  ;;  %v8306_v0 = vpop.permute.xlu0 %2938  ;;  %v6066_v1 = vpack.c.bf16 %v2899_v56, %v2728_v10  ;;  %v3176_v10 = vrot.slane %v8014_v50, %v8235_v19  ;;  %v3180_v56 = vrot.slane %v8014_v50, %v8255_v43  ;;  %v8337_v31 = vmul.f32 %v3006_v33, %v2967_v52 }
 0x690   :  { %v3322_v15 = vsel %vm292_vm4, %v3292_v26, %v8224_v37  ;;  %v3323_v48 = vsel %vm292_vm4, %v8116_v13, %v3292_v26  ;;  %v2965_v52 = vsel %vm2956_vm11, %v8178_v53, %v8306_v0 }
 0x691   :  { %v8316_v55 = vmul.f32 %v3358_v63, %v3323_v48  ;;  %v8318_v17 = vmul.f32 %v3362_v61, %v3322_v15  ;;  %6067 = vmatprep.subr.bf16.mxu1 %v6066_v1  ;;  %3813 = vrot.lane.b32.xlu0 %v7936_v22, %s6286_s4  ;;  %v3014_v1 = vrot.slane %v8016_v62, %v8246_v29 }
 0x692   :  { %6069 = vmatpush1.bf16.msra.mxu1 %v6068_v59  ;;  %v3184_v15 = vrot.slane %v8014_v50, %v8246_v29  ;;  %v3010_v48 = vrot.slane %v8016_v62, %v8255_v43 }
 0x693   :  { %9575 = vst [vmem:[#allocation50_spill] sm:$0xff] %v8316_v55  ;;  %9576 = vst [vmem:[#allocation51_spill] sm:$0xff] %v8318_v17  ;;  %3815 = vrot.lane.b32.xlu1 %v7948_v21, %s6286_s4  ;;  %v3296_v2 = vpop.permute.xlu1 %3295  ;;  %v3106_v13 = vpop.permute.xlu0 %3105  ;;  %v3529_v55 = vrot.slane %v8095_v41, %v8145_v38 }
 0x694   :  { %v3137_v63 = vsel %vm244_vm3, %v8203_v57, %v3106_v13  ;;  %v3136_v26 = vsel %vm244_vm3, %v3106_v13, %v8222_v4  ;;  %v2966_v57 = vsel %vm2956_vm11, %v2935_v35, %v8178_v53  ;;  %v3070_v53 = vmul.f32 %v3014_v1, %v2965_v52 }
 0x695   :  { %v8342_v59 = vmul.f32 %v3176_v10, %v3137_v63  ;;  %3817 = vrot.lane.b32.xlu0 %v8156_v30, %s6286_s4  ;;  %v3239_v63 = vmul.f32 %v3180_v56, %v3136_v26  ;;  %v3069_v45 = vmul.f32 %v3010_v48, %v2966_v57  ;;  %v3366_v1 = vrot.slane %v8085_v40, %v8255_v43 }
 0x696   :  { %v3321_v48 = vsel %vm292_vm4, %v8224_v37, %v3296_v2  ;;  %v3370_v57 = vrot.slane %v8085_v40, %v8246_v29  ;;  %v2637_v37 = vld [vmem:[#allocation8 + $0x40] ss:$8 sm:$0xf0] }
 0x697   :  { %2948 = vrot.lane.b32.xlu1 %v8156_v30, %s6288_s23  ;;  %v3462_v33 = vpop.permute.xlu1 %3461  ;;  %v8359_v10 = vpop.permute.xlu0 %3109  ;;  %v6072_v26 = vpack.c.bf16 %v3239_v63, %v3069_v45 }
 0x698   :  { %v3493_v12 = vsel %vm3483_vm12, %v3462_v33, %v8230_v42  ;;  %v3135_v61 = vsel %vm244_vm3, %v8222_v4, %v8359_v10  ;;  %v3700_v4 = vrot.slane %v8089_v9, %v8145_v38  ;;  %v3494_v45 = vsel %vm3483_vm12, %v8091_v44, %v3462_v33 }
 0x699   :  { %v3240_v35 = vmul.f32 %v3184_v15, %v3135_v61  ;;  %3119 = vrot.lane.b32.xlu0 %v8156_v30, %s6277_s1  ;;  %v3704_v61 = vrot.slane %v8089_v9, %v8235_v19  ;;  %v8402_v33 = vmul.f32 %v3529_v55, %v3494_v45  ;;  %v8404_v63 = vmul.f32 %v3533_v36, %v3493_v12  ;;  %v2807_v36 = vld [vmem:[#allocation8 + $0x41] ss:$8 sm:$0xf] }
 0x69a   :  { %v3425_v55 = vmul.f32 %v3366_v1, %v3321_v48  ;;  %v3708_v1 = vrot.slane %v8089_v9, %v8255_v43  ;;  %v2808_v30 = vld [vmem:[#allocation8 + $0x41] ss:$8 sm:$0xf0] }
 0x69b   :  { %2952 = vrot.lane.b32.xlu1 %v8163_v49, %s6288_s23  ;;  %v3466_v13 = vpop.permute.xlu1 %3465  ;;  %v6070_v56 = vpack.c.bf16 %v3240_v35, %v3070_v53  ;;  %9577 = vst [vmem:[#allocation52_spill] sm:$0xff] %v8402_v33  ;;  %9578 = vst [vmem:[#allocation53_spill] sm:$0xff] %v8404_v63 }
 0x69d   :  { %3123 = vrot.lane.b32.xlu0 %v8163_v49, %s6277_s1  ;;  %6071 = vmatprep.subr.bf16.mxu1 %v6070_v56 }
 0x69e   :  { %6073 = vmatpush1.bf16.msra.mxu1 %v6072_v26 }
 0x69f   :  { %3479 = vrot.lane.b32.xlu1 %v8163_v49, %s6285_s6  ;;  %v3633_v15 = vpop.permute.xlu1 %3632 }
 0x6a0   :  { %v3664_v52 = vsel %vm3654_vm13, %v3633_v15, %v8243_v3  ;;  %v3665_v44 = vsel %vm3654_vm13, %v8114_v28, %v3633_v15  ;;  %v6076_v15 = vpack.c.bf16 %v3425_v55, %v7858_v8  ;;  %v3541_v8 = vrot.slane %v8095_v41, %v8246_v29 }
 0x6a1   :  { %v8406_v53 = vmul.f32 %v3700_v4, %v3665_v44  ;;  %v8408_v35 = vmul.f32 %v3704_v61, %v3664_v52  ;;  %3309 = vrot.lane.b32.xlu0 %v8163_v49, %s6278_s20  ;;  %v3537_v44 = vrot.slane %v8095_v41, %v8255_v43 }
 0x6a3   :  { %9579 = vst [vmem:[#allocation54_spill] sm:$0xff] %v8406_v53  ;;  %9580 = vst [vmem:[#allocation55_spill] sm:$0xff] %v8408_v35  ;;  %2779 = vrot.lane.b32.xlu1 %v8167_v46, %s6287_s25  ;;  %v3637_v28 = vpop.permute.xlu1 %3636  ;;  %v8416_v56 = vpop.permute.xlu0 %3297 }
 0x6a4   :  { %v3320_v12 = vsel %vm292_vm4, %v3296_v2, %v8416_v56  ;;  %v3663_v52 = vsel %vm3654_vm13, %v8243_v3, %v3637_v28  ;;  %v3492_v3 = vsel %vm3483_vm12, %v8230_v42, %v3466_v13  ;;  %v3883_v42 = vrot.slane %v8135_v51, %v8246_v29 }
 0x6a5   :  { %v3426_v26 = vmul.f32 %v3370_v57, %v3320_v12  ;;  %3650 = vrot.lane.b32.xlu0 %v8163_v49, %s6289_s19  ;;  %v3767_v12 = vmul.f32 %v3708_v1, %v3663_v52  ;;  %v3879_v1 = vrot.slane %v8135_v51, %v8255_v43 }
 0x6a7   :  { %3121 = vrot.lane.b32.xlu1 %v8167_v46, %s6277_s1  ;;  %v3804_v4 = vpop.permute.xlu1 %3803  ;;  %v8427_v61 = vpop.permute.xlu0 %3467  ;;  %v6074_v45 = vpack.c.bf16 %v3426_v26, %v7860_v16  ;;  %v3712_v16 = vrot.slane %v8089_v9, %v8246_v29 }
 0x6a8   :  { %9581 = vst [vmem:[#allocation56_spill] sm:$0xff] %v8427_v61  ;;  %v8436_v2 = vsel %vm3825_vm14, %v3804_v4, %v8259_v47  ;;  %v8441_v48 = vsel %vm3825_vm14, %v8137_v34, %v3804_v4  ;;  %v3491_v34 = vsel %vm3483_vm12, %v3466_v13, %v8427_v61  ;;  %v3596_v13 = vmul.f32 %v3537_v44, %v3492_v3 }
 0x6a9   :  { %9582 = vst [vmem:[#allocation57_spill] sm:$0xff] %v8436_v2  ;;  %9583 = vst [vmem:[#allocation58_spill] sm:$0xff] %v8441_v48  ;;  %6075 = vmatprep.subr.bf16.mxu1 %v6074_v45  ;;  %2609 = vrot.lane.b32.xlu0 %v8167_v46, %s6284_s7  ;;  %v3597_v4 = vmul.f32 %v3541_v8, %v3491_v34  ;;  %v3335_v48 = vld [vmem:[#allocation8 + $0x45] ss:$8 sm:$0xf0] }
 0x6aa   :  { %6077 = vmatpush1.bf16.msra.mxu1 %v6076_v15  ;;  %v2636_v15 = vld [vmem:[#allocation8 + $0x40] ss:$8 sm:$0xf] }
 0x6ab   :  { %3307 = vrot.lane.b32.xlu1 %v8167_v46, %s6278_s20  ;;  %v3808_v57 = vpop.permute.xlu1 %3807  ;;  %v8462_v55 = vpop.permute.xlu0 %3638  ;;  %v8477_v34 = vor.u32 %v2637_v37, %v2636_v15 }
 0x6ac   :  { %9584 = vst [vmem:[#allocation59_spill] sm:$0xff] %v8462_v55  ;;  %v3662_v26 = vsel %vm3654_vm13, %v3637_v28, %v8462_v55  ;;  %v3834_v3 = vsel %vm3825_vm14, %v8259_v47, %v3808_v57 }
 0x6ad   :  { %v3768_v45 = vmul.f32 %v3712_v16, %v3662_v26  ;;  %2950 = vrot.lane.b32.xlu0 %v8167_v46, %s6288_s23  ;;  %v6080_v16 = vpack.c.bf16 %v3767_v12, %v3596_v13  ;;  %v8490_v12 = vor.u32 %v2808_v30, %v2807_v36  ;;  %v2684_v33 = vrot.slane %v8477_v34, %v9552_v23 }
 0x6af   :  { %3311 = vrot.lane.b32.xlu1 %v8174_v18, %s6278_s20  ;;  %v2600_v28 = vpop.permute.xlu1 %2599  ;;  %v8475_v52 = vpop.permute.xlu0 %3809  ;;  %v6078_v8 = vpack.c.bf16 %v3768_v45, %v3597_v4  ;;  %v3938_v4 = vmul.f32 %v3879_v1, %v3834_v3  ;;  %v9586_v45 = vld [vmem:[#allocation16_spill] sm:$0xff] }
 0x6b0   :  { %9585 = vst [vmem:[#allocation60_spill] sm:$0xff] %v8475_v52  ;;  %v2623_v26 = vsel %vm2615_vm9, %v8241_v60, %v2600_v28  ;;  %v3833_v44 = vsel %vm3825_vm14, %v3808_v57, %v8475_v52  ;;  %v2676_v15 = vrot.slane %v8477_v34, %v9586_v45  ;;  %v2847_v47 = vrot.slane %v8490_v12, %v9586_v45  ;;  %v3148_v3 = vld [vmem:[#allocation8 + $0x43] ss:$8 sm:$0xf] }
 0x6b1   :  { %v3939_v61 = vmul.f32 %v3883_v42, %v3833_v44  ;;  %6079 = vmatprep.subr.bf16.mxu1 %v6078_v8  ;;  %3477 = vrot.lane.b32.xlu0 %v8167_v46, %s6285_s6  ;;  %v2979_v44 = vld [vmem:[#allocation8 + $0x42] ss:$8 sm:$0xf0]  ;;  %v2986_v20 = vrot.slane %v8016_v62, %v9586_v45 }
 0x6b2   :  { %6081 = vmatpush1.bf16.msra.mxu1 %v6080_v16  ;;  %v8512_v57 = vmul.f32 %v2676_v15, %v2623_v26  ;;  %v2978_v26 = vld [vmem:[#allocation8 + $0x42] ss:$8 sm:$0xf] }
 0x6b3   :  { %3648 = vrot.lane.b32.xlu1 %v8167_v46, %s6289_s19  ;;  %v2604_v60 = vpop.permute.xlu1 %2603  ;;  %4341 = vmatprep.subr.mxu1 %v3939_v61  ;;  %v8494_v37 = vpop.permute.xlu0 %3301  ;;  %v4702_v15 = vld [vmem:[%s9215_s13] sm:$0xff] }
 0x6b4   :  { %9587 = vst [vmem:[#allocation61_spill] sm:$0xff] %v8512_v57  ;;  %v2859_v57 = vrot.slane %v8490_v12, %v9551_v58 }
 0x6b5   :  { %3481 = vrot.lane.b32.xlu0 %v8174_v18, %s6285_s6 }
 0x6b6   :  { %4342 = vmatpush1.msra.mxu1 %v3938_v4  ;;  %v3149_v4 = vld [vmem:[#allocation8 + $0x43] ss:$8 sm:$0xf0] }
 0x6b7   :  { %3652 = vrot.lane.b32.xlu1 %v8174_v18, %s6289_s19  ;;  %v2770_v30 = vpop.permute.xlu1 %2769  ;;  %5397 = vmatmul.mubr.msk.f32.vlgmr.msra.gmra.mrb[16].mxu1 %vm497_vm8, %v8183_v5  ;;  %v8506_v36 = vpop.permute.xlu0 %3471 }
 0x6b8   :  { %v2793_v61 = vsel %vm2785_vm10, %v8288_v7, %v2770_v30  ;;  %4531 = vmatprep.mubr.f32.mxu1 %v9537_v11  ;;  %v4680_v7 = vld [vmem:[%s9214_s12] sm:$0xff] }
 0x6b9   :  { %v8514_v42 = vmul.f32 %v2847_v47, %v2793_v61  ;;  %3819 = vrot.lane.b32.xlu0 %v8167_v46, %s6286_s4  ;;  %v8532_v47 = vor.u32 %v2979_v44, %v2978_v26  ;;  %v8542_v46 = vor.u32 %v3149_v4, %v3148_v3  ;;  %v2855_v3 = vrot.slane %v8490_v12, %v9552_v23 }
 0x6bb   :  { %9588 = vst [vmem:[#allocation62_spill] sm:$0xff] %v8514_v42  ;;  %3821 = vrot.lane.b32.xlu1 %v8163_v49, %s6286_s4  ;;  %v2774_v1 = vpop.permute.xlu1 %2773  ;;  %v2602_v8 = vpop.permute.xlu0 %2601  ;;  %v4741_v49 = vld [vmem:[%s9217_s15] sm:$0xff]  ;;  %v3018_v26 = vrot.slane %v8532_v47, %v9586_v45 }
 0x6bc   :  { %v2622_v16 = vsel %vm2615_vm9, %v2600_v28, %v2602_v8  ;;  %v3334_v42 = vld [vmem:[#allocation8 + $0x45] ss:$8 sm:$0xf] }
 0x6bd   :  { %3823 = vrot.lane.b32.xlu0 %v8174_v18, %s6286_s4  ;;  %v2680_v18 = vrot.slane %v8477_v34, %v9550_v54  ;;  %v8586_v63 = vor.u32 %v3335_v48, %v3334_v42 }
 0x6bf   :  { %4683 = vperm.xlu1 %6171, %v4680_v7   ;;  %v2941_v61 = vpop.permute.xlu1 %2940  ;;  %v8534_v13 = vpop.permute.xlu0 %2605  ;;  %v2851_v7 = vrot.slane %v8490_v12, %v9550_v54  ;;  %v8558_v43 = vmul.f32 %v2680_v18, %v2622_v16  ;;  %v2621_v18 = vsel %vm2615_vm9, %v2602_v8, %v2604_v60  ;;  %v3374_v48 = vrot.slane %v8586_v63, %v9586_v45 }
 0x6c0   :  { %v2964_v28 = vsel %vm2956_vm11, %v8306_v0, %v2941_v61  ;;  %v2688_v0 = vrot.slane %v8477_v34, %v9551_v58  ;;  %v2731_v17 = vmul.f32 %v2684_v33, %v2621_v18 }
 0x6c1   :  { %4705 = vperm.xlu0 %6170, %v4702_v15   ;;  %v3188_v15 = vrot.slane %v8542_v46, %v9586_v45  ;;  %9589 = vst [vmem:[#allocation63_spill] sm:$0xff] %v8558_v43 }
 0x6c3   :  { %4744 = vperm.xlu1 %6171, %v4741_v49   ;;  %v2945_v44 = vpop.permute.xlu1 %2944  ;;  %v2772_v52 = vpop.permute.xlu0 %2771 }
 0x6c4   :  { %v2792_v4 = vsel %vm2785_vm10, %v2770_v30, %v2772_v52  ;;  %v2791_v55 = vsel %vm2785_vm10, %v2772_v52, %v2774_v1  ;;  %v2620_v30 = vsel %vm2615_vm9, %v2604_v60, %v8534_v13  ;;  %v8588_v60 = vmul.f32 %v3018_v26, %v2964_v28 }
 0x6c5   :  { %v8562_v49 = vmul.f32 %v2851_v7, %v2792_v4  ;;  %v2902_v4 = vmul.f32 %v2855_v3, %v2791_v55  ;;  %v2732_v8 = vmul.f32 %v2688_v0, %v2620_v30  ;;  %v3196_v28 = vrot.slane %v8542_v46, %v9552_v23 }
 0x6c6   :  { %v3200_v0 = vrot.slane %v8542_v46, %v9551_v58 }
 0x6c7   :  { %9590 = vst [vmem:[#allocation64_spill] sm:$0xff] %v8562_v49  ;;  %v8573_v16 = vpop.permute.xlu1 %3111  ;;  %v8575_v52 = vpop.permute.xlu0 %2775  ;;  %v6100_v43 = vpack.c.bf16 %v2902_v4, %v2731_v17 }
 0x6c8   :  { %v3134_v53 = vsel %vm244_vm3, %v8359_v10, %v8573_v16  ;;  %v2790_v2 = vsel %vm2785_vm10, %v2774_v1, %v8575_v52 }
 0x6c9   :  { %v8590_v35 = vmul.f32 %v3188_v15, %v3134_v53  ;;  %v2903_v19 = vmul.f32 %v2859_v57, %v2790_v2  ;;  %v3378_v53 = vrot.slane %v8586_v63, %v9550_v54  ;;  %v3026_v15 = vrot.slane %v8532_v47, %v9552_v23 }
 0x6cb   :  { %v3116_v3 = vpop.permute.xlu1 %3115  ;;  %v6098_v7 = vpack.c.bf16 %v2903_v19, %v2732_v8  ;;  %v2943_v10 = vpop.permute.xlu0 %2942 }
 0x6cc   :  { %v8596_v49 = vsel %vm2956_vm11, %v2941_v61, %v2943_v10  ;;  %v2962_v18 = vsel %vm2956_vm11, %v2943_v10, %v2945_v44 }
 0x6cd   :  { %6099 = vmatprep.subr.bf16.mxu1 %v6098_v7 }
 0x6ce   :  { %6101 = vmatpush1.bf16.msra.mxu1 %v6100_v43  ;;  %v3382_v43 = vrot.slane %v8586_v63, %v9552_v23 }
 0x6cf   :  { %v3300_v33 = vpop.permute.xlu1 %3299  ;;  %v8608_v17 = vpop.permute.xlu0 %2946 }
 0x6d0   :  { %v3318_v2 = vsel %vm292_vm4, %v3300_v33, %v8494_v37  ;;  %v3319_v19 = vsel %vm292_vm4, %v8416_v56, %v3300_v33  ;;  %v3030_v56 = vrot.slane %v8532_v47, %v9551_v58  ;;  %v2961_v30 = vsel %vm2956_vm11, %v2945_v44, %v8608_v17 }
 0x6d1   :  { %v8610_v57 = vmul.f32 %v3374_v48, %v3319_v19  ;;  %v8612_v42 = vmul.f32 %v3378_v53, %v3318_v2  ;;  %v3073_v33 = vmul.f32 %v3026_v15, %v2962_v18  ;;  %v2644_v15 = vrot.slane %v7938_v24, %v9586_v45 }
 0x6d2   :  { %v3074_v48 = vmul.f32 %v3030_v56, %v2961_v30  ;;  %v3160_v56 = vrot.slane %v8014_v50, %v9550_v54  ;;  %v2815_v18 = vrot.slane %v7946_v39, %v9586_v45  ;;  %v3346_v24 = vrot.slane %v8085_v40, %v9550_v54 }
 0x6d3   :  { %9591 = vst [vmem:[#allocation66_spill] sm:$0xff] %v8610_v57  ;;  %v8618_v61 = vpop.permute.xlu0 %3113  ;;  %v3304_v2 = vpop.permute.xlu1 %3303 }
 0x6d4   :  { %v3132_v26 = vsel %vm244_vm3, %v8618_v61, %v3116_v3  ;;  %v3317_v44 = vsel %vm292_vm4, %v8494_v37, %v3304_v2  ;;  %v3141_v37 = vsel %vm244_vm3, %v7987_v14, %v8020_v25 }
 0x6d5   :  { %v3243_v4 = vmul.f32 %v3196_v28, %v3132_v26  ;;  %v3429_v26 = vmul.f32 %v3382_v43, %v3317_v44  ;;  %v2990_v43 = vrot.slane %v8016_v62, %v9550_v54  ;;  %v9597_v44 = vld [vmem:[#allocation37_spill] sm:$0xff] }
 0x6d7   :  { %v8636_v7 = vpop.permute.xlu0 %3117  ;;  %v6104_v1 = vpack.c.bf16 %v3243_v4, %v3073_v33  ;;  %v8646_v10 = vpop.permute.xlu1 %3469  ;;  %v9593_v4 = vld [vmem:[#allocation30_spill] sm:$0xff] }
 0x6d8   :  { %v3131_v8 = vsel %vm244_vm3, %v3116_v3, %v8636_v7  ;;  %v3386_v3 = vrot.slane %v8586_v63, %v9551_v58 }
 0x6d9   :  { %v3244_v53 = vmul.f32 %v3200_v0, %v3131_v8 }
 0x6db   :  { %v6102_v19 = vpack.c.bf16 %v3244_v53, %v3074_v48  ;;  %v9594_v48 = vld [vmem:[#allocation33_spill] sm:$0xff]  ;;  %v9595_v53 = vld [vmem:[#allocation24_spill] sm:$0xff] }
 0x6dc   :  { %v2971_v25 = vsel %vm2956_vm11, %v9595_v53, %v9594_v48 }
 0x6dd   :  { %6103 = vmatprep.subr.bf16.mxu1 %v6102_v19  ;;  %v9596_v19 = vld [vmem:[#allocation21_spill] sm:$0xff] }
 0x6de   :  { %6105 = vmatpush1.bf16.msra.mxu1 %v6104_v1 }
 0x6e3   :  { %v8650_v28 = vpop.permute.xlu0 %3305 }
 0x6e4   :  { %9592 = vst [vmem:[#allocation67_spill] sm:$0xff] %v8650_v28  ;;  %v3316_v1 = vsel %vm292_vm4, %v3304_v2, %v8650_v28  ;;  %v3234_v2 = vmul.f32 %v3160_v56, %v3141_v37  ;;  %v3064_v56 = vmul.f32 %v2990_v43, %v2971_v25  ;;  %v3688_v37 = vrot.slane %v8089_v9, %v9550_v54 }
 0x6e5   :  { %v3430_v0 = vmul.f32 %v3386_v3, %v3316_v1  ;;  %v8663_v30 = vpop.permute.xlu1 %2613  ;;  %v3326_v3 = vsel %vm292_vm4, %v9597_v44, %v9596_v19  ;;  %v6108_v1 = vpack.c.bf16 %v3429_v26, %v7936_v22  ;;  %v3342_v26 = vrot.slane %v8085_v40, %v9586_v45  ;;  %v9602_v40 = vld [vmem:[#allocation36_spill] sm:$0xff] }
 0x6e6   :  { %v2631_v8 = vsel %vm2615_vm9, %v8663_v30, %v9593_v4  ;;  %v9598_v4 = vld [vmem:[#allocation23_spill] sm:$0xff]  ;;  %v3517_v19 = vrot.slane %v8095_v41, %v9550_v54 }
 0x6e7   :  { %v8679_v33 = vpop.permute.xlu0 %2783  ;;  %v6106_v39 = vpack.c.bf16 %v3430_v0, %v7948_v21  ;;  %v2721_v55 = vmul.f32 %v2644_v15, %v2631_v8  ;;  %v3156_v21 = vrot.slane %v8014_v50, %v9586_v45  ;;  %v9600_v15 = vld [vmem:[#allocation25_spill] sm:$0xff]  ;;  %v6022_v8 = vpack.c.bf16 %v3234_v2, %v3064_v56  ;;  %v9605_v56 = vld [vmem:[#allocation35_spill] sm:$0xff] }
 0x6e8   :  { %v2801_v48 = vsel %vm2785_vm10, %v8679_v33, %v9598_v4  ;;  %v3327_v50 = vsel %vm292_vm4, %v9600_v15, %v9597_v44  ;;  %v9604_v44 = vld [vmem:[#allocation27_spill] sm:$0xff]  ;;  %v3684_v2 = vrot.slane %v8089_v9, %v9586_v45  ;;  %v9607_v9 = vld [vmem:[#allocation22_spill] sm:$0xff] }
 0x6e9   :  { %v2892_v28 = vmul.f32 %v2815_v18, %v2801_v48  ;;  %v8693_v57 = vpop.permute.xlu1 %2954  ;;  %6107 = vmatprep.subr.bf16.mxu1 %v6106_v39  ;;  %v3420_v18 = vmul.f32 %v3346_v24, %v3326_v3  ;;  %v9603_v24 = vld [vmem:[#allocation34_spill] sm:$0xff] }
 0x6ea   :  { %9599 = vst [vmem:[#allocation68_spill] sm:$0xff] %v8693_v57  ;;  %v2972_v22 = vsel %vm2956_vm11, %v8693_v57, %v9595_v53  ;;  %6109 = vmatpush1.bf16.msra.mxu1 %v6108_v1  ;;  %v9601_v53 = vld [vmem:[#allocation26_spill] sm:$0xff]  ;;  %v3497_v3 = vsel %vm3483_vm12, %v9604_v44, %v9603_v24 }
 0x6eb   :  { %v6020_v62 = vpack.c.bf16 %v2892_v28, %v2721_v55  ;;  %v8705_v0 = vpop.permute.xlu0 %3125  ;;  %v3668_v25 = vsel %vm3654_vm13, %v9602_v40, %v9601_v53  ;;  %v3063_v55 = vmul.f32 %v2986_v20, %v2972_v22  ;;  %v3505_v1 = vld [vmem:[#allocation8 + $0x46] ss:$8 sm:$0xf]  ;;  %v3669_v22 = vsel %vm3654_vm13, %v9605_v56, %v9602_v40 }
 0x6ec   :  { %v3142_v43 = vsel %vm244_vm3, %v8705_v0, %v7987_v14  ;;  %v3419_v14 = vmul.f32 %v3342_v26, %v3327_v50  ;;  %v3506_v4 = vld [vmem:[#allocation8 + $0x46] ss:$8 sm:$0xf0]  ;;  %v3498_v53 = vsel %vm3483_vm12, %v9607_v9, %v9604_v44  ;;  %v3761_v15 = vmul.f32 %v3684_v2, %v3669_v22 }
 0x6ed   :  { %v3233_v28 = vmul.f32 %v3156_v21, %v3142_v43  ;;  %v3474_v39 = vpop.permute.xlu1 %3473  ;;  %6021 = vmatpush1.bf16.msra.mxu0 %v6020_v62  ;;  %v3513_v21 = vrot.slane %v8095_v41, %v9586_v45  ;;  %v3762_v62 = vmul.f32 %v3688_v37, %v3668_v25  ;;  %v3676_v43 = vld [vmem:[#allocation8 + $0x47] ss:$8 sm:$0xf]  ;;  %v8743_v57 = vor.u32 %v3506_v4, %v3505_v1 }
 0x6ee   :  { %6023 = vmatprep.subr.bf16.mxu0 %v6022_v8  ;;  %v3677_v8 = vld [vmem:[#allocation8 + $0x47] ss:$8 sm:$0xf0]  ;;  %v3855_v22 = vrot.slane %v8135_v51, %v9586_v45 }
 0x6ef   :  { %v6024_v48 = vpack.c.bf16 %v3233_v28, %v3063_v55  ;;  %v8727_v20 = vpop.permute.xlu0 %3475  ;;  %v9606_v26 = vld [vmem:[#allocation28_spill] sm:$0xff]  ;;  %v3591_v28 = vmul.f32 %v3517_v19, %v3497_v3  ;;  %v9608_v41 = vld [vmem:[#allocation19_spill] sm:$0xff]  ;;  %v8745_v37 = vor.u32 %v3677_v8, %v3676_v43  ;;  %v9609_v44 = vld [vmem:[#allocation65_spill] sm:$0xff]  ;;  %v3557_v3 = vrot.slane %v8743_v57, %v9551_v58 }
 0x6f0   :  { %v6026_v50 = vpack.c.bf16 %v3420_v18, %v9606_v26  ;;  %v6028_v24 = vpack.c.bf16 %v3419_v14, %v9608_v41  ;;  %v3590_v18 = vmul.f32 %v3513_v21, %v3498_v53  ;;  %v3859_v26 = vrot.slane %v8135_v51, %v9550_v54  ;;  %v9610_v56 = vld [vmem:[#allocation38_spill] sm:$0xff] }
 0x6f1   :  { %v8740_v55 = vpop.permute.xlu1 %3640  ;;  %6025 = vmatpush1.bf16.msra.mxu0 %v6024_v48  ;;  %v6030_v25 = vpack.c.bf16 %v3762_v62, %v3591_v28  ;;  %v3839_v19 = vsel %vm3825_vm14, %v9610_v56, %v9609_v44  ;;  %v3724_v14 = vrot.slane %v8745_v37, %v9552_v23  ;;  %v3728_v1 = vrot.slane %v8745_v37, %v9551_v58  ;;  %v9611_v62 = vld [vmem:[#allocation31_spill] sm:$0xff] }
 0x6f2   :  { %6027 = vmatprep.subr.bf16.mxu0 %v6026_v50  ;;  %v3487_v4 = vsel %vm3483_vm12, %v3474_v39, %v8727_v20  ;;  %v6032_v21 = vpack.c.bf16 %v3761_v15, %v3590_v18  ;;  %v3840_v43 = vsel %vm3825_vm14, %v9611_v62, %v9610_v56  ;;  %v3553_v8 = vrot.slane %v8743_v57, %v9552_v23 }
 0x6f3   :  { %v8747_v40 = vpop.permute.xlu0 %3642  ;;  %v3488_v53 = vsel %vm3483_vm12, %v8506_v36, %v3474_v39  ;;  %v2692_v28 = vrot.slane %v8477_v34, %v8145_v38  ;;  %v3933_v41 = vmul.f32 %v3859_v26, %v3839_v19  ;;  %v2863_v44 = vrot.slane %v8490_v12, %v8145_v38 }
 0x6f4   :  { %v3600_v62 = vmul.f32 %v3553_v8, %v3488_v53  ;;  %v3847_v8 = vld [vmem:[#allocation8 + $0xc0] ss:$8 sm:$0xf] }
 0x6f5   :  { %v3645_v2 = vpop.permute.xlu1 %3644  ;;  %6029 = vmatpush1.bf16.msra.mxu0 %v6028_v24  ;;  %v3601_v24 = vmul.f32 %v3557_v3, %v3487_v4  ;;  %v3848_v53 = vld [vmem:[#allocation8 + $0xc0] ss:$8 sm:$0xf0] }
 0x6f6   :  { %v3659_v48 = vsel %vm3654_vm13, %v8747_v40, %v3645_v2  ;;  %6031 = vmatprep.subr.bf16.mxu0 %v6030_v25 }
 0x6f7   :  { %v8775_v50 = vpop.permute.xlu0 %3646  ;;  %v3771_v18 = vmul.f32 %v3724_v14, %v3659_v48 }
 0x6f8   :  { %v3658_v15 = vsel %vm3654_vm13, %v3645_v2, %v8775_v50  ;;  %v3932_v2 = vmul.f32 %v3855_v22, %v3840_v43  ;;  %v9615_v22 = vld [vmem:[#allocation43_spill] sm:$0xff] }
 0x6f9   :  { %v3772_v56 = vmul.f32 %v3728_v1, %v3658_v15  ;;  %v8785_v25 = vpop.permute.xlu1 %2607  ;;  %6033 = vmatpush1.bf16.msra.mxu0 %v6032_v21  ;;  %v6112_v3 = vpack.c.bf16 %v3771_v18, %v3600_v62  ;;  %v9617_v15 = vpack.c.bf16 %v8342_v59, %v8337_v31  ;;  %v9619_v18 = vld [vmem:[#allocation45_spill] sm:$0xff]  ;;  %v9621_v59 = vld [vmem:[#allocation51_spill] sm:$0xff] }
 0x6fa   :  { %v2619_v39 = vsel %vm2615_vm9, %v8534_v13, %v8785_v25  ;;  %4128 = vmatprep.subr.mxu0 %v3933_v41  ;;  %v9612_v13 = vld [vmem:[#allocation49_spill] sm:$0xff]  ;;  %v8825_v41 = vor.u32 %v3848_v53, %v3847_v8  ;;  %v9625_v8 = vld [vmem:[#allocation50_spill] sm:$0xff]  ;;  %v9626_v53 = vld [vmem:[#allocation20_spill] sm:$0xff] }
 0x6fb   :  { %v8793_v9 = vpop.permute.xlu0 %2777  ;;  %v6110_v26 = vpack.c.bf16 %v3772_v56, %v3601_v24  ;;  %v8799_v14 = vmul.f32 %v2692_v28, %v2619_v39  ;;  %v9613_v48 = vpack.c.bf16 %v8271_v27, %v9612_v13  ;;  %v2875_v28 = vrot.slane %v8490_v12, %v8246_v29  ;;  %v9618_v24 = vld [vmem:[#allocation46_spill] sm:$0xff]  ;;  %v9622_v39 = vld [vmem:[#allocation29_spill] sm:$0xff]  ;;  %v9624_v13 = vld [vmem:[#allocation47_spill] sm:$0xff] }
 0x6fc   :  { %v2789_v19 = vsel %vm2785_vm10, %v8575_v52, %v8793_v9  ;;  %v9614_v52 = vld [vmem:[#allocation44_spill] sm:$0xff]  ;;  %v9620_v56 = vpack.c.bf16 %v9618_v24, %v9619_v18  ;;  %v3871_v24 = vrot.slane %v8135_v51, %v8145_v38  ;;  %v9628_v18 = vld [vmem:[#allocation55_spill] sm:$0xff] }
 0x6fd   :  { %v8801_v1 = vmul.f32 %v2863_v44, %v2789_v19  ;;  %v8803_v4 = vpop.permute.xlu1 %2611  ;;  %4129 = vmatpush1.msra.mxu0 %v3932_v2  ;;  %6111 = vmatprep.subr.bf16.mxu1 %v6110_v26  ;;  %v9616_v62 = vpack.c.bf16 %v9614_v52, %v9615_v22  ;;  %v9623_v2 = vpack.c.bf16 %v9621_v59, %v9622_v39 }
 0x6fe   :  { %5394 = vmatmul.mubr.msk.f32.vlgmr.msra.gmra.mrb[14].mxu0 %vm497_vm8, %v8183_v5  ;;  %6051 = vmatprep.subr.bf16.mxu0 %v9613_v48  ;;  %v2704_v26 = vrot.slane %v8477_v34, %v8246_v29  ;;  %v3875_v48 = vrot.slane %v8135_v51, %v9624_v13  ;;  %v2616_v52 = vsel %vm2615_vm9, %v8803_v4, %v8663_v30 }
 0x6ff   :  { %6113 = vmatpush1.bf16.msra.mxu1 %v6112_v3  ;;  %6053 = vmatpush1.bf16.msra.mxu0 %v9616_v62  ;;  %v8815_v43 = vpop.permute.xlu0 %2781  ;;  %v3899_v3 = vrot.slane %v8825_v41, %v9551_v58  ;;  %v3192_v30 = vrot.slane %v8542_v46, %v9550_v54  ;;  %v3133_v59 = vsel %vm244_vm3, %v8573_v16, %v8618_v61  ;;  %v9633_v16 = vld [vmem:[#allocation52_spill] sm:$0xff] }
 0x700   :  { %6055 = vmatprep.subr.bf16.mxu0 %v9617_v15  ;;  %4318 = vmatprep.mubr.f32.mxu0 %v9537_v11  ;;  %v2786_v31 = vsel %vm2785_vm10, %v8815_v43, %v8679_v33  ;;  %v3895_v33 = vrot.slane %v8825_v41, %v9552_v23  ;;  %v9627_v15 = vpack.c.bf16 %v9625_v8, %v9626_v53 }
 0x701   :  { %v8821_v27 = vpop.permute.xlu1 %3811  ;;  %v2907_v22 = vmul.f32 %v2875_v28, %v2786_v31  ;;  %v3034_v28 = vrot.slane %v8532_v47, %v8145_v38  ;;  %v2736_v51 = vmul.f32 %v2704_v26, %v2616_v52  ;;  %v3204_v8 = vrot.slane %v8542_v46, %v8145_v38 }
 0x702   :  { %v3242_v52 = vmul.f32 %v3192_v30, %v3133_v59  ;;  %v9636_v30 = vld [vmem:[#allocation64_spill] sm:$0xff] }
 0x703   :  { %6057 = vmatpush1.bf16.msra.mxu0 %v9620_v56  ;;  %v8830_v44 = vpop.permute.xlu0 %3813  ;;  %v9629_v56 = vld [vmem:[#allocation53_spill] sm:$0xff] }
 0x704   :  { %6059 = vmatprep.subr.bf16.mxu0 %v9623_v2  ;;  %v9630_v31 = vpack.c.bf16 %v9628_v18, %v9629_v56  ;;  %v9632_v56 = vld [vmem:[#allocation54_spill] sm:$0xff] }
 0x705   :  { %v3816_v19 = vpop.permute.xlu1 %3815  ;;  %v9634_v61 = vpack.c.bf16 %v9632_v56, %v9633_v16  ;;  %v3887_v56 = vrot.slane %v8825_v41, %v9586_v45  ;;  %v3891_v16 = vrot.slane %v8825_v41, %v9550_v54 }
 0x706   :  { %v3830_v62 = vsel %vm3825_vm14, %v8830_v44, %v3816_v19 }
 0x707   :  { %6061 = vmatpush1.bf16.msra.mxu0 %v9627_v15  ;;  %v8857_v58 = vpop.permute.xlu0 %3817  ;;  %v3022_v15 = vrot.slane %v8532_v47, %v9550_v54  ;;  %v3942_v21 = vmul.f32 %v3895_v33, %v3830_v62  ;;  %v9635_v33 = vld [vmem:[#allocation58_spill] sm:$0xff] }
 0x708   :  { %v3829_v23 = vsel %vm3825_vm14, %v3816_v19, %v8857_v58  ;;  %6063 = vmatprep.subr.bf16.mxu0 %v9630_v31  ;;  %v9631_v19 = vld [vmem:[#allocation57_spill] sm:$0xff]  ;;  %v3936_v62 = vmul.f32 %v3871_v24, %v9635_v33  ;;  %v3720_v24 = vrot.slane %v8745_v37, %v9550_v54 }
 0x709   :  { %v3943_v39 = vmul.f32 %v3899_v3, %v3829_v23  ;;  %v8875_v2 = vpop.permute.xlu1 %2948  ;;  %v3937_v53 = vmul.f32 %v3875_v48, %v9631_v19  ;;  %v6130_v3 = vpack.c.bf16 %v2907_v22, %v2736_v51  ;;  %v3072_v22 = vmul.f32 %v3022_v15, %v8596_v49  ;;  %v9640_v19 = vld [vmem:[#allocation61_spill] sm:$0xff] }
 0x70a   :  { %v2960_v18 = vsel %vm2956_vm11, %v8608_v17, %v8875_v2  ;;  %v3660_v49 = vsel %vm3654_vm13, %v8740_v55, %v8747_v40  ;;  %v3549_v15 = vrot.slane %v8743_v57, %v9550_v54  ;;  %v3489_v40 = vsel %vm3483_vm12, %v8646_v10, %v8506_v36 }
 0x70b   :  { %6065 = vmatpush1.bf16.msra.mxu0 %v9634_v61  ;;  %4483 = vmatprep.subr.mxu1 %v3943_v39  ;;  %v8889_v26 = vpop.permute.xlu0 %3119  ;;  %v8896_v23 = vmul.f32 %v3034_v28, %v2960_v18  ;;  %v9637_v28 = vld [vmem:[#allocation63_spill] sm:$0xff]  ;;  %v6086_v51 = vpack.c.bf16 %v3242_v52, %v3072_v22  ;;  %v3716_v18 = vrot.slane %v8745_v37, %v9586_v45 }
 0x70c   :  { %v3130_v48 = vsel %vm244_vm3, %v8636_v7, %v8889_v26  ;;  %4270 = vmatprep.subr.mxu0 %v3937_v53  ;;  %4484 = vmatpush1.msra.mxu1 %v3942_v21  ;;  %v9638_v59 = vpack.c.bf16 %v9636_v30, %v9637_v28  ;;  %v3046_v61 = vrot.slane %v8532_v47, %v8246_v29  ;;  %v9642_v52 = vld [vmem:[#allocation59_spill] sm:$0xff] }
 0x70d   :  { %v8898_v17 = vmul.f32 %v3204_v8, %v3130_v48  ;;  %v8900_v31 = vpop.permute.xlu1 %2952  ;;  %5399 = vmatmul.mubr.msk.f32.vlgmr.msra.gmra.mrb[18].mxu1 %vm497_vm8, %v8183_v5  ;;  %6131 = vmatprep.subr.bf16.mxu1 %v6130_v3  ;;  %v9639_v8 = vld [vmem:[#allocation62_spill] sm:$0xff]  ;;  %v3661_v48 = vsel %vm3654_vm13, %v9642_v52, %v8740_v55  ;;  %v3770_v33 = vmul.f32 %v3720_v24, %v3660_v49 }
 0x70e   :  { %4673 = vmatprep.mubr.f32.mxu1 %v9537_v11  ;;  %v9641_v53 = vpack.c.bf16 %v9639_v8, %v9640_v19  ;;  %v3216_v36 = vrot.slane %v8542_v46, %v8246_v29  ;;  %v9644_v30 = vpack.c.bf16 %v8590_v35, %v8588_v60  ;;  %v3208_v28 = vrot.slane %v8542_v46, %v9624_v13 }
 0x70f   :  { %v6120_v7 = vpack.c.bf16 %v8898_v17, %v8896_v23  ;;  %4271 = vmatpush1.msra.mxu0 %v3936_v62  ;;  %v8908_v21 = vpop.permute.xlu0 %3123  ;;  %v9643_v62 = vld [vmem:[#allocation48_spill] sm:$0xff]  ;;  %v2696_v24 = vrot.slane %v8477_v34, %v9624_v13  ;;  %v9646_v49 = vpack.c.bf16 %v8612_v42, %v7944_v6  ;;  %v3390_v60 = vrot.slane %v8586_v63, %v8145_v38 }
 0x710   :  { %5396 = vmatmul.mubr.msk.f32.vlgmr.msra.gmra.mrb[16].mxu0 %vm497_vm8, %v8183_v5  ;;  %6083 = vmatprep.subr.bf16.mxu0 %v9638_v59  ;;  %v3545_v5 = vrot.slane %v8743_v57, %v9586_v45  ;;  %v2867_v45 = vrot.slane %v8490_v12, %v9624_v13  ;;  %v2871_v54 = vrot.slane %v8490_v12, %v9643_v62  ;;  %v9645_v59 = vld [vmem:[#allocation56_spill] sm:$0xff] }
 0x711   :  { %v8921_v39 = vpop.permute.xlu1 %3479  ;;  %6085 = vmatpush1.bf16.msra.mxu0 %v9641_v53  ;;  %4460 = vmatprep.mubr.f32.mxu0 %v9537_v11  ;;  %v3212_v55 = vrot.slane %v8542_v46, %v9643_v62  ;;  %v3599_v12 = vmul.f32 %v3549_v15, %v3489_v40  ;;  %v2700_v35 = vrot.slane %v8477_v34, %v9643_v62  ;;  %v9647_v40 = vld [vmem:[#allocation68_spill] sm:$0xff] }
 0x712   :  { %6087 = vmatprep.subr.bf16.mxu0 %v6086_v51  ;;  %v3490_v51 = vsel %vm3483_vm12, %v9645_v59, %v8646_v10  ;;  %v3769_v8 = vmul.f32 %v3716_v18, %v3661_v48  ;;  %v3127_v19 = vsel %vm244_vm3, %v8908_v21, %v8705_v0  ;;  %v3394_v10 = vrot.slane %v8586_v63, %v9624_v13  ;;  %v9648_v59 = vld [vmem:[#allocation66_spill] sm:$0xff] }
 0x713   :  { %v8943_v3 = vpop.permute.xlu0 %3309  ;;  %v3038_v6 = vrot.slane %v8532_v47, %v9624_v13  ;;  %v3831_v34 = vsel %vm3825_vm14, %v8821_v27, %v8830_v44  ;;  %v6094_v42 = vpack.c.bf16 %v3770_v33, %v3599_v12  ;;  %v3042_v15 = vrot.slane %v8532_v47, %v9643_v62  ;;  %v9649_v44 = vld [vmem:[#allocation32_spill] sm:$0xff] }
 0x714   :  { %v3398_v0 = vrot.slane %v8586_v63, %v9643_v62  ;;  %v3598_v18 = vmul.f32 %v3545_v5, %v3490_v51  ;;  %v2957_v52 = vsel %vm2956_vm11, %v8900_v31, %v9647_v40  ;;  %v9650_v33 = vpack.c.bf16 %v9648_v59, %v9649_v44  ;;  %v9651_v40 = vld [vmem:[#allocation60_spill] sm:$0xff] }
 0x715   :  { %v2780_v22 = vpop.permute.xlu1 %2779  ;;  %6089 = vmatpush1.bf16.msra.mxu0 %v9644_v30  ;;  %v3402_v47 = vrot.slane %v8586_v63, %v8246_v29  ;;  %v3248_v12 = vmul.f32 %v3216_v36, %v3127_v19  ;;  %v3561_v51 = vrot.slane %v8743_v57, %v8145_v38  ;;  %v3832_v59 = vsel %vm3825_vm14, %v9651_v40, %v8821_v27  ;;  %v9653_v40 = vld [vmem:[#allocation39_spill] sm:$0xff] }
 0x716   :  { %6091 = vmatprep.subr.bf16.mxu0 %v9646_v49  ;;  %v2788_v48 = vsel %vm2785_vm10, %v8793_v9, %v2780_v22  ;;  %v2787_v5 = vsel %vm2785_vm10, %v2780_v22, %v8815_v43  ;;  %v3565_v9 = vrot.slane %v8743_v57, %v9624_v13  ;;  %v6096_v49 = vpack.c.bf16 %v3769_v8, %v3598_v18 }
 0x717   :  { %v8979_v53 = vpop.permute.xlu0 %3650  ;;  %v3941_v44 = vmul.f32 %v3891_v16, %v3831_v34  ;;  %v3736_v36 = vrot.slane %v8745_v37, %v9624_v13  ;;  %v3078_v19 = vmul.f32 %v3046_v61, %v2957_v52  ;;  %v2905_v43 = vmul.f32 %v2867_v45, %v2788_v48  ;;  %v9652_v45 = vld [vmem:[#allocation67_spill] sm:$0xff] }
 0x718   :  { %v9655_v46 = vpack.c.bf16 %v8801_v1, %v8799_v14  ;;  %v3573_v14 = vrot.slane %v8743_v57, %v8246_v29  ;;  %v3740_v1 = vrot.slane %v8745_v37, %v9643_v62 }
 0x719   :  { %v3122_v30 = vpop.permute.xlu1 %3121  ;;  %6093 = vmatpush1.bf16.msra.mxu0 %v9650_v33  ;;  %v3940_v33 = vmul.f32 %v3887_v56, %v3832_v59 }
 0x71a   :  { %6095 = vmatprep.subr.bf16.mxu0 %v6094_v42  ;;  %v2906_v42 = vmul.f32 %v2871_v54, %v2787_v5  ;;  %v3128_v27 = vsel %vm244_vm3, %v3122_v30, %v8908_v21  ;;  %v3129_v54 = vsel %vm244_vm3, %v8889_v26, %v3122_v30  ;;  %v3732_v30 = vrot.slane %v8745_v37, %v8145_v38 }
 0x71b   :  { %v2610_v63 = vpop.permute.xlu0 %2609  ;;  %v3247_v48 = vmul.f32 %v3212_v55, %v3128_v27  ;;  %v3246_v26 = vmul.f32 %v3208_v28, %v3129_v54 }
 0x71c   :  { %v2617_v22 = vsel %vm2615_vm9, %v2610_v63, %v8803_v4  ;;  %v2618_v8 = vsel %vm2615_vm9, %v8785_v25, %v2610_v63  ;;  %v6134_v25 = vpack.c.bf16 %v3248_v12, %v3078_v19 }
 0x71d   :  { %v2734_v16 = vmul.f32 %v2696_v24, %v2618_v8  ;;  %v2735_v34 = vmul.f32 %v2700_v35, %v2617_v22  ;;  %v3308_v18 = vpop.permute.xlu1 %3307  ;;  %6097 = vmatpush1.bf16.msra.mxu0 %v6096_v49  ;;  %v9657_v8 = vld [vmem:[#allocation41_spill] sm:$0xff] }
 0x71e   :  { %v3314_v61 = vsel %vm292_vm4, %v3308_v18, %v8943_v3  ;;  %v3315_v4 = vsel %vm292_vm4, %v9652_v45, %v3308_v18  ;;  %4412 = vmatprep.subr.mxu0 %v3941_v44 }
 0x71f   :  { %v6132_v21 = vpack.c.bf16 %v2906_v42, %v2735_v34  ;;  %v3431_v24 = vmul.f32 %v3390_v60, %v3315_v4  ;;  %v2951_v35 = vpop.permute.xlu0 %2950  ;;  %v6114_v52 = vpack.c.bf16 %v2905_v43, %v2734_v16  ;;  %v3432_v56 = vmul.f32 %v3394_v10, %v3314_v61 }
 0x720   :  { %v2958_v5 = vsel %vm2956_vm11, %v2951_v35, %v8900_v31  ;;  %v2959_v49 = vsel %vm2956_vm11, %v8875_v2, %v2951_v35  ;;  %v9654_v31 = vld [vmem:[#allocation25_spill] sm:$0xff]  ;;  %v9052_v2 = vld [vmem:[#allocation6] sm:$0xff]  ;;  %v3569_v43 = vrot.slane %v8743_v57, %v9643_v62  ;;  %v3907_v57 = vrot.slane %v8825_v41, %v9624_v13 }
 0x721   :  { %v6124_v12 = vpack.c.bf16 %v3431_v24, %v9653_v40  ;;  %v3076_v59 = vmul.f32 %v3038_v6, %v2959_v49  ;;  %v3077_v44 = vmul.f32 %v3042_v15, %v2958_v5  ;;  %v3312_v63 = vpop.permute.xlu1 %3311  ;;  %4413 = vmatpush1.msra.mxu0 %v3940_v33  ;;  %6133 = vmatpush1.bf16.msra.mxu1 %v6132_v21  ;;  %v9658_v33 = vld [vmem:[#allocation40_spill] sm:$0xff]  ;;  %v9660_v21 = vld [vmem:[#allocation35_spill] sm:$0xff] }
 0x722   :  { %v3313_v55 = vsel %vm292_vm4, %v8943_v3, %v3312_v63  ;;  %v3328_v60 = vsel %vm292_vm4, %v3312_v63, %v9654_v31  ;;  %5398 = vmatmul.mubr.msk.f32.vlgmr.msra.gmra.mrb[18].mxu0 %vm497_vm8, %v9052_v2  ;;  %6115 = vmatprep.subr.bf16.mxu0 %v6114_v52  ;;  %v6122_v42 = vpack.c.bf16 %v3432_v56, %v9657_v8  ;;  %v9661_v63 = vld [vmem:[#allocation31_spill] sm:$0xff] }
 0x723   :  { %v6136_v10 = vpack.c.bf16 %v3247_v48, %v3077_v44  ;;  %v3433_v6 = vmul.f32 %v3398_v0, %v3313_v55  ;;  %v3434_v15 = vmul.f32 %v3402_v47, %v3328_v60  ;;  %6135 = vmatprep.subr.bf16.mxu1 %v6134_v25  ;;  %6117 = vmatpush1.bf16.msra.mxu0 %v9655_v46  ;;  %v3478_v28 = vpop.permute.xlu0 %3477  ;;  %v9656_v47 = vld [vmem:[#allocation42_spill] sm:$0xff] }
 0x724   :  { %v3485_v3 = vsel %vm3483_vm12, %v3478_v28, %v8921_v39  ;;  %v6118_v19 = vpack.c.bf16 %v3246_v26, %v3076_v59  ;;  %4602 = vmatprep.mubr.f32.mxu0 %v9537_v11  ;;  %v3486_v27 = vsel %vm3483_vm12, %v8727_v20, %v3478_v28  ;;  %v3744_v20 = vrot.slane %v8745_v37, %v8246_v29  ;;  %v9659_v25 = vld [vmem:[#allocation22_spill] sm:$0xff] }
 0x725   :  { %v3649_v0 = vpop.permute.xlu1 %3648  ;;  %6137 = vmatpush1.bf16.msra.mxu1 %v6136_v10  ;;  %v6138_v22 = vpack.c.bf16 %v3434_v15, %v9656_v47  ;;  %v3603_v16 = vmul.f32 %v3565_v9, %v3485_v3  ;;  %v6140_v61 = vpack.c.bf16 %v3433_v6, %v9658_v33  ;;  %v3911_v56 = vrot.slane %v8825_v41, %v9643_v62  ;;  %v9138_v3 = vld [vmem:[%s9216_s14] sm:$0xff]  ;;  %s6290_s14 = smov [#allocation9]  }
 0x726   :  { %v3656_v34 = vsel %vm3654_vm13, %v3649_v0, %v8979_v53  ;;  %v3657_v18 = vsel %vm3654_vm13, %v8775_v50, %v3649_v0  ;;  %6119 = vmatprep.subr.bf16.mxu0 %v6118_v19  ;;  %v3915_v59 = vrot.slane %v8825_v41, %v8246_v29  ;;  %s5357_s8 = sshll.u32 %s6290_s14, 4  ;;  %s5358_s8 = int_to_ptr.vmem [resolvable:$true] %s5357_s8 }
 0x727   :  { %v3774_v45 = vmul.f32 %v3736_v36, %v3656_v34  ;;  %6139 = vmatprep.subr.bf16.mxu1 %v6138_v22  ;;  %6121 = vmatpush1.bf16.msra.mxu0 %v6120_v7  ;;  %v3482_v4 = vpop.permute.xlu0 %3481  ;;  %v3602_v36 = vmul.f32 %v3561_v51, %v3486_v27  ;;  %v3773_v54 = vmul.f32 %v3732_v30, %v3657_v18  ;;  %s6239_s9 = scalar_lea.vmem %s5358_s8, 2048  ;;  %p6244_p11 = scmp.lt.s32.totalorder %s5358_s8, %s5358_s8 }
 0x728   :  { %v3484_v9 = vsel %vm3483_vm12, %v8921_v39, %v3482_v4  ;;  %v3499_v50 = vsel %vm3483_vm12, %v3482_v4, %v9659_v25  ;;  %6123 = vmatprep.subr.bf16.mxu0 %v6122_v42  ;;  %v3903_v51 = vrot.slane %v8825_v41, %v8145_v38  ;;  %p6240_p10 = scmp.ne.s32.totalorder %s5358_s8, %s6239_s9  ;;  %p6245_p12 = scmp.lt.s32.totalorder %s6239_s9, %s6239_s9 }
 0x729   :  { %v3604_v23 = vmul.f32 %v3569_v43, %v3484_v9  ;;  %v3605_v17 = vmul.f32 %v3573_v14, %v3499_v50  ;;  %v3653_v7 = vpop.permute.xlu1 %3652  ;;  %6141 = vmatpush1.bf16.msra.mxu1 %v6140_v61  ;;  %v6126_v24 = vpack.c.bf16 %v3774_v45, %v3603_v16 }
 0x72a   :  { %v3655_v37 = vsel %vm3654_vm13, %v8979_v53, %v3653_v7  ;;  %v3670_v39 = vsel %vm3654_vm13, %v3653_v7, %v9660_v21  ;;  %v6128_v53 = vpack.c.bf16 %v3773_v54, %v3602_v36  ;;  %p6246_p13 = por %p6245_p12, %p6244_p11 }
 0x72b   :  { %v3775_v35 = vmul.f32 %v3740_v1, %v3655_v37  ;;  %v3776_v52 = vmul.f32 %v3744_v20, %v3670_v39  ;;  %6125 = vmatpush1.bf16.msra.mxu0 %v6124_v12  ;;  %v3820_v48 = vpop.permute.xlu0 %3819 }
 0x72c   :  { %6127 = vmatprep.subr.bf16.mxu0 %v6126_v24  ;;  %v3828_v12 = vsel %vm3825_vm14, %v8857_v58, %v3820_v48  ;;  %p6247_p0 = pnand %p6246_p13, %p6240_p10 }
 0x72d   :  { %v6144_v5 = vpack.c.bf16 %v3775_v35, %v3604_v23  ;;  %v3822_v49 = vpop.permute.xlu1 %3821  ;;  %v6142_v40 = vpack.c.bf16 %v3776_v52, %v3605_v17  ;;  %v3944_v29 = vmul.f32 %v3903_v51, %v3828_v12 }
 0x72e   :  { %v3827_v13 = vsel %vm3825_vm14, %v3820_v48, %v3822_v49 }
 0x72f   :  { %v3945_v44 = vmul.f32 %v3907_v57, %v3827_v13  ;;  %6143 = vmatprep.subr.bf16.mxu1 %v6142_v40  ;;  %6129 = vmatpush1.bf16.msra.mxu0 %v6128_v53  ;;  %v3824_v38 = vpop.permute.xlu0 %3823 }
 0x730   :  { %6145 = vmatpush1.bf16.msra.mxu1 %v6144_v5  ;;  %v3826_v62 = vsel %vm3825_vm14, %v3822_v49, %v3824_v38  ;;  %v3841_v26 = vsel %vm3825_vm14, %v3824_v38, %v9661_v63 }
 0x731   :  { %v3946_v41 = vmul.f32 %v3911_v56, %v3826_v62  ;;  %v3947_v55 = vmul.f32 %v3915_v59, %v3841_v26  ;;  %4554 = vmatprep.subr.mxu0 %v3945_v44 }
 0x733   :  { %4555 = vmatpush1.msra.mxu0 %v3944_v29  ;;  %4625 = vmatprep.subr.mxu1 %v3947_v55 }
 0x734   :  { %5400 = vmatmul.mubr.msk.f32.vlgmr.msra.gmra.mrb[20].mxu0 %vm497_vm8, %v9052_v2  ;;  %4626 = vmatpush1.msra.mxu1 %v3946_v41 }
 0x735   :  { %5401 = vmatmul.mubr.msk.f32.vlgmr.msra.gmra.mrb[20].mxu1 %vm497_vm8, %v9052_v2  ;;  %4815 = vmatprep.mubr.f32.mxu0 %v9537_v11 }
 0x736   :  { %4886 = vmatprep.mubr.f32.mxu1 %v9537_v11 }
 0x73e   :  { %v9127_v58 = vpop.permute.xlu1 %4683 }
 0x740   :  { %v9130_v10 = vpop.permute.xlu0 %4705 }
 0x74a   :  { %v4249_v32 = vpop.f32.mrb[14].mxu1 }
 0x74b   :  { %v4688_v31 = vmul.f32 %v9127_v58, %v4249_v32  ;;  %v4251_v60 = vpop.f32.mrb[15].mxu1 }
 0x74c   :  { %v4689_v6 = vmul.f32 %v9127_v58, %v4251_v60 }
 0x74d   :  { %v4710_v15 = vadd.f32 %v9130_v10, %v4688_v31 }
 0x74e   :  { %v4711_v46 = vadd.f32 %v9130_v10, %v4689_v6 }
 0x74f   :  { %v4726_v2 = vmax.f32 %v4710_v15, 0.0 }
 0x750   :  { %v4727_v28 = vmax.f32 %v4711_v46, 0.0 }
 0x752   :  { %4822 = vmatprep.subr.mxu1 %v4727_v28 }
 0x753   :  { %4823 = vmatpush1.msra.mxu1 %v4726_v2 }
 0x754   :  { %5403 = vmatmul.mubr.msk.f32.vlgmr.msra.gmra.mrb[22].mxu1 %vm4747_vm15, %v9138_v3 }
 0x755   :  { %5028 = vmatprep.mubr.f32.mxu1 %v9537_v11 }
 0x78a   :  { %v4391_v30 = vpop.f32.mrb[16].mxu1 }
 0x78b   :  { %v4692_v19 = vmul.f32 %v9127_v58, %v4391_v30  ;;  %v4393_v43 = vpop.f32.mrb[17].mxu1 }
 0x78c   :  { %v4693_v0 = vmul.f32 %v9127_v58, %v4393_v43 }
 0x78d   :  { %v4714_v47 = vadd.f32 %v9130_v10, %v4692_v19 }
 0x78e   :  { %v4715_v22 = vadd.f32 %v9130_v10, %v4693_v0 }
 0x78f   :  { %v4730_v1 = vmax.f32 %v4714_v47, 0.0 }
 0x790   :  { %v4731_v14 = vmax.f32 %v4715_v22, 0.0 }
 0x792   :  { %4964 = vmatprep.subr.mxu1 %v4731_v14 }
 0x793   :  { %4965 = vmatpush1.msra.mxu1 %v4730_v1 }
 0x794   :  { %5405 = vmatmul.mubr.msk.f32.vlgmr.msra.gmra.mrb[24].mxu1 %vm4747_vm15, %v9138_v3 }
 0x795   :  { %5170 = vmatprep.mubr.f32.mxu1 %v9537_v11 }
 0x7d1   :  { %v4178_v8 = vpop.f32.mrb[14].mxu0 }
 0x7d2   :  { %v4686_v42 = vmul.f32 %v9127_v58, %v4178_v8  ;;  %v4180_v27 = vpop.f32.mrb[15].mxu0 }
 0x7d3   :  { %v4687_v16 = vmul.f32 %v9127_v58, %v4180_v27 }
 0x7d4   :  { %v4708_v34 = vadd.f32 %v9130_v10, %v4686_v42 }
 0x7d5   :  { %v4709_v18 = vadd.f32 %v9130_v10, %v4687_v16 }
 0x7d6   :  { %v4724_v61 = vmax.f32 %v4708_v34, 0.0 }
 0x7d7   :  { %v4725_v33 = vmax.f32 %v4709_v18, 0.0 }
 0x7d9   :  { %4751 = vmatprep.subr.mxu0 %v4725_v33 }
 0x7da   :  { %4752 = vmatpush1.msra.mxu0 %v4724_v61 }
 0x7db   :  { %5402 = vmatmul.mubr.msk.f32.vlgmr.msra.gmra.mrb[22].mxu0 %vm4747_vm15, %v9138_v3 }
 0x7dc   :  { %4957 = vmatprep.mubr.f32.mxu0 %v9537_v11 }
 0x7e0   :  { %v4533_v45 = vpop.f32.mrb[18].mxu1 }
 0x7e1   :  { %v4696_v4 = vmul.f32 %v9127_v58, %v4533_v45  ;;  %v4535_v20 = vpop.f32.mrb[19].mxu1 }
 0x7e2   :  { %v4697_v9 = vmul.f32 %v9127_v58, %v4535_v20 }
 0x7e3   :  { %v4718_v25 = vadd.f32 %v9130_v10, %v4696_v4  ;;  %v4320_v50 = vpop.f32.mrb[16].mxu0 }
 0x7e4   :  { %v4719_v36 = vadd.f32 %v9130_v10, %v4697_v9  ;;  %v4690_v54 = vmul.f32 %v9127_v58, %v4320_v50  ;;  %v4322_v23 = vpop.f32.mrb[17].mxu0 }
 0x7e5   :  { %v4691_v17 = vmul.f32 %v9127_v58, %v4322_v23  ;;  %v4734_v21 = vmax.f32 %v4718_v25, 0.0 }
 0x7e6   :  { %v4735_v7 = vmax.f32 %v4719_v36, 0.0  ;;  %v4712_v37 = vadd.f32 %v9130_v10, %v4690_v54 }
 0x7e7   :  { %v4713_v39 = vadd.f32 %v9130_v10, %v4691_v17 }
 0x7e8   :  { %5106 = vmatprep.subr.mxu1 %v4735_v7  ;;  %v4728_v35 = vmax.f32 %v4712_v37, 0.0 }
 0x7e9   :  { %v4729_v24 = vmax.f32 %v4713_v39, 0.0  ;;  %5107 = vmatpush1.msra.mxu1 %v4734_v21 }
 0x7ea   :  { %5407 = vmatmul.mubr.msk.f32.vlgmr.msra.gmra.mrb[26].mxu1 %vm4747_vm15, %v9138_v3 }
 0x7eb   :  { %4893 = vmatprep.subr.mxu0 %v4729_v24  ;;  %5312 = vmatprep.mubr.f32.mxu1 %v9537_v11 }
 0x7ec   :  { %4894 = vmatpush1.msra.mxu0 %v4728_v35 }
 0x7ed   :  { %5404 = vmatmul.mubr.msk.f32.vlgmr.msra.gmra.mrb[24].mxu0 %vm4747_vm15, %v9138_v3 }
 0x7ee   :  { %5099 = vmatprep.mubr.f32.mxu0 %v9537_v11 }
 0x7f5   :  { %v4462_v52 = vpop.f32.mrb[18].mxu0 }
 0x7f6   :  { %v4694_v48 = vmul.f32 %v9127_v58, %v4462_v52  ;;  %v4464_v57 = vpop.f32.mrb[19].mxu0 }
 0x7f7   :  { %v4695_v51 = vmul.f32 %v9127_v58, %v4464_v57 }
 0x7f8   :  { %v4716_v56 = vadd.f32 %v9130_v10, %v4694_v48 }
 0x7f9   :  { %v4717_v53 = vadd.f32 %v9130_v10, %v4695_v51 }
 0x7fa   :  { %v4732_v49 = vmax.f32 %v4716_v56, 0.0 }
 0x7fb   :  { %v4733_v5 = vmax.f32 %v4717_v53, 0.0 }
 0x7fd   :  { %5035 = vmatprep.subr.mxu0 %v4733_v5 }
 0x7fe   :  { %5036 = vmatpush1.msra.mxu0 %v4732_v49 }
 0x7ff   :  { %5406 = vmatmul.mubr.msk.f32.vlgmr.msra.gmra.mrb[26].mxu0 %vm4747_vm15, %v9138_v3 }
 0x800   :  { %5241 = vmatprep.mubr.f32.mxu0 %v9537_v11 }
 0x807   :  { %v4604_v40 = vpop.f32.mrb[20].mxu0 }
 0x808   :  { %v4698_v59 = vmul.f32 %v9127_v58, %v4604_v40  ;;  %v4606_v12 = vpop.f32.mrb[21].mxu0  ;;  %v4675_v13 = vpop.f32.mrb[20].mxu1 }
 0x809   :  { %v4699_v44 = vmul.f32 %v9127_v58, %v4606_v12  ;;  %v4700_v38 = vmul.f32 %v9127_v58, %v4675_v13  ;;  %v4677_v62 = vpop.f32.mrb[21].mxu1 }
 0x80a   :  { %v4720_v63 = vadd.f32 %v9130_v10, %v4698_v59  ;;  %v4701_v26 = vmul.f32 %v9127_v58, %v4677_v62  ;;  %v4745_v58 = vpop.permute.xlu1 %4744 }
 0x80b   :  { %v4721_v29 = vadd.f32 %v9130_v10, %v4699_v44  ;;  %v4722_v41 = vadd.f32 %v9130_v10, %v4700_v38 }
 0x80c   :  { %v4723_v11 = vadd.f32 %v9130_v10, %v4701_v26  ;;  %v4736_v32 = vmax.f32 %v4720_v63, 0.0 }
 0x80d   :  { %v4737_v55 = vmax.f32 %v4721_v29, 0.0  ;;  %v4738_v60 = vmax.f32 %v4722_v41, 0.0 }
 0x80e   :  { %v4739_v31 = vmax.f32 %v4723_v11, 0.0 }
 0x80f   :  { %5177 = vmatprep.subr.mxu0 %v4737_v55 }
 0x810   :  { %5178 = vmatpush1.msra.mxu0 %v4736_v32  ;;  %5248 = vmatprep.subr.mxu1 %v4739_v31 }
 0x811   :  { %5408 = vmatmul.mubr.msk.f32.vlgmr.msra.gmra.mrb[28].mxu0 %vm4747_vm15, %v9138_v3  ;;  %5249 = vmatpush1.msra.mxu1 %v4738_v60 }
 0x812   :  { %5409 = vmatmul.mubr.msk.f32.vlgmr.msra.gmra.mrb[28].mxu1 %vm4747_vm15, %v9138_v3 }
 0x827   :  { %v4888_v6 = vpop.f32.mrb[22].mxu1 }
 0x828   :  { %v4889_v15 = vadd.f32 %v4888_v6, %v4745_v58  ;;  %v4890_v46 = vpop.f32.mrb[23].mxu1 }
 0x829   :  { %v4891_v28 = vadd.f32 %v4890_v46, %v4745_v58 }
 0x82a   :  { %v5321_v10 = vmax.f32 %v4889_v15, 0.0 }
 0x82b   :  { %v5322_v2 = vmax.f32 %v4891_v28, 0.0 }
 0x82c   :  { %5337 = vst [vmem:[#allocation9 + $0x10] sm:$0xff] %v5321_v10 }
 0x82d   :  { %5338 = vst [vmem:[#allocation9 + $0x18] sm:$0xff] %v5322_v2 }
 0x867   :  { %v5030_v30 = vpop.f32.mrb[24].mxu1 }
 0x868   :  { %v5031_v19 = vadd.f32 %v5030_v30, %v4745_v58  ;;  %v5032_v43 = vpop.f32.mrb[25].mxu1 }
 0x869   :  { %v5033_v0 = vadd.f32 %v5032_v43, %v4745_v58 }
 0x86a   :  { %v5325_v47 = vmax.f32 %v5031_v19, 0.0 }
 0x86b   :  { %v5326_v22 = vmax.f32 %v5033_v0, 0.0 }
 0x86c   :  { %5341 = vst [vmem:[#allocation9 + $0x30] sm:$0xff] %v5325_v47 }
 0x86d   :  { %5342 = vst [vmem:[#allocation9 + $0x38] sm:$0xff] %v5326_v22 }
 0x8ae   :  { %v4817_v14 = vpop.f32.mrb[22].mxu0 }
 0x8af   :  { %v4818_v1 = vadd.f32 %v4817_v14, %v4745_v58  ;;  %v4819_v3 = vpop.f32.mrb[23].mxu0 }
 0x8b0   :  { %v4820_v8 = vadd.f32 %v4819_v3, %v4745_v58 }
 0x8b1   :  { %v5319_v42 = vmax.f32 %v4818_v1, 0.0 }
 0x8b2   :  { %v5320_v27 = vmax.f32 %v4820_v8, 0.0 }
 0x8b3   :  { %5335 = vst [vmem:[#allocation9] sm:$0xff] %v5319_v42 }
 0x8b4   :  { %5336 = vst [vmem:[#allocation9 + $0x8] sm:$0xff] %v5320_v27 }
 0x8bd   :  { %v5172_v16 = vpop.f32.mrb[26].mxu1 }
 0x8be   :  { %v5173_v34 = vadd.f32 %v5172_v16, %v4745_v58  ;;  %v5174_v18 = vpop.f32.mrb[27].mxu1 }
 0x8bf   :  { %v5175_v33 = vadd.f32 %v5174_v18, %v4745_v58 }
 0x8c0   :  { %v5329_v61 = vmax.f32 %v5173_v34, 0.0  ;;  %v4959_v45 = vpop.f32.mrb[24].mxu0 }
 0x8c1   :  { %v5330_v4 = vmax.f32 %v5175_v33, 0.0  ;;  %v4960_v20 = vadd.f32 %v4959_v45, %v4745_v58  ;;  %v4961_v9 = vpop.f32.mrb[25].mxu0 }
 0x8c2   :  { %5345 = vst [vmem:[#allocation9 + $0x50] sm:$0xff] %v5329_v61  ;;  %v4962_v25 = vadd.f32 %v4961_v9, %v4745_v58 }
 0x8c3   :  { %5346 = vst [vmem:[#allocation9 + $0x58] sm:$0xff] %v5330_v4  ;;  %v5323_v50 = vmax.f32 %v4960_v20, 0.0 }
 0x8c4   :  { %v5324_v36 = vmax.f32 %v4962_v25, 0.0 }
 0x8c5   :  { %5339 = vst [vmem:[#allocation9 + $0x20] sm:$0xff] %v5323_v50 }
 0x8c6   :  { %5340 = vst [vmem:[#allocation9 + $0x28] sm:$0xff] %v5324_v36 }
 0x8d2   :  { %v5101_v54 = vpop.f32.mrb[26].mxu0 }
 0x8d3   :  { %v5102_v23 = vadd.f32 %v5101_v54, %v4745_v58  ;;  %v5103_v17 = vpop.f32.mrb[27].mxu0 }
 0x8d4   :  { %v5104_v7 = vadd.f32 %v5103_v17, %v4745_v58 }
 0x8d5   :  { %v5327_v37 = vmax.f32 %v5102_v23, 0.0 }
 0x8d6   :  { %v5328_v21 = vmax.f32 %v5104_v7, 0.0 }
 0x8d7   :  { %5343 = vst [vmem:[#allocation9 + $0x40] sm:$0xff] %v5327_v37 }
 0x8d8   :  { %5344 = vst [vmem:[#allocation9 + $0x48] sm:$0xff] %v5328_v21 }
 0x8e4   :  { %v5243_v39 = vpop.f32.mrb[28].mxu0 }
 0x8e5   :  { %v5244_v24 = vadd.f32 %v5243_v39, %v4745_v58  ;;  %v5245_v35 = vpop.f32.mrb[29].mxu0  ;;  %v5314_v52 = vpop.f32.mrb[28].mxu1 }
 0x8e6   :  { %v5246_v48 = vadd.f32 %v5245_v35, %v4745_v58  ;;  %v5315_v57 = vadd.f32 %v5314_v52, %v4745_v58  ;;  %v5316_v51 = vpop.f32.mrb[29].mxu1 }
 0x8e7   :  { %v5331_v56 = vmax.f32 %v5244_v24, 0.0  ;;  %v5317_v53 = vadd.f32 %v5316_v51, %v4745_v58 }
 0x8e8   :  { %v5332_v5 = vmax.f32 %v5246_v48, 0.0  ;;  %v5333_v49 = vmax.f32 %v5315_v57, 0.0 }
 0x8e9   :  { %5347 = vst [vmem:[#allocation9 + $0x60] sm:$0xff] %v5331_v56  ;;  %v5334_v40 = vmax.f32 %v5317_v53, 0.0 }
 0x8ea   :  { %5348 = vst [vmem:[#allocation9 + $0x68] sm:$0xff] %v5332_v5  ;;  %5349 = vst [vmem:[#allocation9 + $0x70] sm:$0xff] %v5333_v49 }
 0x8eb   :  { %5350 = vst [vmem:[#allocation9 + $0x78] sm:$0xff] %v5334_v40 }
 0x8ec   :  { %6250 = shalt.err (!%p6247_p0)
}
 0x8ed   :  { %s6251_s11 = scalar_lea.hbm %s9220_s18, 2048 }
 0x8ee   :  { %p6252_p1 = scmp.ne.s32.totalorder %s9220_s18, %s6251_s11  ;;  %p6255_p2 = scmp.lt.u32.totalorder %s6251_s11, %s9220_s18 }
 0x8f0   :  { %p6257_p3 = pnand %p6255_p2, %p6252_p1 }
 0x8f2   :  { %6260 = shalt.err (!%p6257_p3)
}
 0x8f3   :  { %5360 = dma.vmem_to_hbm [thread:$0]  %s5358_s8, 2048, %s9220_s18, [#allocation5]  }
 0x8f4   :  { %6265 = dma.done.wait [#allocation5], 2048  }
 0x8f5   :  { %6266 = vsyncadd [#allocation5], 4294965248 }
 0x8f6   :  { %5364 = vsyncpa [#allocation4], 1 }
 0x8f7   :  { %5365 = vsyncpa [#allocation7], 1 }
 0x8f8   :  { %5366 = vsyncpa [#allocation5], 1 }

</bundles_post_ra>
